<compile_context>
chip_gen: v7x
topology: tpu7x:2x2x1
jax: 0.10.0
libtpu: 0.0.40
codegen_flags: <defaults>
</compile_context>

<pallas_src>
import functools

import jax
import jax.numpy as jnp
from jax.experimental import pallas as pl
from jax.experimental.pallas import tpu as pltpu


# ----------------------------- activations ---------------------------------


def _hswish(x):
    return x * jnp.clip(x + 3.0, 0.0, 6.0) / 6.0


def _hsigmoid(x):
    return jnp.clip(x + 3.0, 0.0, 6.0) / 6.0


def _act(x, use_hs):
    return _hswish(x) if use_hs else jnp.maximum(x, 0.0)


# ------------------------------- kernel -------------------------------------


def fused_bottleneck_kernel(
        x_ref, w_exp_ref, b_exp_ref, w_dw_ref, bn2s_ref, bn2b_ref,
        w_se1_ref, b_se1_ref, w_se2_ref, b_se2_ref, w_proj_ref, b_proj_ref,
        o_ref, xp_ref, *,
        K, S, H, W, Ho, Wo, pad, lpad, use_hs, use_se, identity):
    """Whole MobileBottleneck for one batch image, all intermediates in VMEM."""
    x = x_ref[0]                                   # (H, W, Cin)
    Cin = x.shape[-1]
    C2 = w_exp_ref.shape[1]

    # ---- stage 1: fused conv1 || dense_connect (1x1 conv + folded BN + act)
    xf = x.reshape(H * W, Cin)
    y = jnp.dot(xf, w_exp_ref[...], preferred_element_type=jnp.float32)
    y = _act(y + b_exp_ref[...], use_hs)           # (H*W, C2)

    # ---- stage 2: depthwise KxK conv + folded BN, zero-padding in VMEM
    # Re-zero every grid step (keeps the halo correct on every core), then
    # write the interior at a sublane-aligned column offset (lpad % 8 == 0).
    xp_ref[...] = jnp.zeros_like(xp_ref)
    xp_ref[pad:pad + H, lpad:lpad + W, :] = y.reshape(H, W, C2)
    xp = xp_ref[...]                               # (Hp, Wp_s, C2)

    w_dw = w_dw_ref[...]                           # (K*K, C2)
    acc = jnp.zeros((Ho, Wo, C2), jnp.float32)
    for kh in range(K):                            # static tap loop on the VPU
        for kw in range(K):
            r0 = kh
            c0 = lpad - pad + kw
            tap = xp[r0:r0 + (Ho - 1) * S + 1:S,
                     c0:c0 + (Wo - 1) * S + 1:S, :]
            wt = w_dw[kh * K + kw:kh * K + kw + 1, :].reshape(1, 1, C2)
            acc = acc + tap * wt
    y2 = acc.reshape(Ho * Wo, C2) * bn2s_ref[...] + bn2b_ref[...]

    # ---- stage 3: squeeze-and-excite (global avg pool + 2 tiny FCs)
    if use_se:
        pooled = jnp.mean(y2, axis=0, keepdims=True)            # (1, C2)
        s1 = jnp.maximum(
            jnp.dot(pooled, w_se1_ref[...],
                    preferred_element_type=jnp.float32) + b_se1_ref[...], 0.0)
        s2 = _hsigmoid(
            jnp.dot(s1, w_se2_ref[...],
                    preferred_element_type=jnp.float32) + b_se2_ref[...])
        y2 = y2 * s2
    y2 = _act(y2, use_hs)

    # ---- stage 4: 1x1 projection + folded BN (+ identity residual)
    out = jnp.dot(y2, w_proj_ref[...],
                  preferred_element_type=jnp.float32) + b_proj_ref[...]
    if identity:
        out = out + xf          # valid: identity => stride==1 and Cin==oup
    o_ref[0] = out


# ------------------------------ wrapper --------------------------------------


def mobile_bottleneck_forward(x_nchw, p, *, kernel_size, stride, use_se, use_hs,
                              identity):
    K, S = kernel_size, stride
    x = jnp.transpose(x_nchw, (0, 2, 3, 1)).astype(jnp.float32)   # NHWC
    N, H, W, Cin = x.shape
    C2 = p["w_exp"].shape[1]
    Cr = p["w_se1"].shape[1]
    oup = p["w_proj"].shape[1]

    pad = (K - 1) // 2
    Ho = (H + 2 * pad - K) // S + 1
    Wo = (W + 2 * pad - K) // S + 1

    if identity:
        assert S == 1 and Cin == oup, \
            "identity residual requires stride==1 and inp==oup"

    # scratch for the zero-padded depthwise input; interior stored at a
    # sublane-aligned column offset so the store is a clean unmasked vst.
    lpad = 8 if pad > 0 else 0
    Hp = H + 2 * pad
    Wp = lpad + W + pad

    kernel = functools.partial(
        fused_bottleneck_kernel, K=K, S=S, H=H, W=W, Ho=Ho, Wo=Wo,
        pad=pad, lpad=lpad, use_hs=use_hs, use_se=use_se, identity=identity)

    out = pl.pallas_call(
        kernel,
        grid=(N,),
        in_specs=[
            pl.BlockSpec((1, H, W, Cin), lambda b: (b, 0, 0, 0)),
            pl.BlockSpec((Cin, C2), lambda b: (0, 0)),
            pl.BlockSpec((1, C2), lambda b: (0, 0)),
            pl.BlockSpec((K * K, C2), lambda b: (0, 0)),
            pl.BlockSpec((1, C2), lambda b: (0, 0)),
            pl.BlockSpec((1, C2), lambda b: (0, 0)),
            pl.BlockSpec((C2, Cr), lambda b: (0, 0)),
            pl.BlockSpec((1, Cr), lambda b: (0, 0)),
            pl.BlockSpec((Cr, C2), lambda b: (0, 0)),
            pl.BlockSpec((1, C2), lambda b: (0, 0)),
            pl.BlockSpec((C2, oup), lambda b: (0, 0)),
            pl.BlockSpec((1, oup), lambda b: (0, 0)),
        ],
        out_specs=pl.BlockSpec((1, Ho * Wo, oup), lambda b: (b, 0, 0)),
        out_shape=jax.ShapeDtypeStruct((N, Ho * Wo, oup), jnp.float32),
        scratch_shapes=[pltpu.VMEM((Hp, Wp, C2), jnp.float32)],
        compiler_params=pltpu.CompilerParams(
            dimension_semantics=("parallel",)),    # batch images independent
    )(x, p["w_exp"], p["b_exp"], p["w_dw"], p["bn2_s"], p["bn2_b"],
      p["w_se1"], p["b_se1"], p["w_se2"], p["b_se2"], p["w_proj"], p["b_proj"])

    return jnp.transpose(out.reshape(N, Ho, Wo, oup), (0, 3, 1, 2))   # NCHW


# ------------------------- parameter construction ----------------------------


def make_raw_params(key, inp, oup, hidden, K):
    C2 = 2 * hidden
    Cr = C2 // 4
    keys = iter(jax.random.split(key, 32))

    def nrm(shape, scale=0.1):
        return scale * jax.random.normal(next(keys), shape, jnp.float32)

    def bn_params(n):
        gamma = jax.random.uniform(next(keys), (n,), jnp.float32, 0.5, 1.5)
        beta = nrm((n,))
        mean = nrm((n,))
        var = jax.random.uniform(next(keys), (n,), jnp.float32, 0.5, 1.5)
        return (gamma, beta, mean, var)

    return dict(
        w1=nrm((hidden, inp)), bn1=bn_params(hidden),
        wdc=nrm((hidden, inp)), bn_dc=bn_params(hidden),
        wdw=nrm((C2, K, K)), bn2=bn_params(C2),
        w_se1=nrm((Cr, C2)), b_se1=nrm((Cr,)),
        w_se2=nrm((C2, Cr)), b_se2=nrm((C2,)),
        w3=nrm((oup, C2)), bn3=bn_params(oup),
    )


def fold_params(raw, eps=1e-5):
    def scale_bias(bn):
        g, b, m, v = bn
        s = g / jnp.sqrt(v + eps)
        return s, b - m * s

    s1, b1 = scale_bias(raw["bn1"])
    sdc, bdc = scale_bias(raw["bn_dc"])
    s2, bb2 = scale_bias(raw["bn2"])
    s3, bb3 = scale_bias(raw["bn3"])

    w_exp = jnp.concatenate(
        [(raw["w1"] * s1[:, None]).T, (raw["wdc"] * sdc[:, None]).T], axis=1)
    b_exp = jnp.concatenate([b1, bdc])[None, :]

    C2, K, _ = raw["wdw"].shape
    w_dw = jnp.transpose(raw["wdw"], (1, 2, 0)).reshape(K * K, C2)  # taps x C2

    return dict(
        w_exp=w_exp, b_exp=b_exp,
        w_dw=w_dw,
        bn2_s=s2[None, :], bn2_b=bb2[None, :],
        w_se1=raw["w_se1"].T, b_se1=raw["b_se1"][None, :],
        w_se2=raw["w_se2"].T, b_se2=raw["b_se2"][None, :],
        w_proj=(raw["w3"] * s3[:, None]).T, b_proj=bb3[None, :],
    )


# ------------------------------ reference ------------------------------------


def ref_forward(x_nchw, raw, K, S, use_se, use_hs, identity, eps=1e-5):
    hi = jax.lax.Precision.HIGHEST
    x = jnp.transpose(x_nchw, (0, 2, 3, 1)).astype(jnp.float32)

    def conv1x1(t, w):  # w: (cout, cin)
        return jnp.einsum("nhwc,oc->nhwo", t, w, precision=hi)

    def bn(t, prm):
        g, b, m, v = prm
        return (t - m) * (g / jnp.sqrt(v + eps)) + b

    act = (lambda t: _act(t, use_hs))

    y = act(bn(conv1x1(x, raw["w1"]), raw["bn1"]))
    z = act(bn(conv1x1(x, raw["wdc"]), raw["bn_dc"]))
    y = jnp.concatenate([y, z], axis=-1)

    pad = (K - 1) // 2
    yp = jnp.pad(y, ((0, 0), (pad, pad), (pad, pad), (0, 0)))
    N, Hp, Wp, C2 = yp.shape
    Ho = (Hp - K) // S + 1
    Wo = (Wp - K) // S + 1
    dw = jnp.zeros((N, Ho, Wo, C2), jnp.float32)
    for kh in range(K):
        for kw in range(K):
            dw = dw + (yp[:, kh:kh + (Ho - 1) * S + 1:S,
                          kw:kw + (Wo - 1) * S + 1:S, :]
                       * raw["wdw"][:, kh, kw])
    dw = bn(dw, raw["bn2"])
    if use_se:
        pooled = jnp.mean(dw, axis=(1, 2), keepdims=True)
        s1 = jnp.maximum(
            jnp.einsum("nijc,rc->nijr", pooled, raw["w_se1"], precision=hi)
            + raw["b_se1"], 0.0)
        s2 = _hsigmoid(
            jnp.einsum("nijr,cr->nijc", s1, raw["w_se2"], precision=hi)
            + raw["b_se2"])
        dw = dw * s2
    dw = act(dw)

    out = bn(conv1x1(dw, raw["w3"]), raw["bn3"])
    if identity:
        out = out + x
    return jnp.transpose(out, (0, 3, 1, 2))


# -------------------------------- main ----------------------------------------


if __name__ == "__main__":
    inp, oup, hidden = 8, 8, 16
    kernel_size, stride = 3, 1
    use_se, use_hs = True, True
    identity = (stride == 1 and inp == oup)
    N, H, W = 2, 16, 16

    key = jax.random.PRNGKey(0)
    kx, kp = jax.random.split(key)
    x = jax.random.normal(kx, (N, inp, H, W), jnp.float32)

    raw = make_raw_params(kp, inp, oup, hidden, kernel_size)
    params = fold_params(raw)

    out = mobile_bottleneck_forward(
        x, params, kernel_size=kernel_size, stride=stride,
        use_se=use_se, use_hs=use_hs, identity=identity)
    out = jax.block_until_ready(out)

    assert out.shape == (N, oup, H, W), out.shape

    ref = ref_forward(x, raw, kernel_size, stride, use_se, use_hs, identity)
    if not jnp.allclose(out, ref, atol=5e-2, rtol=5e-2):
        max_err = float(jnp.max(jnp.abs(out - ref)))
        raise AssertionError(f"Pallas output mismatch vs reference, max abs err={max_err}")

    print("KERNEL_OK")
</pallas_src>

<mosaic_0001>
module attributes {stable_mosaic.version = 11 : i64} {
  func.func @fused_bottleneck_kernel(%arg0: i32, %arg1: memref<1x16x16x8xf32, #tpu.memory_space<vmem>>, %arg2: memref<8x32xf32, #tpu.memory_space<vmem>>, %arg3: memref<1x32xf32, #tpu.memory_space<vmem>>, %arg4: memref<9x32xf32, #tpu.memory_space<vmem>>, %arg5: memref<1x32xf32, #tpu.memory_space<vmem>>, %arg6: memref<1x32xf32, #tpu.memory_space<vmem>>, %arg7: memref<32x8xf32, #tpu.memory_space<vmem>>, %arg8: memref<1x8xf32, #tpu.memory_space<vmem>>, %arg9: memref<8x32xf32, #tpu.memory_space<vmem>>, %arg10: memref<1x32xf32, #tpu.memory_space<vmem>>, %arg11: memref<32x8xf32, #tpu.memory_space<vmem>>, %arg12: memref<1x8xf32, #tpu.memory_space<vmem>>, %arg13: memref<1x256x8xf32, #tpu.memory_space<vmem>>, %arg14: memref<18x25x32xf32, #tpu.memory_space<vmem>>) attributes {dimension_semantics = [#tpu.dimension_semantics<parallel>], iteration_bounds = array<i64: 2>, scalar_prefetch = 0 : i64, scratch_operands = 1 : i64, tpu.core_type = #tpu.core_type<tc>, window_params = [{transform_indices = @transform_0, window_bounds = array<i64: 1, 16, 16, 8>}, {pipeline_mode = #tpu.pipeline_mode<synchronous>, transform_indices = @transform_1, window_bounds = array<i64: 8, 32>}, {pipeline_mode = #tpu.pipeline_mode<synchronous>, transform_indices = @transform_2, window_bounds = array<i64: 1, 32>}, {pipeline_mode = #tpu.pipeline_mode<synchronous>, transform_indices = @transform_3, window_bounds = array<i64: 9, 32>}, {pipeline_mode = #tpu.pipeline_mode<synchronous>, transform_indices = @transform_4, window_bounds = array<i64: 1, 32>}, {pipeline_mode = #tpu.pipeline_mode<synchronous>, transform_indices = @transform_5, window_bounds = array<i64: 1, 32>}, {pipeline_mode = #tpu.pipeline_mode<synchronous>, transform_indices = @transform_6, window_bounds = array<i64: 32, 8>}, {pipeline_mode = #tpu.pipeline_mode<synchronous>, transform_indices = @transform_7, window_bounds = array<i64: 1, 8>}, {pipeline_mode = #tpu.pipeline_mode<synchronous>, transform_indices = @transform_8, window_bounds = array<i64: 8, 32>}, {pipeline_mode = #tpu.pipeline_mode<synchronous>, transform_indices = @transform_9, window_bounds = array<i64: 1, 32>}, {pipeline_mode = #tpu.pipeline_mode<synchronous>, transform_indices = @transform_10, window_bounds = array<i64: 32, 8>}, {pipeline_mode = #tpu.pipeline_mode<synchronous>, transform_indices = @transform_11, window_bounds = array<i64: 1, 8>}, {transform_indices = @transform_12, window_bounds = array<i64: 1, 256, 8>}]} {
    %c0 = arith.constant 0 : index
    %c0_0 = arith.constant 0 : index
    %c0_1 = arith.constant 0 : index
    %c0_2 = arith.constant 0 : index
    %0 = vector.load %arg1[%c0, %c0_0, %c0_1, %c0_2] : memref<1x16x16x8xf32, #tpu.memory_space<vmem>>, vector<1x16x16x8xf32>
    %1 = vector.shape_cast %0 : vector<1x16x16x8xf32> to vector<16x16x8xf32>
    %2 = vector.shape_cast %1 : vector<16x16x8xf32> to vector<256x8xf32>
    %c0_3 = arith.constant 0 : index
    %c0_4 = arith.constant 0 : index
    %3 = vector.load %arg2[%c0_3, %c0_4] : memref<8x32xf32, #tpu.memory_space<vmem>>, vector<8x32xf32>
    %cst = arith.constant dense<0.000000e+00> : vector<256x32xf32>
    %4 = tpu.matmul %2, %3, %cst {dimension_numbers = #tpu.dot_dimension_numbers<[1], [0], [0], [1], [0, 0, 1, 1], [], []>} : vector<256x8xf32>, vector<8x32xf32>, vector<256x32xf32> -> vector<256x32xf32>
    %c0_5 = arith.constant 0 : index
    %c0_6 = arith.constant 0 : index
    %5 = vector.load %arg3[%c0_5, %c0_6] : memref<1x32xf32, #tpu.memory_space<vmem>>, vector<1x32xf32>
    %6 = vector.broadcast %5 : vector<1x32xf32> to vector<256x32xf32>
    %7 = arith.addf %4, %6 : vector<256x32xf32>
    %cst_7 = arith.constant 3.000000e+00 : f32
    %8 = vector.broadcast %cst_7 : f32 to vector<256x32xf32>
    %9 = arith.addf %7, %8 : vector<256x32xf32>
    %cst_8 = arith.constant 0.000000e+00 : f32
    %cst_9 = arith.constant 6.000000e+00 : f32
    %10 = vector.broadcast %cst_8 : f32 to vector<256x32xf32>
    %11 = arith.maximumf %10, %9 : vector<256x32xf32>
    %12 = vector.broadcast %cst_9 : f32 to vector<256x32xf32>
    %13 = arith.minimumf %12, %11 : vector<256x32xf32>
    %14 = arith.mulf %7, %13 : vector<256x32xf32>
    %cst_10 = arith.constant 6.000000e+00 : f32
    %15 = vector.broadcast %cst_10 : f32 to vector<256x32xf32>
    %16 = arith.divf %14, %15 : vector<256x32xf32>
    %cst_11 = arith.constant 0.000000e+00 : f32
    %17 = vector.broadcast %cst_11 : f32 to vector<18x25x32xf32>
    %c0_12 = arith.constant 0 : index
    %c0_13 = arith.constant 0 : index
    %c0_14 = arith.constant 0 : index
    %18 = vector.load %arg14[%c0_12, %c0_13, %c0_14] : memref<18x25x32xf32, #tpu.memory_space<vmem>>, vector<18x25x32xf32>
    tpu.vector_store %arg14[%c0_12, %c0_13, %c0_14], %17 {strides = array<i32>} : memref<18x25x32xf32, #tpu.memory_space<vmem>>, vector<18x25x32xf32>,
    %19 = vector.shape_cast %16 : vector<256x32xf32> to vector<16x16x32xf32>
    %c1 = arith.constant 1 : index
    %c8 = arith.constant 8 : index
    %c0_15 = arith.constant 0 : index
    %20 = vector.load %arg14[%c1, %c8, %c0_15] : memref<18x25x32xf32, #tpu.memory_space<vmem>>, vector<16x16x32xf32>
    tpu.vector_store %arg14[%c1, %c8, %c0_15], %19 {strides = array<i32>} : memref<18x25x32xf32, #tpu.memory_space<vmem>>, vector<16x16x32xf32>,
    %c0_16 = arith.constant 0 : index
    %c0_17 = arith.constant 0 : index
    %c0_18 = arith.constant 0 : index
    %21 = vector.load %arg14[%c0_16, %c0_17, %c0_18] : memref<18x25x32xf32, #tpu.memory_space<vmem>>, vector<18x25x32xf32>
    %c0_19 = arith.constant 0 : index
    %c0_20 = arith.constant 0 : index
    %22 = vector.load %arg4[%c0_19, %c0_20] : memref<9x32xf32, #tpu.memory_space<vmem>>, vector<9x32xf32>
    %cst_21 = arith.constant 0.000000e+00 : f32
    %23 = vector.broadcast %cst_21 : f32 to vector<16x16x32xf32>
    %24 = vector.extract_strided_slice %21 {offsets = [0, 7, 0], sizes = [16, 16, 32], strides = [1, 1, 1]} : vector<18x25x32xf32> to vector<16x16x32xf32>
    %25 = vector.extract_strided_slice %22 {offsets = [0, 0], sizes = [1, 32], strides = [1, 1]} : vector<9x32xf32> to vector<1x32xf32>
    %26 = vector.shape_cast %25 : vector<1x32xf32> to vector<1x1x32xf32>
    %27 = vector.broadcast %26 : vector<1x1x32xf32> to vector<16x16x32xf32>
    %28 = arith.mulf %24, %27 : vector<16x16x32xf32>
    %29 = arith.addf %23, %28 : vector<16x16x32xf32>
    %30 = vector.extract_strided_slice %21 {offsets = [0, 8, 0], sizes = [16, 16, 32], strides = [1, 1, 1]} : vector<18x25x32xf32> to vector<16x16x32xf32>
    %31 = vector.extract_strided_slice %22 {offsets = [1, 0], sizes = [1, 32], strides = [1, 1]} : vector<9x32xf32> to vector<1x32xf32>
    %32 = vector.shape_cast %31 : vector<1x32xf32> to vector<1x1x32xf32>
    %33 = vector.broadcast %32 : vector<1x1x32xf32> to vector<16x16x32xf32>
    %34 = arith.mulf %30, %33 : vector<16x16x32xf32>
    %35 = arith.addf %29, %34 : vector<16x16x32xf32>
    %36 = vector.extract_strided_slice %21 {offsets = [0, 9, 0], sizes = [16, 16, 32], strides = [1, 1, 1]} : vector<18x25x32xf32> to vector<16x16x32xf32>
    %37 = vector.extract_strided_slice %22 {offsets = [2, 0], sizes = [1, 32], strides = [1, 1]} : vector<9x32xf32> to vector<1x32xf32>
    %38 = vector.shape_cast %37 : vector<1x32xf32> to vector<1x1x32xf32>
    %39 = vector.broadcast %38 : vector<1x1x32xf32> to vector<16x16x32xf32>
    %40 = arith.mulf %36, %39 : vector<16x16x32xf32>
    %41 = arith.addf %35, %40 : vector<16x16x32xf32>
    %42 = vector.extract_strided_slice %21 {offsets = [1, 7, 0], sizes = [16, 16, 32], strides = [1, 1, 1]} : vector<18x25x32xf32> to vector<16x16x32xf32>
    %43 = vector.extract_strided_slice %22 {offsets = [3, 0], sizes = [1, 32], strides = [1, 1]} : vector<9x32xf32> to vector<1x32xf32>
    %44 = vector.shape_cast %43 : vector<1x32xf32> to vector<1x1x32xf32>
    %45 = vector.broadcast %44 : vector<1x1x32xf32> to vector<16x16x32xf32>
    %46 = arith.mulf %42, %45 : vector<16x16x32xf32>
    %47 = arith.addf %41, %46 : vector<16x16x32xf32>
    %48 = vector.extract_strided_slice %21 {offsets = [1, 8, 0], sizes = [16, 16, 32], strides = [1, 1, 1]} : vector<18x25x32xf32> to vector<16x16x32xf32>
    %49 = vector.extract_strided_slice %22 {offsets = [4, 0], sizes = [1, 32], strides = [1, 1]} : vector<9x32xf32> to vector<1x32xf32>
    %50 = vector.shape_cast %49 : vector<1x32xf32> to vector<1x1x32xf32>
    %51 = vector.broadcast %50 : vector<1x1x32xf32> to vector<16x16x32xf32>
    %52 = arith.mulf %48, %51 : vector<16x16x32xf32>
    %53 = arith.addf %47, %52 : vector<16x16x32xf32>
    %54 = vector.extract_strided_slice %21 {offsets = [1, 9, 0], sizes = [16, 16, 32], strides = [1, 1, 1]} : vector<18x25x32xf32> to vector<16x16x32xf32>
    %55 = vector.extract_strided_slice %22 {offsets = [5, 0], sizes = [1, 32], strides = [1, 1]} : vector<9x32xf32> to vector<1x32xf32>
    %56 = vector.shape_cast %55 : vector<1x32xf32> to vector<1x1x32xf32>
    %57 = vector.broadcast %56 : vector<1x1x32xf32> to vector<16x16x32xf32>
    %58 = arith.mulf %54, %57 : vector<16x16x32xf32>
    %59 = arith.addf %53, %58 : vector<16x16x32xf32>
    %60 = vector.extract_strided_slice %21 {offsets = [2, 7, 0], sizes = [16, 16, 32], strides = [1, 1, 1]} : vector<18x25x32xf32> to vector<16x16x32xf32>
    %61 = vector.extract_strided_slice %22 {offsets = [6, 0], sizes = [1, 32], strides = [1, 1]} : vector<9x32xf32> to vector<1x32xf32>
    %62 = vector.shape_cast %61 : vector<1x32xf32> to vector<1x1x32xf32>
    %63 = vector.broadcast %62 : vector<1x1x32xf32> to vector<16x16x32xf32>
    %64 = arith.mulf %60, %63 : vector<16x16x32xf32>
    %65 = arith.addf %59, %64 : vector<16x16x32xf32>
    %66 = vector.extract_strided_slice %21 {offsets = [2, 8, 0], sizes = [16, 16, 32], strides = [1, 1, 1]} : vector<18x25x32xf32> to vector<16x16x32xf32>
    %67 = vector.extract_strided_slice %22 {offsets = [7, 0], sizes = [1, 32], strides = [1, 1]} : vector<9x32xf32> to vector<1x32xf32>
    %68 = vector.shape_cast %67 : vector<1x32xf32> to vector<1x1x32xf32>
    %69 = vector.broadcast %68 : vector<1x1x32xf32> to vector<16x16x32xf32>
    %70 = arith.mulf %66, %69 : vector<16x16x32xf32>
    %71 = arith.addf %65, %70 : vector<16x16x32xf32>
    %72 = vector.extract_strided_slice %21 {offsets = [2, 9, 0], sizes = [16, 16, 32], strides = [1, 1, 1]} : vector<18x25x32xf32> to vector<16x16x32xf32>
    %73 = vector.extract_strided_slice %22 {offsets = [8, 0], sizes = [1, 32], strides = [1, 1]} : vector<9x32xf32> to vector<1x32xf32>
    %74 = vector.shape_cast %73 : vector<1x32xf32> to vector<1x1x32xf32>
    %75 = vector.broadcast %74 : vector<1x1x32xf32> to vector<16x16x32xf32>
    %76 = arith.mulf %72, %75 : vector<16x16x32xf32>
    %77 = arith.addf %71, %76 : vector<16x16x32xf32>
    %78 = vector.shape_cast %77 : vector<16x16x32xf32> to vector<256x32xf32>
    %c0_22 = arith.constant 0 : index
    %c0_23 = arith.constant 0 : index
    %79 = vector.load %arg5[%c0_22, %c0_23] : memref<1x32xf32, #tpu.memory_space<vmem>>, vector<1x32xf32>
    %80 = vector.broadcast %79 : vector<1x32xf32> to vector<256x32xf32>
    %81 = arith.mulf %78, %80 : vector<256x32xf32>
    %c0_24 = arith.constant 0 : index
    %c0_25 = arith.constant 0 : index
    %82 = vector.load %arg6[%c0_24, %c0_25] : memref<1x32xf32, #tpu.memory_space<vmem>>, vector<1x32xf32>
    %83 = vector.broadcast %82 : vector<1x32xf32> to vector<256x32xf32>
    %84 = arith.addf %81, %83 : vector<256x32xf32>
    %cst_26 = arith.constant dense<0.000000e+00> : vector<32xf32>
    %85 = vector.multi_reduction <add>, %84, %cst_26 [0] : vector<256x32xf32> to vector<32xf32>
    %86 = vector.shape_cast %85 : vector<32xf32> to vector<1x32xf32>
    %cst_27 = arith.constant 2.560000e+02 : f32
    %87 = vector.broadcast %cst_27 : f32 to vector<1x32xf32>
    %88 = arith.divf %86, %87 : vector<1x32xf32>
    %c0_28 = arith.constant 0 : index
    %c0_29 = arith.constant 0 : index
    %89 = vector.load %arg7[%c0_28, %c0_29] : memref<32x8xf32, #tpu.memory_space<vmem>>, vector<32x8xf32>
    %cst_30 = arith.constant dense<0.000000e+00> : vector<1x8xf32>
    %90 = tpu.matmul %88, %89, %cst_30 {dimension_numbers = #tpu.dot_dimension_numbers<[1], [0], [0], [1], [0, 0, 1, 1], [], []>} : vector<1x32xf32>, vector<32x8xf32>, vector<1x8xf32> -> vector<1x8xf32>
    %c0_31 = arith.constant 0 : index
    %c0_32 = arith.constant 0 : index
    %91 = vector.load %arg8[%c0_31, %c0_32] : memref<1x8xf32, #tpu.memory_space<vmem>>, vector<1x8xf32>
    %92 = arith.addf %90, %91 : vector<1x8xf32>
    %cst_33 = arith.constant 0.000000e+00 : f32
    %93 = vector.broadcast %cst_33 : f32 to vector<1x8xf32>
    %94 = arith.maximumf %92, %93 : vector<1x8xf32>
    %c0_34 = arith.constant 0 : index
    %c0_35 = arith.constant 0 : index
    %95 = vector.load %arg9[%c0_34, %c0_35] : memref<8x32xf32, #tpu.memory_space<vmem>>, vector<8x32xf32>
    %cst_36 = arith.constant dense<0.000000e+00> : vector<1x32xf32>
    %96 = tpu.matmul %94, %95, %cst_36 {dimension_numbers = #tpu.dot_dimension_numbers<[1], [0], [0], [1], [0, 0, 1, 1], [], []>} : vector<1x8xf32>, vector<8x32xf32>, vector<1x32xf32> -> vector<1x32xf32>
    %c0_37 = arith.constant 0 : index
    %c0_38 = arith.constant 0 : index
    %97 = vector.load %arg10[%c0_37, %c0_38] : memref<1x32xf32, #tpu.memory_space<vmem>>, vector<1x32xf32>
    %98 = arith.addf %96, %97 : vector<1x32xf32>
    %cst_39 = arith.constant 3.000000e+00 : f32
    %99 = vector.broadcast %cst_39 : f32 to vector<1x32xf32>
    %100 = arith.addf %98, %99 : vector<1x32xf32>
    %cst_40 = arith.constant 0.000000e+00 : f32
    %cst_41 = arith.constant 6.000000e+00 : f32
    %101 = vector.broadcast %cst_40 : f32 to vector<1x32xf32>
    %102 = arith.maximumf %101, %100 : vector<1x32xf32>
    %103 = vector.broadcast %cst_41 : f32 to vector<1x32xf32>
    %104 = arith.minimumf %103, %102 : vector<1x32xf32>
    %cst_42 = arith.constant 6.000000e+00 : f32
    %105 = vector.broadcast %cst_42 : f32 to vector<1x32xf32>
    %106 = arith.divf %104, %105 : vector<1x32xf32>
    %107 = vector.broadcast %106 : vector<1x32xf32> to vector<256x32xf32>
    %108 = arith.mulf %84, %107 : vector<256x32xf32>
    %cst_43 = arith.constant 3.000000e+00 : f32
    %109 = vector.broadcast %cst_43 : f32 to vector<256x32xf32>
    %110 = arith.addf %108, %109 : vector<256x32xf32>
    %cst_44 = arith.constant 0.000000e+00 : f32
    %cst_45 = arith.constant 6.000000e+00 : f32
    %111 = vector.broadcast %cst_44 : f32 to vector<256x32xf32>
    %112 = arith.maximumf %111, %110 : vector<256x32xf32>
    %113 = vector.broadcast %cst_45 : f32 to vector<256x32xf32>
    %114 = arith.minimumf %113, %112 : vector<256x32xf32>
    %115 = arith.mulf %108, %114 : vector<256x32xf32>
    %cst_46 = arith.constant 6.000000e+00 : f32
    %116 = vector.broadcast %cst_46 : f32 to vector<256x32xf32>
    %117 = arith.divf %115, %116 : vector<256x32xf32>
    %c0_47 = arith.constant 0 : index
    %c0_48 = arith.constant 0 : index
    %118 = vector.load %arg11[%c0_47, %c0_48] : memref<32x8xf32, #tpu.memory_space<vmem>>, vector<32x8xf32>
    %cst_49 = arith.constant dense<0.000000e+00> : vector<256x8xf32>
    %119 = tpu.matmul %117, %118, %cst_49 {dimension_numbers = #tpu.dot_dimension_numbers<[1], [0], [0], [1], [0, 0, 1, 1], [], []>} : vector<256x32xf32>, vector<32x8xf32>, vector<256x8xf32> -> vector<256x8xf32>
    %c0_50 = arith.constant 0 : index
    %c0_51 = arith.constant 0 : index
    %120 = vector.load %arg12[%c0_50, %c0_51] : memref<1x8xf32, #tpu.memory_space<vmem>>, vector<1x8xf32>
    %121 = vector.broadcast %120 : vector<1x8xf32> to vector<256x8xf32>
    %122 = arith.addf %119, %121 : vector<256x8xf32>
    %123 = arith.addf %122, %2 : vector<256x8xf32>
    %c0_52 = arith.constant 0 : index
    %c0_53 = arith.constant 0 : index
    %c0_54 = arith.constant 0 : index
    %124 = vector.load %arg13[%c0_52, %c0_53, %c0_54] : memref<1x256x8xf32, #tpu.memory_space<vmem>>, vector<1x256x8xf32>
    %125 = vector.shape_cast %124 : vector<1x256x8xf32> to vector<256x8xf32>
    %126 = vector.shape_cast %123 : vector<256x8xf32> to vector<1x256x8xf32>
    tpu.vector_store %arg13[%c0_52, %c0_53, %c0_54], %126 {strides = array<i32>} : memref<1x256x8xf32, #tpu.memory_space<vmem>>, vector<1x256x8xf32>,
    return
  }
  func.func @transform_0(%arg0: i32) -> (i32, i32, i32, i32) {
    %c0_i32 = arith.constant 0 : i32
    %c0_i32_0 = arith.constant 0 : i32
    %c0_i32_1 = arith.constant 0 : i32
    %c0_i32_2 = arith.constant 0 : i32
    return %arg0, %c0_i32, %c0_i32_0, %c0_i32_1 : i32, i32, i32, i32
  }
  func.func @transform_1(%arg0: i32) -> (i32, i32) {
    %c0_i32 = arith.constant 0 : i32
    %c0_i32_0 = arith.constant 0 : i32
    %c0_i32_1 = arith.constant 0 : i32
    return %c0_i32, %c0_i32_0 : i32, i32
  }
  func.func @transform_2(%arg0: i32) -> (i32, i32) {
    %c0_i32 = arith.constant 0 : i32
    %c0_i32_0 = arith.constant 0 : i32
    %c0_i32_1 = arith.constant 0 : i32
    return %c0_i32, %c0_i32_0 : i32, i32
  }
  func.func @transform_3(%arg0: i32) -> (i32, i32) {
    %c0_i32 = arith.constant 0 : i32
    %c0_i32_0 = arith.constant 0 : i32
    %c0_i32_1 = arith.constant 0 : i32
    return %c0_i32, %c0_i32_0 : i32, i32
  }
  func.func @transform_4(%arg0: i32) -> (i32, i32) {
    %c0_i32 = arith.constant 0 : i32
    %c0_i32_0 = arith.constant 0 : i32
    %c0_i32_1 = arith.constant 0 : i32
    return %c0_i32, %c0_i32_0 : i32, i32
  }
  func.func @transform_5(%arg0: i32) -> (i32, i32) {
    %c0_i32 = arith.constant 0 : i32
    %c0_i32_0 = arith.constant 0 : i32
    %c0_i32_1 = arith.constant 0 : i32
    return %c0_i32, %c0_i32_0 : i32, i32
  }
  func.func @transform_6(%arg0: i32) -> (i32, i32) {
    %c0_i32 = arith.constant 0 : i32
    %c0_i32_0 = arith.constant 0 : i32
    %c0_i32_1 = arith.constant 0 : i32
    return %c0_i32, %c0_i32_0 : i32, i32
  }
  func.func @transform_7(%arg0: i32) -> (i32, i32) {
    %c0_i32 = arith.constant 0 : i32
    %c0_i32_0 = arith.constant 0 : i32
    %c0_i32_1 = arith.constant 0 : i32
    return %c0_i32, %c0_i32_0 : i32, i32
  }
  func.func @transform_8(%arg0: i32) -> (i32, i32) {
    %c0_i32 = arith.constant 0 : i32
    %c0_i32_0 = arith.constant 0 : i32
    %c0_i32_1 = arith.constant 0 : i32
    return %c0_i32, %c0_i32_0 : i32, i32
  }
  func.func @transform_9(%arg0: i32) -> (i32, i32) {
    %c0_i32 = arith.constant 0 : i32
    %c0_i32_0 = arith.constant 0 : i32
    %c0_i32_1 = arith.constant 0 : i32
    return %c0_i32, %c0_i32_0 : i32, i32
  }
  func.func @transform_10(%arg0: i32) -> (i32, i32) {
    %c0_i32 = arith.constant 0 : i32
    %c0_i32_0 = arith.constant 0 : i32
    %c0_i32_1 = arith.constant 0 : i32
    return %c0_i32, %c0_i32_0 : i32, i32
  }
  func.func @transform_11(%arg0: i32) -> (i32, i32) {
    %c0_i32 = arith.constant 0 : i32
    %c0_i32_0 = arith.constant 0 : i32
    %c0_i32_1 = arith.constant 0 : i32
    return %c0_i32, %c0_i32_0 : i32, i32
  }
  func.func @transform_12(%arg0: i32) -> (i32, i32, i32) {
    %c0_i32 = arith.constant 0 : i32
    %c0_i32_0 = arith.constant 0 : i32
    %c0_i32_1 = arith.constant 0 : i32
    return %arg0, %c0_i32, %c0_i32_0 : i32, i32, i32
  }
}

</mosaic_0001>

<bundles_post_ra>
// kernel: tpu_custom_call.1
= control target key start
LH: loop header
LB: loop body
LE: loop exit
PB: predicated region body
PF: predicated region fallthrough
CT: control target
= control target key end

     0   :  { %s4421_s21 = smov 0   ;;  %s7074_s0 = inlined_call_operand.vmem [shape: f32[2,16,16,8], index: 0, kind: input, shape index: {}]   ;;  %s7075_s1 = inlined_call_operand.vmem [shape: f32[8,32], index: 1, kind: input, shape index: {}]   ;;  %s7076_s2 = inlined_call_operand.vmem [shape: f32[1,32], index: 2, kind: input, shape index: {}]   ;;  %s7077_s3 = inlined_call_operand.vmem [shape: f32[9,32], index: 3, kind: input, shape index: {}]   ;;  %s7078_s4 = inlined_call_operand.vmem [shape: f32[1,32], index: 4, kind: input, shape index: {}]   ;;  %s7079_s5 = inlined_call_operand.vmem [shape: f32[1,32], index: 5, kind: input, shape index: {}]   ;;  %s7080_s6 = inlined_call_operand.vmem [shape: f32[32,8], index: 6, kind: input, shape index: {}]   ;;  %s7081_s7 = inlined_call_operand.vmem [shape: f32[1,8], index: 7, kind: input, shape index: {}]   ;;  %s7082_s8 = inlined_call_operand.vmem [shape: f32[8,32], index: 8, kind: input, shape index: {}]   ;;  %s7083_s9 = inlined_call_operand.vmem [shape: f32[1,32], index: 9, kind: input, shape index: {}]   ;;  %s7084_s10 = inlined_call_operand.vmem [shape: f32[32,8], index: 10, kind: input, shape index: {}]   ;;  %s7085_s11 = inlined_call_operand.vmem [shape: f32[1,8], index: 11, kind: input, shape index: {}]   ;;  %s7086_s12 = inlined_call_operand.vmem [shape: f32[2,256,8], index: 12, kind: output, shape index: {}]  }
   0x1 LB: > { %s3999_s22 = sadd.s32 4294967295, %s4351_s21   ;;  %p4003_p0 = scmp.ge.s32.totalorder %s4351_s21, 1  ;;  %s4351_s21 = sphi %s4421_s21, %s22_s21  }
   0x2   : > { %p362_p1 = scmp.lt.s32.totalorder %s4351_s21, 3 }
   0x4   : > { %p363_p2 = pnand %p4003_p0, %p362_p1 }
   0x6   : > { %366 = sbr.rel (%p363_p2) target bundleno = 1398 (0x576), region = 68 }
   0xd   : > { %v446_v0 = vld [vmem:[%s7075_s1] sm:$0xff]  ;;  %p404_p3 = scmp.lt.s32.totalorder %s3999_s22, 1  ;;  %vm454_vm0 = vcmask 64512   ;;  %vm937_vm1 = vcmask 261120   ;;  %v7088_v33 = vmov 0.0   ;;  %vm941_vm2 = vcmask 253952  }
   0xe   : > { %4159 = vmatprep.subr.mxu0 %v446_v0  ;;  %940 = vst.msk [vmem:[#allocation2 + $0x10] sm:$0xff] %vm937_vm1, %v7088_v33  ;;  %945 = vst.msk [vmem:[#allocation2 + $0x30] sm:$0xff] %vm937_vm1, %v7088_v33  ;;  %4220 = vmatprep.subr.mxu1 %v7088_v33  ;;  %v4654_v34 = vld [vmem:[%s7076_s2] ss:$0 sm:$0xff]  ;;  %v1118_v35 = vlaneseq  ;;  %vm1286_vm3 = vcmask 1046528   ;;  %vm1531_vm4 = vcmask 1045504  }
   0xf   : > { %4160 = vmatpush3.msra.mxu0 %v446_v0  ;;  %s7538_s22 = smov (!%p404_p3, %s3999_s22), 1  ;;  %938 = vst.msk [vmem:[#allocation2] sm:$0xff] %vm937_vm1, %v7088_v33  ;;  %939 = vst.msk [vmem:[#allocation2 + $0x8] sm:$0xff] %vm937_vm1, %v7088_v33  ;;  %v4666_v51 = vld [vmem:[%s7077_s3] sm:$0xff]  ;;  %vm2932_vm5 = vcmask 1040384   ;;  %vm4355_vm6 = vmmov 0  }
  0x10   : > { %s4081_s25 = sshll.u32 %s7538_s22, 8  ;;  %943 = vst.msk [vmem:[#allocation2 + $0x20] sm:$0xff] %vm937_vm1, %v7088_v33  ;;  %944 = vst.msk [vmem:[#allocation2 + $0x28] sm:$0xff] %vm937_vm1, %v7088_v33  ;;  %v4657_v39 = vshrl.u32 %v1118_v35, 7 }
  0x11   : > { %s4440_s28 = scalar_lea.vmem %s7074_s0, %s4081_s25  ;;  %947 = vst.msk [vmem:[#allocation2 + $0x40] sm:$0xff] %vm937_vm1, %v7088_v33  ;;  %948 = vst.msk [vmem:[#allocation2 + $0x48] sm:$0xff] %vm937_vm1, %v7088_v33  ;;  %s6942_s17 = scalar_lea.vmem %s7086_s12, %s4081_s25 }
  0x12   : > { %v414_v1 = vld [vmem:[%s4440_s28] sm:$0xff]  ;;  %v415_v2 = vld [vmem:[%s4440_s28 + $0x8] sm:$0xff]  ;;  %v416_v3 = vld [vmem:[%s4440_s28 + $0x10] sm:$0xff]  ;;  %949 = vst.msk [vmem:[#allocation2 + $0x50] sm:$0xff] %vm937_vm1, %v7088_v33  ;;  %v1220_v47 = vsub.s32 1, %v4657_v39  ;;  %v1433_v57 = vsub.s32 2, %v4657_v39 }
  0x13   : > { %4161 = vmatprep.mubr.msk.f32.mxu0 %vm454_vm0, %v414_v1  ;;  %v417_v4 = vld [vmem:[%s4440_s28 + $0x18] sm:$0xff]  ;;  %v418_v5 = vld [vmem:[%s4440_s28 + $0x20] sm:$0xff]  ;;  %v419_v6 = vld [vmem:[%s4440_s28 + $0x28] sm:$0xff]  ;;  %951 = vst.msk [vmem:[#allocation2 + $0x60] sm:$0xff] %vm937_vm1, %v7088_v33  ;;  %v1710_v35 = vsub.s32 3, %v4657_v39 }
  0x14   : > { %4162 = vmatmul.mubr.msk.f32.vlgmr.msra.gmra.mrb[0].mxu0 %vm454_vm0, %v415_v2  ;;  %v420_v7 = vld [vmem:[%s4440_s28 + $0x30] sm:$0xff]  ;;  %v421_v8 = vld [vmem:[%s4440_s28 + $0x38] sm:$0xff]  ;;  %v422_v9 = vld [vmem:[%s4440_s28 + $0x40] sm:$0xff]  ;;  %952 = vst.msk [vmem:[#allocation2 + $0x68] sm:$0xff] %vm937_vm1, %v7088_v33  ;;  %v4671_v61 = vrot.slane %v4666_v51, %v1220_v47 }
  0x15   : > { %4164 = vmatprep.mubr.msk.f32.mxu0 %vm454_vm0, %v416_v3  ;;  %v423_v10 = vld [vmem:[%s4440_s28 + $0x48] sm:$0xff]  ;;  %v424_v11 = vld [vmem:[%s4440_s28 + $0x50] sm:$0xff]  ;;  %v425_v12 = vld [vmem:[%s4440_s28 + $0x58] sm:$0xff]  ;;  %953 = vst.msk [vmem:[#allocation2 + $0x70] sm:$0xff] %vm937_vm1, %v7088_v33  ;;  %v7087_v3 = vsub.s32 0, %v4657_v39 }
  0x16   : > { %v426_v13 = vld [vmem:[%s4440_s28 + $0x60] sm:$0xff]  ;;  %v427_v14 = vld [vmem:[%s4440_s28 + $0x68] sm:$0xff]  ;;  %v428_v15 = vld [vmem:[%s4440_s28 + $0x70] sm:$0xff]  ;;  %955 = vst.msk [vmem:[#allocation2 + $0x80] sm:$0xff] %vm937_vm1, %v7088_v33 }
  0x17   : > { %v429_v16 = vld [vmem:[%s4440_s28 + $0x78] sm:$0xff]  ;;  %v430_v17 = vld [vmem:[%s4440_s28 + $0x80] sm:$0xff]  ;;  %v431_v18 = vld [vmem:[%s4440_s28 + $0x88] sm:$0xff]  ;;  %956 = vst.msk [vmem:[#allocation2 + $0x88] sm:$0xff] %vm937_vm1, %v7088_v33 }
  0x18   : > { %4165 = vmatmul.mubr.msk.f32.gmra.mrb[2].mxu0 %vm454_vm0, %v417_v4  ;;  %v432_v19 = vld [vmem:[%s4440_s28 + $0x90] sm:$0xff]  ;;  %v433_v20 = vld [vmem:[%s4440_s28 + $0x98] sm:$0xff]  ;;  %v434_v21 = vld [vmem:[%s4440_s28 + $0xa0] sm:$0xff]  ;;  %957 = vst.msk [vmem:[#allocation2 + $0x90] sm:$0xff] %vm937_vm1, %v7088_v33 }
  0x19   : > { %4167 = vmatprep.mubr.msk.f32.mxu0 %vm454_vm0, %v418_v5  ;;  %v435_v22 = vld [vmem:[%s4440_s28 + $0xa8] sm:$0xff]  ;;  %v436_v23 = vld [vmem:[%s4440_s28 + $0xb0] sm:$0xff]  ;;  %v437_v24 = vld [vmem:[%s4440_s28 + $0xb8] sm:$0xff]  ;;  %959 = vst.msk [vmem:[#allocation2 + $0xa0] sm:$0xff] %vm937_vm1, %v7088_v33 }
  0x1a   : > { %v438_v25 = vld [vmem:[%s4440_s28 + $0xc0] sm:$0xff]  ;;  %v439_v26 = vld [vmem:[%s4440_s28 + $0xc8] sm:$0xff]  ;;  %v440_v27 = vld [vmem:[%s4440_s28 + $0xd0] sm:$0xff]  ;;  %960 = vst.msk [vmem:[#allocation2 + $0xa8] sm:$0xff] %vm937_vm1, %v7088_v33 }
  0x1b   : > { %v441_v28 = vld [vmem:[%s4440_s28 + $0xd8] sm:$0xff]  ;;  %v442_v29 = vld [vmem:[%s4440_s28 + $0xe0] sm:$0xff]  ;;  %v443_v30 = vld [vmem:[%s4440_s28 + $0xe8] sm:$0xff]  ;;  %961 = vst.msk [vmem:[#allocation2 + $0xb0] sm:$0xff] %vm937_vm1, %v7088_v33 }
  0x1c   : > { %4168 = vmatmul.mubr.msk.f32.gmra.mrb[4].mxu0 %vm454_vm0, %v419_v6  ;;  %v444_v31 = vld [vmem:[%s4440_s28 + $0xf0] sm:$0xff]  ;;  %v445_v32 = vld [vmem:[%s4440_s28 + $0xf8] sm:$0xff]  ;;  %963 = vst.msk [vmem:[#allocation2 + $0xc0] sm:$0xff] %vm937_vm1, %v7088_v33  ;;  %964 = vst.msk [vmem:[#allocation2 + $0xc8] sm:$0xff] %vm937_vm1, %v7088_v33 }
  0x1d   : > { %4170 = vmatprep.mubr.msk.f32.mxu0 %vm454_vm0, %v420_v7  ;;  %965 = vst.msk [vmem:[#allocation2 + $0xd0] sm:$0xff] %vm937_vm1, %v7088_v33  ;;  %967 = vst.msk [vmem:[#allocation2 + $0xe0] sm:$0xff] %vm937_vm1, %v7088_v33  ;;  %v1046_v2 = vld [vmem:[#allocation2 + $0x10] sm:$0xff]  ;;  %v1045_v7 = vld [vmem:[#allocation2 + $0x8] sm:$0xff] }
  0x1e   : > { %968 = vst.msk [vmem:[#allocation2 + $0xe8] sm:$0xff] %vm937_vm1, %v7088_v33  ;;  %969 = vst.msk [vmem:[#allocation2 + $0xf0] sm:$0xff] %vm937_vm1, %v7088_v33 }
  0x1f   : > { %971 = vst.msk [vmem:[#allocation2 + $0x100] sm:$0xff] %vm937_vm1, %v7088_v33  ;;  %972 = vst.msk [vmem:[#allocation2 + $0x108] sm:$0xff] %vm937_vm1, %v7088_v33 }
  0x20   : > { %4171 = vmatmul.mubr.msk.f32.gmra.mrb[6].mxu0 %vm454_vm0, %v421_v8  ;;  %973 = vst.msk [vmem:[#allocation2 + $0x110] sm:$0xff] %vm937_vm1, %v7088_v33  ;;  %975 = vst.msk [vmem:[#allocation2 + $0x120] sm:$0xff] %vm937_vm1, %v7088_v33 }
  0x21   : > { %4173 = vmatprep.mubr.msk.f32.mxu0 %vm454_vm0, %v422_v9  ;;  %976 = vst.msk [vmem:[#allocation2 + $0x128] sm:$0xff] %vm937_vm1, %v7088_v33  ;;  %977 = vst.msk [vmem:[#allocation2 + $0x130] sm:$0xff] %vm937_vm1, %v7088_v33 }
  0x22   : > { %979 = vst.msk [vmem:[#allocation2 + $0x140] sm:$0xff] %vm937_vm1, %v7088_v33  ;;  %980 = vst.msk [vmem:[#allocation2 + $0x148] sm:$0xff] %vm937_vm1, %v7088_v33 }
  0x23   : > { %981 = vst.msk [vmem:[#allocation2 + $0x150] sm:$0xff] %vm937_vm1, %v7088_v33  ;;  %983 = vst.msk [vmem:[#allocation2 + $0x160] sm:$0xff] %vm937_vm1, %v7088_v33 }
  0x24   : > { %4174 = vmatmul.mubr.msk.f32.gmra.mrb[8].mxu0 %vm454_vm0, %v423_v10  ;;  %984 = vst.msk [vmem:[#allocation2 + $0x168] sm:$0xff] %vm937_vm1, %v7088_v33  ;;  %985 = vst.msk [vmem:[#allocation2 + $0x170] sm:$0xff] %vm937_vm1, %v7088_v33 }
  0x25   : > { %4176 = vmatprep.mubr.msk.f32.mxu0 %vm454_vm0, %v424_v11  ;;  %987 = vst.msk [vmem:[#allocation2 + $0x180] sm:$0xff] %vm937_vm1, %v7088_v33  ;;  %988 = vst.msk [vmem:[#allocation2 + $0x188] sm:$0xff] %vm937_vm1, %v7088_v33  ;;  %v4679_v11 = vrot.slane %v4666_v51, %v1433_v57 }
  0x26   : > { %989 = vst.msk [vmem:[#allocation2 + $0x190] sm:$0xff] %vm937_vm1, %v7088_v33  ;;  %991 = vst.msk [vmem:[#allocation2 + $0x1a0] sm:$0xff] %vm937_vm1, %v7088_v33 }
  0x27   : > { %992 = vst.msk [vmem:[#allocation2 + $0x1a8] sm:$0xff] %vm937_vm1, %v7088_v33  ;;  %993 = vst.msk [vmem:[#allocation2 + $0x1b0] sm:$0xff] %vm937_vm1, %v7088_v33 }
  0x28   : > { %4177 = vmatmul.mubr.msk.f32.gmra.mrb[10].mxu0 %vm454_vm0, %v425_v12  ;;  %995 = vst.msk [vmem:[#allocation2 + $0x1c0] sm:$0xff] %vm937_vm1, %v7088_v33  ;;  %996 = vst.msk [vmem:[#allocation2 + $0x1c8] sm:$0xff] %vm937_vm1, %v7088_v33 }
  0x29   : > { %4179 = vmatprep.mubr.msk.f32.mxu0 %vm454_vm0, %v426_v13  ;;  %997 = vst.msk [vmem:[#allocation2 + $0x1d0] sm:$0xff] %vm937_vm1, %v7088_v33  ;;  %999 = vst.msk [vmem:[#allocation2 + $0x1e0] sm:$0xff] %vm937_vm1, %v7088_v33 }
  0x2a   : > { %1000 = vst.msk [vmem:[#allocation2 + $0x1e8] sm:$0xff] %vm937_vm1, %v7088_v33  ;;  %1001 = vst.msk [vmem:[#allocation2 + $0x1f0] sm:$0xff] %vm937_vm1, %v7088_v33 }
  0x2b   : > { %1003 = vst.msk [vmem:[#allocation2 + $0x200] sm:$0xff] %vm937_vm1, %v7088_v33  ;;  %1004 = vst.msk [vmem:[#allocation2 + $0x208] sm:$0xff] %vm937_vm1, %v7088_v33 }
  0x2c   : > { %4180 = vmatmul.mubr.msk.f32.gmra.mrb[12].mxu0 %vm454_vm0, %v427_v14  ;;  %1005 = vst.msk [vmem:[#allocation2 + $0x210] sm:$0xff] %vm937_vm1, %v7088_v33  ;;  %1007 = vst.msk [vmem:[#allocation2 + $0x220] sm:$0xff] %vm937_vm1, %v7088_v33 }
  0x2d   : > { %4182 = vmatprep.mubr.msk.f32.mxu0 %vm454_vm0, %v428_v15  ;;  %1008 = vst.msk [vmem:[#allocation2 + $0x228] sm:$0xff] %vm937_vm1, %v7088_v33  ;;  %1009 = vst.msk [vmem:[#allocation2 + $0x230] sm:$0xff] %vm937_vm1, %v7088_v33 }
  0x2e   : > { %942 = vst.msk [vmem:[#allocation2 + $0x18] sm:$0x1] %vm941_vm2, %v7088_v33  ;;  %946 = vst.msk [vmem:[#allocation2 + $0x38] sm:$0x1] %vm941_vm2, %v7088_v33 }
  0x2f   : > { %950 = vst.msk [vmem:[#allocation2 + $0x58] sm:$0x1] %vm941_vm2, %v7088_v33  ;;  %954 = vst.msk [vmem:[#allocation2 + $0x78] sm:$0x1] %vm941_vm2, %v7088_v33 }
  0x30   : > { %4183 = vmatmul.mubr.msk.f32.gmra.mrb[14].mxu0 %vm454_vm0, %v429_v16  ;;  %958 = vst.msk [vmem:[#allocation2 + $0x98] sm:$0x1] %vm941_vm2, %v7088_v33  ;;  %962 = vst.msk [vmem:[#allocation2 + $0xb8] sm:$0x1] %vm941_vm2, %v7088_v33  ;;  %v1223_v16 = vmul.f32 %v4671_v61, %v1046_v2 }
  0x31   : > { %4185 = vmatprep.mubr.msk.f32.mxu0 %vm454_vm0, %v430_v17  ;;  %966 = vst.msk [vmem:[#allocation2 + $0xd8] sm:$0x1] %vm941_vm2, %v7088_v33  ;;  %970 = vst.msk [vmem:[#allocation2 + $0xf8] sm:$0x1] %vm941_vm2, %v7088_v33 }
  0x32   : > { %974 = vst.msk [vmem:[#allocation2 + $0x118] sm:$0x1] %vm941_vm2, %v7088_v33  ;;  %978 = vst.msk [vmem:[#allocation2 + $0x138] sm:$0x1] %vm941_vm2, %v7088_v33 }
  0x33   : > { %982 = vst.msk [vmem:[#allocation2 + $0x158] sm:$0x1] %vm941_vm2, %v7088_v33  ;;  %986 = vst.msk [vmem:[#allocation2 + $0x178] sm:$0x1] %vm941_vm2, %v7088_v33 }
  0x34   : > { %4186 = vmatmul.mubr.msk.f32.gmra.mrb[16].mxu0 %vm454_vm0, %v431_v18  ;;  %990 = vst.msk [vmem:[#allocation2 + $0x198] sm:$0x1] %vm941_vm2, %v7088_v33  ;;  %994 = vst.msk [vmem:[#allocation2 + $0x1b8] sm:$0x1] %vm941_vm2, %v7088_v33 }
  0x35   : > { %4188 = vmatprep.mubr.msk.f32.mxu0 %vm454_vm0, %v432_v19  ;;  %998 = vst.msk [vmem:[#allocation2 + $0x1d8] sm:$0x1] %vm941_vm2, %v7088_v33  ;;  %1002 = vst.msk [vmem:[#allocation2 + $0x1f8] sm:$0x1] %vm941_vm2, %v7088_v33  ;;  %v1047_v15 = vld [vmem:[#allocation2 + $0x18] sm:$0x1]  ;;  %v4688_v19 = vrot.slane %v4666_v51, %v7087_v3 }
  0x36   : > { %1006 = vst.msk [vmem:[#allocation2 + $0x218] sm:$0x1] %vm941_vm2, %v7088_v33  ;;  %1010 = vst.msk [vmem:[#allocation2 + $0x238] sm:$0x1] %vm941_vm2, %v7088_v33 }
  0x37   : > { %7207 = vst [vmem:[#allocation3_spill] sm:$0xff] %v4657_v39 }
  0x38   : > { %4189 = vmatmul.mubr.msk.f32.gmra.mrb[18].mxu0 %vm454_vm0, %v433_v20  ;;  %v1222_v20 = vmul.f32 %v4671_v61, %v1045_v7 }
  0x39   : > { %4191 = vmatprep.mubr.msk.f32.mxu0 %vm454_vm0, %v434_v21 }
  0x3c   : > { %4192 = vmatmul.mubr.msk.f32.gmra.mrb[20].mxu0 %vm454_vm0, %v435_v22 }
  0x3d   : > { %4194 = vmatprep.mubr.msk.f32.mxu0 %vm454_vm0, %v436_v23  ;;  %v1044_v23 = vld [vmem:[#allocation2] sm:$0xff] }
  0x40   : > { %4195 = vmatmul.mubr.msk.f32.gmra.mrb[22].mxu0 %vm454_vm0, %v437_v24 }
  0x41   : > { %4197 = vmatprep.mubr.msk.f32.mxu0 %vm454_vm0, %v438_v25 }
  0x44   : > { %4198 = vmatmul.mubr.msk.f32.gmra.mrb[24].mxu0 %vm454_vm0, %v439_v26 }
  0x45   : > { %4200 = vmatprep.mubr.msk.f32.mxu0 %vm454_vm0, %v440_v27  ;;  %v1436_v27 = vmul.f32 %v4679_v11, %v1046_v2 }
  0x48   : > { %4201 = vmatmul.mubr.msk.f32.gmra.mrb[26].mxu0 %vm454_vm0, %v441_v28  ;;  %v1437_v28 = vmul.f32 %v4679_v11, %v1047_v15 }
  0x49   : > { %4203 = vmatprep.mubr.msk.f32.mxu0 %vm454_vm0, %v442_v29  ;;  %v2022_v29 = vsub.s32 5, %v4657_v39 }
  0x4a   : > { %v1535_v47 = vrot.slane %v1437_v28, 2 }
  0x4c   : > { %4204 = vmatmul.mubr.msk.f32.gmra.mrb[28].mxu0 %vm454_vm0, %v443_v30 }
  0x4d   : > { %4206 = vmatprep.mubr.msk.f32.mxu0 %vm454_vm0, %v444_v31 }
  0x50   : > { %4207 = vmatmul.mubr.msk.f32.gmra.mrb[30].mxu0 %vm454_vm0, %v445_v32  ;;  %v1288_v32 = vrot.slane %v1223_v16, 1  ;;  %v1052_v16 = vld [vmem:[#allocation2 + $0x40] sm:$0xff] }
  0xe7   : > { %v4163_v36 = vpop.f32.mrb[0].mxu0 }
  0xe8   : > { %v623_v37 = vadd.f32 %v4163_v36, %v4654_v34  ;;  %v617_v38 = vpop.f32.mrb[1].mxu0 }
  0xe9   : > { %v618_v40 = vadd.f32 %v4654_v34, %v617_v38  ;;  %v1287_v38 = vrot.slane %v1222_v20, 1 }
  0xea   : > { %v777_v41 = vadd.f32 3.0, %v623_v37 }
  0xeb   : > { %v776_v42 = vadd.f32 3.0, %v618_v40  ;;  %v4166_v43 = vpop.f32.mrb[2].mxu0 }
  0xec   : > { %v809_v44 = vmax.f32 %v777_v41, 0.0  ;;  %v633_v45 = vadd.f32 %v4166_v43, %v4654_v34  ;;  %v627_v46 = vpop.f32.mrb[3].mxu0 }
  0xed   : > { %v808_v48 = vmax.f32 %v776_v42, 0.0  ;;  %v628_v49 = vadd.f32 %v4654_v34, %v627_v46  ;;  %v1124_v42 = vmul.f32 %v4688_v19, %v1046_v2  ;;  %v1533_v46 = vrot.slane %v1436_v27, 2 }
  0xee   : > { %v841_v50 = vmin.f32 %v809_v44, 6.0  ;;  %v779_v52 = vadd.f32 3.0, %v633_v45  ;;  %v2298_v2 = vsub.s32 6, %v4657_v39 }
  0xef   : > { %v840_v53 = vmin.f32 %v808_v48, 6.0  ;;  %v778_v54 = vadd.f32 3.0, %v628_v49  ;;  %v4169_v55 = vpop.f32.mrb[4].mxu0  ;;  %v4707_v48 = vrot.slane %v4666_v51, %v2022_v29 }
  0xf0   : > { %v873_v56 = vmul.f32 %v841_v50, %v623_v37  ;;  %v811_v58 = vmax.f32 %v779_v52, 0.0  ;;  %v643_v59 = vadd.f32 %v4169_v55, %v4654_v34  ;;  %v637_v60 = vpop.f32.mrb[5].mxu0  ;;  %v1122_v37 = vmul.f32 %v4688_v19, %v1044_v23 }
  0xf1   : > { %v872_v62 = vmul.f32 %v840_v53, %v618_v40  ;;  %v810_v63 = vmax.f32 %v778_v54, 0.0  ;;  %v638_v0 = vadd.f32 %v4654_v34, %v637_v60  ;;  %v1435_v40 = vmul.f32 %v4679_v11, %v1045_v7  ;;  %7208 = vst [vmem:[#allocation4_spill] sm:$0xff] %v4707_v48 }
  0xf2   : > { %v906_v1 = vmul.f32 0.16666667, %v873_v56  ;;  %v843_v4 = vmin.f32 %v811_v58, 6.0  ;;  %v781_v5 = vadd.f32 3.0, %v643_v59  ;;  %v1123_v50 = vmul.f32 %v4688_v19, %v1045_v7 }
  0xf3   : > { %v905_v6 = vmul.f32 0.16666667, %v872_v62  ;;  %v842_v8 = vmin.f32 %v810_v63, 6.0  ;;  %v780_v9 = vadd.f32 3.0, %v638_v0  ;;  %v4675_v10 = vpop.f32.mrb[6].mxu0  ;;  %v4715_v52 = vrot.slane %v4666_v51, %v1710_v35 }
  0xf4   : > { %1013 = vst.msk [vmem:[#allocation2 + $0x30] sm:$0xff] %vm937_vm1, %v906_v1  ;;  %v875_v12 = vmul.f32 %v843_v4, %v633_v45  ;;  %v813_v13 = vmax.f32 %v781_v5, 0.0  ;;  %v4681_v14 = vpop.f32.mrb[7].mxu0  ;;  %v1051_v45 = vld [vmem:[#allocation2 + $0x38] sm:$0x1]  ;;  %v1289_v53 = vsel %vm1286_vm3, %v1287_v38, %v1288_v32  ;;  %v1383_v54 = vadd.f32 %v1287_v38, %v1122_v37 }
  0xf5   : > { %1012 = vst.msk [vmem:[#allocation2 + $0x28] sm:$0xff] %vm937_vm1, %v905_v6  ;;  %v874_v17 = vmul.f32 %v842_v8, %v628_v49  ;;  %v812_v18 = vmax.f32 %v780_v9, 0.0  ;;  %v1532_v55 = vrot.slane %v1435_v40, 2  ;;  %v1385_v56 = vadd.f32 %v1288_v32, %v1124_v42  ;;  %v1055_v4 = vld [vmem:[#allocation2 + $0x58] sm:$0x1] }
  0xf6   : > { %v908_v21 = vmul.f32 0.16666667, %v875_v12  ;;  %v845_v22 = vmin.f32 %v813_v13, 6.0  ;;  %v4719_v57 = vmul.f32 %v4679_v11, %v1051_v45  ;;  %v1810_v58 = vsub.s32 4, %v4657_v39  ;;  %v4734_v5 = vld [vmem:[%s7077_s3 + $0x8] ss:$0 sm:$0xff] }
  0xf7   : > { %v907_v24 = vmul.f32 0.16666667, %v874_v17  ;;  %v844_v25 = vmin.f32 %v812_v18, 6.0  ;;  %v4691_v26 = vpop.f32.mrb[8].mxu0  ;;  %v1536_v62 = vsel %vm1531_vm4, %v1533_v46, %v1535_v47  ;;  %v4726_v63 = vmul.f32 %v4707_v48, %v1051_v45  ;;  %v1059_v9 = vld [vmem:[#allocation2 + $0x78] sm:$0x1] }
  0xf8   : > { %1015 = vst.msk [vmem:[#allocation2 + $0x50] sm:$0xff] %vm937_vm1, %v908_v21  ;;  %v877_v30 = vmul.f32 %v845_v22, %v643_v59  ;;  %v4697_v31 = vpop.f32.mrb[9].mxu0  ;;  %v1048_v59 = vld [vmem:[#allocation2 + $0x20] sm:$0xff]  ;;  %v1384_v1 = vadd.f32 %v1289_v53, %v1123_v50  ;;  %v1534_v6 = vsel %vm1531_vm4, %v1532_v55, %v1533_v46  ;;  %v1660_v7 = vadd.f32 %v1532_v55, %v1383_v54  ;;  %v1067_v40 = vld [vmem:[#allocation2 + $0xb8] sm:$0x1] }
  0xf9   : > { %1014 = vst.msk [vmem:[#allocation2 + $0x48] sm:$0xff] %vm937_vm1, %v907_v24  ;;  %v876_v36 = vmul.f32 %v844_v25, %v638_v0  ;;  %v1712_v8 = vmul.f32 %v4715_v52, %v1048_v59  ;;  %v4739_v13 = vadd.f32 %v1536_v62, %v1385_v56  ;;  %v4742_v15 = vrot.slane %v4666_v51, %v1810_v58  ;;  %v1063_v24 = vld [vmem:[#allocation2 + $0x98] sm:$0x1]  ;;  %v1060_v58 = vld [vmem:[#allocation2 + $0x80] sm:$0xff] }
  0xfa   : > { %v910_v41 = vmul.f32 0.16666667, %v877_v30  ;;  %v2398_v17 = vsub.s32 7, %v4657_v39  ;;  %v4749_v21 = vmul.f32 %v4734_v5, %v1055_v4  ;;  %v4752_v22 = vmul.f32 %v4679_v11, %v1055_v4  ;;  %v1071_v55 = vld [vmem:[#allocation2 + $0xd8] sm:$0x1]  ;;  %v1068_v47 = vld [vmem:[#allocation2 + $0xc0] sm:$0xff] }
  0xfb   : > { %v909_v43 = vmul.f32 0.16666667, %v876_v36  ;;  %v4704_v44 = vpop.f32.mrb[10].mxu0  ;;  %v4755_v23 = vmul.f32 %v4707_v48, %v1055_v4  ;;  %v4760_v27 = vmul.f32 %v4688_v19, %v1048_v59  ;;  %v4762_v28 = vadd.f32 %v1534_v6, %v1384_v1  ;;  %v1056_v36 = vld [vmem:[#allocation2 + $0x60] sm:$0xff] }
  0xfc   : > { %1017 = vst.msk [vmem:[#allocation2 + $0x70] sm:$0xff] %vm937_vm1, %v910_v41  ;;  %v4710_v49 = vpop.f32.mrb[11].mxu0  ;;  %v4765_v29 = vrot.slane %v4666_v51, %v2298_v2  ;;  %v4768_v30 = vmul.f32 %v4734_v5, %v1059_v9  ;;  %v4771_v32 = vmul.f32 %v4688_v19, %v1052_v16  ;;  %v4773_v35 = vadd.f32 %v1712_v8, %v1660_v7  ;;  %v1064_v7 = vld [vmem:[#allocation2 + $0xa0] sm:$0xff]  ;;  %v1050_v8 = vld [vmem:[#allocation2 + $0x30] sm:$0xff] }
  0xfd   : > { %7209 = vst [vmem:[#allocation5_spill] sm:$0xff] %v4710_v49  ;;  %1016 = vst.msk [vmem:[#allocation2 + $0x68] sm:$0xff] %vm937_vm1, %v909_v43  ;;  %v4776_v37 = vmul.f32 %v4679_v11, %v1059_v9  ;;  %v4779_v38 = vmul.f32 %v4707_v48, %v1059_v9  ;;  %v4782_v41 = vmul.f32 %v4715_v52, %v1052_v16  ;;  %v1049_v9 = vld [vmem:[#allocation2 + $0x28] sm:$0xff] }
  0xfe   : > { %7214 = vst [vmem:[#allocation10_spill] sm:$0xff] %v4765_v29  ;;  %v4785_v42 = vmul.f32 %v4765_v29, %v1052_v16  ;;  %v4788_v43 = vrot.slane %v4666_v51, %v2398_v17  ;;  %v4791_v45 = vmul.f32 %v4734_v5, %v1063_v24  ;;  %v4799_v54 = vmul.f32 %v4679_v11, %v1063_v24 }
  0xff   : > { %v4722_v60 = vpop.f32.mrb[12].mxu0  ;;  %7215 = vst [vmem:[#allocation11_spill] sm:$0xff] %v4776_v37  ;;  %7216 = vst [vmem:[#allocation12_spill] sm:$0xff] %v4779_v38  ;;  %v4803_v51 = vmul.f32 %v4688_v19, %v1056_v36  ;;  %v4806_v59 = vmul.f32 %v4707_v48, %v1063_v24  ;;  %v4809_v62 = vmul.f32 %v4734_v5, %v1067_v40 }
 0x100   : > { %7210 = vst [vmem:[#allocation6_spill] sm:$0xff] %v4722_v60  ;;  %v4728_v0 = vpop.f32.mrb[13].mxu0  ;;  %7217 = vst [vmem:[#allocation13_spill] sm:$0xff] %v4788_v43  ;;  %v4812_v1 = vmul.f32 %v4715_v52, %v1056_v36  ;;  %v4815_v2 = vmul.f32 %v4765_v29, %v1056_v36  ;;  %v4821_v17 = vmul.f32 %v4679_v11, %v1067_v40 }
 0x101   : > { %7211 = vst [vmem:[#allocation7_spill] sm:$0xff] %v4728_v0  ;;  %7218 = vst [vmem:[#allocation14_spill] sm:$0xff] %v4791_v45  ;;  %v4824_v24 = vmul.f32 %v4707_v48, %v1067_v40  ;;  %v4827_v3 = vmul.f32 %v4734_v5, %v1071_v55  ;;  %v4830_v36 = vmul.f32 %v4688_v19, %v1060_v58 }
 0x102   : > { %7220 = vst [vmem:[#allocation16_spill] sm:$0xff] %v4799_v54  ;;  %7221 = vst [vmem:[#allocation17_spill] sm:$0xff] %v4806_v59  ;;  %v4833_v33 = vmul.f32 %v4715_v52, %v1060_v58  ;;  %v4836_v6 = vmul.f32 %v4765_v29, %v1060_v58  ;;  %v4843_v40 = vadd.f32 %v4675_v10, %v4654_v34  ;;  %v4858_v10 = vld [vmem:[#allocation2 + $0xf8] sm:$0x1] }
 0x103   : > { %v4745_v18 = vpop.f32.mrb[14].mxu0  ;;  %7222 = vst [vmem:[#allocation18_spill] sm:$0xff] %v4809_v62  ;;  %7223 = vst [vmem:[#allocation19_spill] sm:$0xff] %v4821_v17  ;;  %v4848_v53 = vmul.f32 %v4688_v19, %v1064_v7  ;;  %v1225_v20 = vmul.f32 %v4671_v61, %v1050_v8  ;;  %v1224_v58 = vmul.f32 %v4671_v61, %v1049_v9 }
 0x104   : > { %7212 = vst [vmem:[#allocation8_spill] sm:$0xff] %v4745_v18  ;;  %v4757_v25 = vpop.f32.mrb[15].mxu0  ;;  %7224 = vst [vmem:[#allocation20_spill] sm:$0xff] %v4824_v24  ;;  %v4853_v16 = vmul.f32 %v4715_v52, %v1064_v7  ;;  %v4856_v12 = vmul.f32 %v4765_v29, %v1064_v7  ;;  %v4873_v7 = vmul.f32 %v4688_v19, %v1068_v47  ;;  %v783_v50 = vadd.f32 3.0, %v4843_v40 }
 0x105   : > { %7213 = vst [vmem:[#allocation9_spill] sm:$0xff] %v4757_v25  ;;  %7225 = vst [vmem:[#allocation21_spill] sm:$0xff] %v4827_v3  ;;  %v1812_v25 = vmul.f32 %v4742_v15, %v1049_v9  ;;  %v1714_v56 = vmul.f32 %v4715_v52, %v1050_v8  ;;  %v4878_v39 = vmul.f32 %v4707_v48, %v1071_v55  ;;  %v1291_v24 = vrot.slane %v1225_v20, 1 }
 0x106   : > { %7226 = vst [vmem:[#allocation22_spill] sm:$0xff] %v4830_v36  ;;  %7227 = vst [vmem:[#allocation23_spill] sm:$0xff] %v4833_v33  ;;  %v4882_v3 = vmul.f32 %v4734_v5, %v4858_v10  ;;  %v1439_v18 = vmul.f32 %v4679_v11, %v1050_v8  ;;  %v1290_v17 = vrot.slane %v1224_v58, 1  ;;  %v4891_v62 = vmul.f32 %v4765_v29, %v1068_v47  ;;  %v4912_v58 = vld [vmem:[#allocation2 + $0xe0] sm:$0xff] }
 0x107   : > { %v4793_v46 = vpop.f32.mrb[16].mxu0  ;;  %7228 = vst [vmem:[#allocation24_spill] sm:$0xff] %v4836_v6  ;;  %7230 = vst [vmem:[#allocation26_spill] sm:$0xff] %v4848_v53  ;;  %v4870_v53 = vadd.f32 %v4654_v34, %v4681_v14  ;;  %v2025_v14 = vmul.f32 %v4707_v48, %v1050_v8  ;;  %v1876_v59 = vrot.slane %v1812_v25, 1  ;;  %v1762_v54 = vadd.f32 %v1714_v56, %v4739_v13 }
 0x108   : > { %7219 = vst [vmem:[#allocation15_spill] sm:$0xff] %v4793_v46  ;;  %v4839_v4 = vpop.f32.mrb[17].mxu0  ;;  %7231 = vst [vmem:[#allocation27_spill] sm:$0xff] %v4853_v16  ;;  %v1813_v46 = vmul.f32 %v4742_v15, %v1050_v8  ;;  %v1713_v16 = vmul.f32 %v4715_v52, %v1049_v9  ;;  %v815_v45 = vmax.f32 %v783_v50, 0.0  ;;  %v1538_v0 = vrot.slane %v1439_v18, 2 }
 0x109   : > { %7229 = vst [vmem:[#allocation25_spill] sm:$0xff] %v4839_v4  ;;  %7232 = vst [vmem:[#allocation28_spill] sm:$0xff] %v4856_v12  ;;  %v4864_v4 = vmul.f32 %v4679_v11, %v1071_v55  ;;  %v782_v20 = vadd.f32 3.0, %v4870_v53  ;;  %v1126_v55 = vmul.f32 %v4688_v19, %v1049_v9  ;;  %v4906_v13 = vadd.f32 %v4691_v26, %v4654_v34 }
 0x10a   : > { %7233 = vst [vmem:[#allocation29_spill] sm:$0xff] %v4858_v10  ;;  %7235 = vst [vmem:[#allocation31_spill] sm:$0xff] %v4873_v7  ;;  %v4888_v7 = vmul.f32 %v4715_v52, %v1068_v47  ;;  %v1877_v12 = vrot.slane %v1813_v46, 1  ;;  %v1438_v10 = vmul.f32 %v4679_v11, %v1049_v9  ;;  %v1292_v47 = vsel %vm1286_vm3, %v1290_v17, %v1291_v24 }
 0x10b   : > { %7234 = vst [vmem:[#allocation30_spill] sm:$0xff] %v4864_v4  ;;  %7236 = vst [vmem:[#allocation32_spill] sm:$0xff] %v4878_v39  ;;  %v1127_v46 = vmul.f32 %v4688_v19, %v1050_v8  ;;  %v1761_v25 = vadd.f32 %v1713_v16, %v4762_v28  ;;  %v4908_v50 = vpop.f32.mrb[18].mxu0  ;;  %v1386_v56 = vadd.f32 %v1290_v17, %v4760_v27  ;;  %v814_v36 = vmax.f32 %v782_v20, 0.0 }
 0x10c   : > { %7237 = vst [vmem:[#allocation33_spill] sm:$0xff] %v4882_v3  ;;  %7238 = vst [vmem:[#allocation34_spill] sm:$0xff] %v4888_v7  ;;  %v2121_v7 = vrot.slane %v2025_v14, 2  ;;  %v1537_v18 = vrot.slane %v1438_v10, 2  ;;  %v1878_v14 = vsel %vm1286_vm3, %v1876_v59, %v1877_v12  ;;  %v1974_v8 = vadd.f32 %v1877_v12, %v1762_v54  ;;  %v1053_v12 = vld [vmem:[#allocation2 + $0x48] sm:$0xff] }
 0x10d   : > { %7239 = vst [vmem:[#allocation35_spill] sm:$0xff] %v4891_v62  ;;  %v2024_v62 = vmul.f32 %v4707_v48, %v1049_v9  ;;  %7240 = vst [vmem:[#allocation36_spill] sm:$0xff] %v4908_v50  ;;  %v1388_v3 = vadd.f32 %v1291_v24, %v1127_v46  ;;  %v1387_v39 = vadd.f32 %v1292_v47, %v1126_v55  ;;  %v1054_v9 = vld [vmem:[#allocation2 + $0x50] sm:$0xff]  ;;  %v7241_v26 = vrot.slane %v4719_v57, 2 }
 0x10e   : > { %v4916_v28 = vadd.f32 %v4654_v34, %v4697_v31  ;;  %v7242_v27 = vrot.slane %v4726_v63, 2  ;;  %v847_v20 = vmin.f32 %v815_v45, 6.0  ;;  %v1972_v50 = vadd.f32 %v1876_v59, %v4773_v35 }
 0x10f   : > { %v1541_v16 = vsel %vm1531_vm4, %v1538_v0, %v7241_v26  ;;  %v2120_v10 = vrot.slane %v2024_v62, 2  ;;  %v1973_v24 = vadd.f32 %v1878_v14, %v1761_v25  ;;  %v4926_v54 = vadd.f32 3.0, %v4906_v13 }
 0x110   : > { %v2124_v17 = vsel %vm1531_vm4, %v2121_v7, %v7242_v27  ;;  %v4930_v31 = vmul.f32 %v4688_v19, %v4912_v58  ;;  %v1539_v57 = vsel %vm1531_vm4, %v1537_v18, %v1538_v0  ;;  %v1663_v55 = vadd.f32 %v1537_v18, %v1386_v56 }
 0x111   : > { %v4934_v63 = vmul.f32 %v4671_v61, %v1054_v9  ;;  %v846_v47 = vmin.f32 %v814_v36, 6.0  ;;  %v1665_v62 = vadd.f32 %v1541_v16, %v1388_v3  ;;  %v2250_v45 = vadd.f32 %v2124_v17, %v1974_v8 }
 0x112   : > { %7243 = vst [vmem:[#allocation37_spill] sm:$0xff] %v4930_v31  ;;  %v1664_v46 = vadd.f32 %v1539_v57, %v1387_v39  ;;  %v4937_v35 = vadd.f32 3.0, %v4916_v28  ;;  %v2122_v59 = vsel %vm1531_vm4, %v2120_v10, %v2121_v7  ;;  %v1130_v25 = vmul.f32 %v4688_v19, %v1054_v9 }
 0x113   : > { %v2401_v14 = vmul.f32 %v4788_v43, %v1054_v9  ;;  %v2400_v26 = vmul.f32 %v4788_v43, %v1053_v12  ;;  %v2248_v0 = vadd.f32 %v2120_v10, %v1972_v50  ;;  %v2249_v56 = vadd.f32 %v2122_v59, %v1973_v24 }
 0x114   : > { %v4944_v18 = vmul.f32 %v4679_v11, %v1054_v9  ;;  %v1815_v3 = vmul.f32 %v4742_v15, %v1054_v9  ;;  %v1763_v39 = vadd.f32 %v4782_v41, %v1663_v55  ;;  %v1294_v36 = vrot.slane %v4934_v63, 1  ;;  %v4959_v55 = vpop.f32.mrb[19].mxu0 }
 0x115   : > { %v1717_v8 = vmul.f32 %v4715_v52, %v1054_v9  ;;  %v4951_v7 = vmul.f32 %v4707_v48, %v1054_v9  ;;  %v2613_v16 = vmul.f32 %v4734_v5, %v1054_v9  ;;  %v1226_v27 = vmul.f32 %v4671_v61, %v1053_v12  ;;  %7244 = vst [vmem:[#allocation38_spill] sm:$0xff] %v4959_v55 }
 0x116   : > { %v1814_v50 = vmul.f32 %v4742_v15, %v1053_v12  ;;  %v2301_v17 = vmul.f32 %v4765_v29, %v1053_v12  ;;  %v2302_v10 = vmul.f32 %v4765_v29, %v1054_v9  ;;  %v2465_v24 = vrot.slane %v2401_v14, 1 }
 0x117   : > { %v2464_v57 = vrot.slane %v2400_v26, 1  ;;  %v2612_v41 = vmul.f32 %v4734_v5, %v1053_v12  ;;  %v2348_v63 = vadd.f32 %v4785_v42, %v2248_v0  ;;  %v1765_v59 = vadd.f32 %v1717_v8, %v1665_v62 }
 0x118   : > { %v1880_v31 = vrot.slane %v1815_v3, 1  ;;  %v2349_v4 = vadd.f32 %v2301_v17, %v2249_v56  ;;  %v2350_v6 = vadd.f32 %v2302_v10, %v2250_v45  ;;  %v4963_v33 = vmul.f32 %v4679_v11, %v1053_v12  ;;  %v1058_v10 = vld [vmem:[#allocation2 + $0x70] sm:$0xff] }
 0x119   : > { %v1716_v60 = vmul.f32 %v4715_v52, %v1053_v12  ;;  %v879_v38 = vmul.f32 %v847_v20, %v4843_v40  ;;  %v2709_v9 = vrot.slane %v2613_v16, 2  ;;  %v1293_v14 = vrot.slane %v1226_v27, 1 }
 0x11a   : > { %v1879_v26 = vrot.slane %v1814_v50, 1  ;;  %v2027_v37 = vmul.f32 %v4707_v48, %v1053_v12  ;;  %v2466_v55 = vsel %vm1286_vm3, %v2464_v57, %v2465_v24  ;;  %v2708_v49 = vrot.slane %v2612_v41, 2 }
 0x11b   : > { %v912_v42 = vmul.f32 0.16666667, %v879_v38  ;;  %v878_v62 = vmul.f32 %v846_v47, %v4870_v53  ;;  %v2126_v45 = vrot.slane %v4951_v7, 2  ;;  %v1764_v0 = vadd.f32 %v1716_v60, %v1664_v46 }
 0x11c   : > { %v2560_v56 = vadd.f32 %v2464_v57, %v2348_v63  ;;  %v2561_v3 = vadd.f32 %v2466_v55, %v2349_v4  ;;  %v2562_v8 = vadd.f32 %v2465_v24, %v2350_v6  ;;  %v1129_v17 = vmul.f32 %v4688_v19, %v1053_v12  ;;  %v4980_v4 = vpop.f32.mrb[20].mxu0  ;;  %v4985_v24 = vld [vmem:[#allocation2 + $0x68] sm:$0xff] }
 0x11d   : > { %v1542_v40 = vrot.slane %v4963_v33, 2  ;;  %1019 = vst.msk [vmem:[#allocation2 + $0x90] sm:$0xff] %vm937_vm1, %v912_v42  ;;  %v911_v20 = vmul.f32 0.16666667, %v878_v62  ;;  %v7245_v16 = vrot.slane %v4749_v21, 2  ;;  %v1295_v53 = vsel %vm1286_vm3, %v1293_v14, %v1294_v36 }
 0x11e   : > { %v1389_v47 = vadd.f32 %v1293_v14, %v4771_v32  ;;  %v817_v60 = vmax.f32 %v4926_v54, 0.0  ;;  %v1881_v6 = vsel %vm1286_vm3, %v1879_v26, %v1880_v31  ;;  %v1975_v12 = vadd.f32 %v1879_v26, %v1763_v39 }
 0x11f   : > { %v2712_v38 = vsel %vm1531_vm4, %v2709_v9, %v7245_v16  ;;  %v2125_v46 = vrot.slane %v2027_v37, 2  ;;  %v2710_v7 = vsel %vm1531_vm4, %v2708_v49, %v2709_v9  ;;  %1018 = vst.msk [vmem:[#allocation2 + $0x88] sm:$0xff] %vm937_vm1, %v911_v20  ;;  %v1976_v27 = vadd.f32 %v1881_v6, %v1764_v0 }
 0x120   : > { %v2836_v21 = vadd.f32 %v2708_v49, %v2560_v56  ;;  %v2837_v50 = vadd.f32 %v2710_v7, %v2561_v3  ;;  %v849_v57 = vmin.f32 %v817_v60, 6.0  ;;  %v1391_v32 = vadd.f32 %v1294_v36, %v1130_v25 }
 0x121   : > { %v1543_v54 = vrot.slane %v4944_v18, 2  ;;  %v2838_v41 = vadd.f32 %v2712_v38, %v2562_v8  ;;  %v4990_v55 = vmul.f32 %v4715_v52, %v4912_v58  ;;  %v1977_v37 = vadd.f32 %v1880_v31, %v1765_v59 }
 0x122   : > { %v1390_v39 = vadd.f32 %v1295_v53, %v1129_v17  ;;  %v1666_v63 = vadd.f32 %v1542_v40, %v1389_v47  ;;  %v881_v49 = vmul.f32 %v849_v57, %v4906_v13  ;;  %v2251_v9 = vadd.f32 %v2125_v46, %v1975_v12 }
 0x123   : > { %v2403_v14 = vmul.f32 %v4788_v43, %v1058_v10  ;;  %v2127_v26 = vsel %vm1531_vm4, %v2125_v46, %v2126_v45  ;;  %v2402_v25 = vmul.f32 %v4788_v43, %v4985_v24  ;;  %v2933_v18 = vrot.slane %v2836_v21, 7 }
 0x124   : > { %v2934_v36 = vrot.slane %v2837_v50, 7  ;;  %v2252_v42 = vadd.f32 %v2127_v26, %v1976_v27  ;;  %v914_v62 = vmul.f32 0.16666667, %v881_v49  ;;  %v2936_v0 = vrot.slane %v2838_v41, 7  ;;  %v5034_v26 = vpop.f32.mrb[21].mxu0 }
 0x125   : > { %v1133_v31 = vmul.f32 %v4688_v19, %v1058_v10  ;;  %v1229_v59 = vmul.f32 %v4671_v61, %v1058_v10  ;;  %v7246_v56 = vrot.slane %v4755_v23, 2  ;;  %v7247_v3 = vrot.slane %v4752_v22, 2 }
 0x126   : > { %v2616_v20 = vmul.f32 %v4734_v5, %v1058_v10  ;;  %v2304_v16 = vmul.f32 %v4765_v29, %v4985_v24  ;;  %1021 = vst.msk [vmem:[#allocation2 + $0xb0] sm:$0xff] %vm937_vm1, %v914_v62  ;;  %v5012_v38 = vmul.f32 %v4679_v11, %v1058_v10  ;;  %v2468_v53 = vrot.slane %v2403_v14, 1 }
 0x127   : > { %v2129_v13 = vsel %vm1531_vm4, %v2126_v45, %v7246_v56  ;;  %v1546_v8 = vsel %vm1531_vm4, %v1543_v54, %v7247_v3  ;;  %v2467_v47 = vrot.slane %v2402_v25, 1  ;;  %v2615_v23 = vmul.f32 %v4734_v5, %v4985_v24  ;;  %v5020_v45 = vld [vmem:[%s7078_s4] ss:$0 sm:$0xff] }
 0x128   : > { %v2253_v17 = vadd.f32 %v2129_v13, %v1977_v37  ;;  %v2935_v22 = vsel %vm2932_vm5, %v2933_v18, %v2934_v36  ;;  %v2305_v60 = vmul.f32 %v4765_v29, %v1058_v10  ;;  %v2351_v6 = vadd.f32 %v4815_v2, %v2251_v9  ;;  %v5040_v25 = vld [vmem:[%s7079_s5] ss:$0 sm:$0xff] }
 0x129   : > { %v2352_v12 = vadd.f32 %v2304_v16, %v2252_v42  ;;  %v2937_v46 = vsel %vm2932_vm5, %v2934_v36, %v2936_v0  ;;  %v1297_v7 = vrot.slane %v1229_v59, 1  ;;  %v1668_v27 = vadd.f32 %v1546_v8, %v1391_v32 }
 0x12a   : > { %v1817_v21 = vmul.f32 %v4742_v15, %v1058_v10  ;;  %v1720_v50 = vmul.f32 %v4715_v52, %v1058_v10  ;;  %v5028_v57 = vmul.f32 %v4707_v48, %v1058_v10  ;;  %v2353_v41 = vadd.f32 %v2305_v60, %v2253_v17 }
 0x12b   : > { %v2714_v37 = vrot.slane %v2616_v20, 2  ;;  %v3052_v49 = vmul.f32 %v5020_v45, %v2935_v22  ;;  %v1228_v14 = vmul.f32 %v4671_v61, %v4985_v24  ;;  %v2469_v2 = vsel %vm1286_vm3, %v2467_v47, %v2468_v53 }
 0x12c   : > { %v2713_v9 = vrot.slane %v2615_v23, 2  ;;  %v3053_v32 = vmul.f32 %v5020_v45, %v2937_v46  ;;  %v1548_v10 = vrot.slane %v5012_v38, 2  ;;  %v2563_v18 = vadd.f32 %v2467_v47, %v2351_v6 }
 0x12d   : > { %v2564_v36 = vadd.f32 %v2469_v2, %v2352_v12  ;;  %v1394_v42 = vadd.f32 %v1297_v7, %v1133_v31  ;;  %v1768_v62 = vadd.f32 %v1720_v50, %v1668_v27  ;;  %v1883_v0 = vrot.slane %v1817_v21, 1 }
 0x12e   : > { %v816_v59 = vmax.f32 %v4937_v35, 0.0  ;;  %v2131_v56 = vrot.slane %v5028_v57, 2  ;;  %v2565_v13 = vadd.f32 %v2468_v53, %v2353_v41  ;;  %v1544_v3 = vsel %vm1531_vm4, %v1542_v40, %v1543_v54  ;;  %v5075_v57 = vpop.f32.mrb[22].mxu0 }
 0x12f   : > { %v1816_v8 = vmul.f32 %v4742_v15, %v4985_v24  ;;  %v5051_v17 = vadd.f32 %v5040_v25, %v3052_v49  ;;  %v1296_v20 = vrot.slane %v1228_v14, 1  ;;  %v1667_v16 = vadd.f32 %v1544_v3, %v1390_v39 }
 0x130   : > { %v2715_v31 = vsel %vm1531_vm4, %v2713_v9, %v2714_v37  ;;  %v5055_v38 = vadd.f32 %v5040_v25, %v3053_v32  ;;  %v1766_v35 = vadd.f32 %v4812_v1, %v1666_v63  ;;  %v2839_v53 = vadd.f32 %v2713_v9, %v2563_v18 }
 0x131   : > { %7248 = vst [vmem:[#allocation39_spill] sm:$0xff] %v5051_v17  ;;  %v2840_v47 = vadd.f32 %v2715_v31, %v2564_v36  ;;  %v7250_v33 = vrot.slane %v4768_v30, 2  ;;  %v1719_v54 = vmul.f32 %v4715_v52, %v4985_v24  ;;  %v848_v23 = vmin.f32 %v816_v59, 6.0 }
 0x132   : > { %7249 = vst [vmem:[#allocation40_spill] sm:$0xff] %v5055_v38  ;;  %v673_v39 = vadd.f32 %v4704_v44, %v4654_v34  ;;  %v1444_v60 = vmul.f32 %v4679_v11, %v4985_v24  ;;  %v1882_v6 = vrot.slane %v1816_v8, 1  ;;  %v2030_v1 = vmul.f32 %v4707_v48, %v4985_v24 }
 0x133   : > { %v2717_v40 = vsel %vm1531_vm4, %v2714_v37, %v7250_v33  ;;  %v3123_v30 = vsel %vm937_vm1, %v5051_v17, 0.0  ;;  %v1298_v63 = vsel %vm1286_vm3, %v1296_v20, %v1297_v7  ;;  %v1392_v12 = vadd.f32 %v1296_v20, %v4803_v51  ;;  %v7251_v51 = vld [vmem:[#allocation5_spill] sm:$0xff]  ;;  %v7256_v33 = vld [vmem:[#allocation6_spill] sm:$0xff] }
 0x134   : > { %v2841_v22 = vadd.f32 %v2717_v40, %v2565_v13  ;;  %v1767_v46 = vadd.f32 %v1719_v54, %v1667_v16  ;;  %v3124_v27 = vsel %vm937_vm1, %v5055_v38, 0.0  ;;  %v1978_v44 = vadd.f32 %v1882_v6, %v1766_v35  ;;  %v7252_v13 = vld [vmem:[#allocation11_spill] sm:$0xff]  ;;  %v7254_v16 = vld [vmem:[#allocation12_spill] sm:$0xff]  ;;  %v1062_v54 = vld [vmem:[#allocation2 + $0x90] sm:$0xff] }
 0x135   : > { %v2938_v21 = vrot.slane %v2839_v53, 7  ;;  %v2939_v50 = vrot.slane %v2840_v47, 7  ;;  %v1980_v41 = vadd.f32 %v1883_v0, %v1768_v62  ;;  %v1132_v37 = vmul.f32 %v4688_v19, %v4985_v24 }
 0x136   : > { %v880_v49 = vmul.f32 %v848_v23, %v4916_v28  ;;  %v787_v14 = vadd.f32 3.0, %v673_v39  ;;  %v2941_v2 = vrot.slane %v2841_v22, 7  ;;  %v1547_v7 = vrot.slane %v1444_v60, 2  ;;  %v1061_v60 = vld [vmem:[#allocation2 + $0x88] sm:$0xff] }
 0x137   : > { %v2130_v9 = vrot.slane %v2030_v1, 2  ;;  %v5082_v32 = vadd.f32 %v4654_v34, %v7251_v51  ;;  %v5084_v18 = vadd.f32 %v3124_v27, %v3123_v30  ;;  %v1393_v36 = vadd.f32 %v1298_v63, %v1132_v37  ;;  %v7257_v27 = vld [vmem:[#allocation23_spill] sm:$0xff] }
 0x138   : > { %v1884_v59 = vsel %vm1286_vm3, %v1882_v6, %v1883_v0  ;;  %v7253_v62 = vrot.slane %v7252_v13, 2  ;;  %v1669_v24 = vadd.f32 %v1547_v7, %v1392_v12  ;;  %v2940_v20 = vsel %vm2932_vm5, %v2938_v21, %v2939_v50  ;;  %v5098_v0 = vpop.f32.mrb[23].mxu0  ;;  %v7258_v21 = vld [vmem:[#allocation24_spill] sm:$0xff]  ;;  %v7259_v37 = vld [vmem:[#allocation7_spill] sm:$0xff] }
 0x139   : > { %v1979_v8 = vadd.f32 %v1884_v59, %v1767_v46  ;;  %v2254_v28 = vadd.f32 %v2130_v9, %v1978_v44  ;;  %v7255_v31 = vrot.slane %v7254_v16, 2  ;;  %v913_v53 = vmul.f32 0.16666667, %v880_v49 }
 0x13a   : > { %v1551_v3 = vsel %vm1531_vm4, %v1548_v10, %v7253_v62  ;;  %v819_v47 = vmax.f32 %v787_v14, 0.0  ;;  %v5096_v40 = vadd.f32 %v7256_v33, %v4654_v34  ;;  %v1549_v6 = vsel %vm1531_vm4, %v1547_v7, %v1548_v10 }
 0x13b   : > { %v2134_v35 = vsel %vm1531_vm4, %v2131_v56, %v7255_v31  ;;  %v1671_v23 = vadd.f32 %v1551_v3, %v1394_v42  ;;  %v786_v1 = vadd.f32 3.0, %v5082_v32  ;;  %v2942_v30 = vsel %vm2932_vm5, %v2939_v50, %v2941_v2  ;;  %1020 = vst.msk [vmem:[#allocation2 + $0xa8] sm:$0xff] %vm937_vm1, %v913_v53 }
 0x13c   : > { %v2256_v22 = vadd.f32 %v2134_v35, %v1980_v41  ;;  %v3054_v63 = vmul.f32 %v5020_v45, %v2940_v20  ;;  %v5104_v12 = vadd.f32 %v1549_v6, %v1393_v36  ;;  %v2132_v46 = vsel %vm1531_vm4, %v2130_v9, %v2131_v56  ;;  %v5127_v36 = vpop.f32.mrb[24].mxu0 }
 0x13d   : > { %v5109_v44 = vadd.f32 %v7257_v27, %v1669_v24  ;;  %v2255_v42 = vadd.f32 %v2132_v46, %v1979_v8  ;;  %v2354_v41 = vadd.f32 %v7258_v21, %v2254_v28  ;;  %v5114_v10 = vadd.f32 %v4654_v34, %v7259_v37  ;;  %v5140_v28 = vpop.f32.mrb[25].mxu0 }
 0x13e   : > { %v2405_v50 = vmul.f32 %v4788_v43, %v1062_v54  ;;  %v2404_v49 = vmul.f32 %v4788_v43, %v1061_v60  ;;  %v851_v14 = vmin.f32 %v819_v47, 6.0  ;;  %v5119_v2 = vadd.f32 3.0, %v5096_v40 }
 0x13f   : > { %v3055_v56 = vmul.f32 %v5020_v45, %v2942_v30  ;;  %v1136_v7 = vmul.f32 %v4688_v19, %v1062_v54  ;;  %v818_v9 = vmax.f32 %v786_v1, 0.0  ;;  %v5125_v51 = vmul.f32 %v4765_v29, %v4912_v58 }
 0x140   : > { %v5130_v34 = vadd.f32 %v5040_v25, %v3054_v63  ;;  %v1231_v59 = vmul.f32 %v4671_v61, %v1062_v54  ;;  %v5134_v13 = vmul.f32 %v4679_v11, %v1062_v54  ;;  %v883_v62 = vmul.f32 %v851_v14, %v673_v39 }
 0x141   : > { %v2308_v3 = vmul.f32 %v4765_v29, %v1062_v54  ;;  %v2619_v24 = vmul.f32 %v4734_v5, %v1062_v54  ;;  %v1230_v8 = vmul.f32 %v4671_v61, %v1061_v60  ;;  %v2307_v58 = vmul.f32 %v4765_v29, %v1061_v60 }
 0x142   : > { %7260 = vst [vmem:[#allocation5_spill] sm:$0xff] %v5130_v34  ;;  %v2471_v20 = vrot.slane %v2405_v50, 1  ;;  %v2470_v16 = vrot.slane %v2404_v49, 1  ;;  %v2618_v31 = vmul.f32 %v4734_v5, %v1061_v60  ;;  %v916_v35 = vmul.f32 0.16666667, %v883_v62 }
 0x143   : > { %v1723_v53 = vmul.f32 %v4715_v52, %v1062_v54  ;;  %v1819_v47 = vmul.f32 %v4742_v15, %v1062_v54  ;;  %v2355_v39 = vadd.f32 %v2307_v58, %v2255_v42  ;;  %v850_v33 = vmin.f32 %v818_v9, 6.0 }
 0x144   : > { %v5146_v6 = vadd.f32 %v5040_v25, %v3055_v56  ;;  %v1300_v1 = vrot.slane %v1231_v59, 1  ;;  %v5149_v30 = vmul.f32 %v4707_v48, %v1062_v54  ;;  %v2356_v63 = vadd.f32 %v2308_v3, %v2256_v22  ;;  %1023 = vst.msk [vmem:[#allocation2 + $0xd0] sm:$0xff] %vm937_vm1, %v916_v35 }
 0x145   : > { %v3126_v46 = vsel %vm937_vm1, %v5130_v34, 0.0  ;;  %v1771_v21 = vadd.f32 %v1723_v53, %v1671_v23  ;;  %v1818_v37 = vmul.f32 %v4742_v15, %v1061_v60  ;;  %v2719_v42 = vrot.slane %v2619_v24, 2 }
 0x146   : > { %7261 = vst [vmem:[#allocation11_spill] sm:$0xff] %v5146_v6  ;;  %v1299_v50 = vrot.slane %v1230_v8, 1  ;;  %v2472_v49 = vsel %vm1286_vm3, %v2470_v16, %v2471_v20  ;;  %v2718_v14 = vrot.slane %v2618_v31, 2  ;;  %v1886_v56 = vrot.slane %v1819_v47, 1  ;;  %v5170_v47 = vpop.f32.mrb[26].mxu0 }
 0x147   : > { %v2566_v9 = vadd.f32 %v2470_v16, %v2354_v41  ;;  %v2567_v54 = vadd.f32 %v2472_v49, %v2355_v39  ;;  %v882_v22 = vmul.f32 %v850_v33, %v5082_v32  ;;  %v3128_v59 = vsel %vm937_vm1, %v5146_v6, 0.0  ;;  %v7262_v16 = vld [vmem:[#allocation22_spill] sm:$0xff]  ;;  %v5175_v49 = vpop.f32.mrb[27].mxu0 }
 0x148   : > { %v2136_v62 = vrot.slane %v5149_v30, 2  ;;  %v2568_v3 = vadd.f32 %v2471_v20, %v2356_v63  ;;  %v5162_v23 = vmul.f32 %v4679_v11, %v1061_v60  ;;  %v1983_v58 = vadd.f32 %v1886_v56, %v1771_v21  ;;  %v7263_v20 = vld [vmem:[#allocation14_spill] sm:$0xff] }
 0x149   : > { %v1135_v24 = vmul.f32 %v4688_v19, %v1061_v60  ;;  %v1722_v8 = vmul.f32 %v4715_v52, %v1061_v60  ;;  %v2033_v31 = vmul.f32 %v4707_v48, %v1061_v60  ;;  %v1301_v41 = vsel %vm1286_vm3, %v1299_v50, %v1300_v1 }
 0x14a   : > { %v1395_v32 = vadd.f32 %v1299_v50, %v7262_v16  ;;  %v1885_v35 = vrot.slane %v1818_v37, 1  ;;  %v2720_v53 = vsel %vm1531_vm4, %v2718_v14, %v2719_v42  ;;  %v7264_v39 = vrot.slane %v7263_v20, 2  ;;  %v1066_v50 = vld [vmem:[#allocation2 + $0xb0] sm:$0xff] }
 0x14b   : > { %v2842_v30 = vadd.f32 %v2718_v14, %v2566_v9  ;;  %v2843_v63 = vadd.f32 %v2720_v53, %v2567_v54  ;;  %v915_v21 = vmul.f32 0.16666667, %v882_v22  ;;  %v1552_v60 = vrot.slane %v5162_v23, 2  ;;  %v7265_v9 = vld [vmem:[#allocation16_spill] sm:$0xff] }
 0x14c   : > { %v2722_v33 = vsel %vm1531_vm4, %v2719_v42, %v7264_v39  ;;  %v1770_v6 = vadd.f32 %v1722_v8, %v5104_v12  ;;  %v1981_v37 = vadd.f32 %v1885_v35, %v5109_v44  ;;  %v3127_v16 = vadd.f32 %v3126_v46, %v5084_v18  ;;  %v5193_v18 = vpop.f32.mrb[28].mxu0 }
 0x14d   : > { %v2844_v27 = vadd.f32 %v2722_v33, %v2568_v3  ;;  %v1397_v34 = vadd.f32 %v1300_v1, %v1136_v7  ;;  %v5181_v38 = vadd.f32 %v1301_v41, %v1135_v24  ;;  %v2135_v20 = vrot.slane %v2033_v31, 2  ;;  %1022 = vst.msk [vmem:[#allocation2 + $0xc8] sm:$0xff] %vm937_vm1, %v915_v21  ;;  %v7268_v3 = vld [vmem:[#allocation17_spill] sm:$0xff]  ;;  %7270 = vst [vmem:[#allocation12_spill] sm:$0xff] %v5193_v18  ;;  %v5198_v8 = vpop.f32.mrb[29].mxu0 }
 0x14e   : > { %v1672_v42 = vadd.f32 %v1552_v60, %v1395_v32  ;;  %v1887_v14 = vsel %vm1286_vm3, %v1885_v35, %v1886_v56  ;;  %v7266_v54 = vrot.slane %v7265_v9, 2  ;;  %v7267_v22 = vrot.slane %v5134_v13, 2  ;;  %7271 = vst [vmem:[#allocation6_spill] sm:$0xff] %v5198_v8 }
 0x14f   : > { %v7269_v44 = vrot.slane %v7268_v3, 2  ;;  %v2943_v7 = vrot.slane %v2842_v30, 7  ;;  %v2944_v1 = vrot.slane %v2843_v63, 7  ;;  %v5196_v46 = vmul.f32 %v4671_v61, %v1066_v50  ;;  %v5205_v30 = vld [vmem:[#allocation2 + $0xa8] sm:$0xff] }
 0x150   : > { %v1556_v12 = vsel %vm1531_vm4, %v7267_v22, %v7266_v54  ;;  %v2946_v56 = vrot.slane %v2844_v27, 7  ;;  %v1982_v31 = vadd.f32 %v1887_v14, %v1770_v6  ;;  %v2257_v41 = vadd.f32 %v2135_v20, %v1981_v37 }
 0x151   : > { %v2139_v23 = vsel %vm1531_vm4, %v2136_v62, %v7269_v44  ;;  %v821_v32 = vmax.f32 %v5119_v2, 0.0  ;;  %v5201_v35 = vadd.f32 %v3128_v59, %v3127_v16  ;;  %v1674_v53 = vadd.f32 %v1556_v12, %v1397_v34  ;;  %v5215_v2 = vpop.f32.mrb[30].mxu0 }
 0x152   : > { %v2259_v24 = vadd.f32 %v2139_v23, %v1983_v58  ;;  %v2311_v39 = vmul.f32 %v4765_v29, %v1066_v50  ;;  %v2407_v33 = vmul.f32 %v4788_v43, %v1066_v50  ;;  %v5208_v63 = vmul.f32 %v4679_v11, %v1066_v50  ;;  %7272 = vst [vmem:[#allocation23_spill] sm:$0xff] %v5215_v2  ;;  %v5226_v22 = vpop.f32.mrb[31].mxu0  ;;  %v7290_v2 = vld [vmem:[#allocation9_spill] sm:$0xff] }
 0x153   : > { %v1726_v58 = vmul.f32 %v4715_v52, %v1066_v50  ;;  %v5212_v27 = vmul.f32 %v4742_v15, %v1066_v50  ;;  %v2622_v6 = vmul.f32 %v4734_v5, %v1066_v50  ;;  %v2945_v34 = vsel %vm2932_vm5, %v2943_v7, %v2944_v1  ;;  %7273 = vst [vmem:[#allocation24_spill] sm:$0xff] %v5226_v22 }
 0x154   : > { %v5220_v21 = vmul.f32 %v4707_v48, %v1066_v50  ;;  %v2359_v37 = vadd.f32 %v2311_v39, %v2259_v24  ;;  %v2947_v16 = vsel %vm2932_vm5, %v2944_v1, %v2946_v56  ;;  %v2137_v14 = vsel %vm1531_vm4, %v2135_v20, %v2136_v62 }
 0x155   : > { %v2406_v9 = vmul.f32 %v4788_v43, %v5205_v30  ;;  %v853_v54 = vmin.f32 %v821_v32, 6.0  ;;  %v1139_v12 = vmul.f32 %v4688_v19, %v1066_v50  ;;  %v1774_v3 = vadd.f32 %v1726_v58, %v1674_v53  ;;  %v7280_v50 = vld [vmem:[#allocation27_spill] sm:$0xff] }
 0x156   : > { %v2474_v44 = vrot.slane %v2407_v33, 1  ;;  %v2258_v23 = vadd.f32 %v2137_v14, %v1982_v31  ;;  %v3056_v7 = vmul.f32 %v5020_v45, %v2945_v34  ;;  %v1889_v24 = vrot.slane %v5212_v27, 1  ;;  %v7276_v34 = vld [vmem:[#allocation28_spill] sm:$0xff] }
 0x157   : > { %v2724_v1 = vrot.slane %v2622_v6, 2  ;;  %v3057_v62 = vmul.f32 %v5020_v45, %v2947_v16  ;;  %v7274_v20 = vrot.slane %v5196_v46, 1  ;;  %v2310_v39 = vmul.f32 %v4765_v29, %v5205_v30 }
 0x158   : > { %v2571_v32 = vadd.f32 %v2474_v44, %v2359_v37  ;;  %v2473_v53 = vrot.slane %v2406_v9, 1  ;;  %v2621_v31 = vmul.f32 %v4734_v5, %v5205_v30  ;;  %v885_v33 = vmul.f32 %v853_v54, %v5096_v40 }
 0x159   : > { %v1400_v56 = vadd.f32 %v7274_v20, %v1139_v12  ;;  %v1986_v58 = vadd.f32 %v1889_v24, %v1774_v3  ;;  %v7275_v27 = vrot.slane %v5134_v13, 2  ;;  %v2357_v16 = vadd.f32 %v7276_v34, %v2257_v41  ;;  %v7278_v12 = vld [vmem:[#allocation18_spill] sm:$0xff]  ;;  %v7282_v41 = vld [vmem:[#allocation19_spill] sm:$0xff] }
 0x15a   : > { %v2358_v14 = vadd.f32 %v2310_v39, %v2258_v23  ;;  %v5246_v37 = vadd.f32 %v5040_v25, %v3056_v7  ;;  %v7279_v20 = vrot.slane %v7278_v12, 2  ;;  %v1772_v59 = vadd.f32 %v7280_v50, %v1672_v42  ;;  %v5272_v34 = vld [vmem:[%s7076_s2] ss:$0 sm:$0xff]  ;;  %v7285_v12 = vld [vmem:[#allocation8_spill] sm:$0xff] }
 0x15b   : > { %v1554_v6 = vsel %vm1531_vm4, %v1552_v60, %v7275_v27  ;;  %v788_v5 = vadd.f32 3.0, %v5114_v10  ;;  %v5254_v40 = vadd.f32 %v5040_v25, %v3057_v62  ;;  %v1232_v60 = vmul.f32 %v4671_v61, %v5205_v30 }
 0x15c   : > { %7277 = vst [vmem:[#allocation7_spill] sm:$0xff] %v5246_v37  ;;  %v2727_v9 = vsel %vm1531_vm4, %v2724_v1, %v7279_v20  ;;  %v7283_v54 = vrot.slane %v7282_v41, 2  ;;  %v7284_v3 = vrot.slane %v5208_v63, 2  ;;  %v1673_v7 = vadd.f32 %v1554_v6, %v5181_v38 }
 0x15d   : > { %7281 = vst [vmem:[#allocation22_spill] sm:$0xff] %v5254_v40  ;;  %v5256_v13 = vadd.f32 %v2727_v9, %v2571_v32  ;;  %v2475_v42 = vsel %vm1286_vm3, %v2473_v53, %v2474_v44  ;;  %v2723_v39 = vrot.slane %v2621_v31, 2  ;;  %v918_v50 = vmul.f32 0.16666667, %v885_v33  ;;  %v7286_v44 = vld [vmem:[#allocation20_spill] sm:$0xff] }
 0x15e   : > { %v1561_v23 = vsel %vm1531_vm4, %v7284_v3, %v7283_v54  ;;  %v1820_v62 = vmul.f32 %v4742_v15, %v5205_v30  ;;  %v2569_v32 = vadd.f32 %v2473_v53, %v2357_v16  ;;  %v2570_v27 = vadd.f32 %v2475_v42, %v2358_v14 }
 0x15f   : > { %v693_v20 = vadd.f32 %v5272_v34, %v7285_v12  ;;  %v3130_v38 = vsel %vm937_vm1, %v5246_v37, 0.0  ;;  %v5278_v6 = vadd.f32 %v1561_v23, %v1400_v56  ;;  %v7287_v31 = vrot.slane %v7286_v44, 2  ;;  %1025 = vst.msk [vmem:[#allocation2 + $0xf0] sm:$0xff] %vm937_vm1, %v918_v50  ;;  %v7289_v37 = vld [vmem:[#allocation26_spill] sm:$0xff] }
 0x160   : > { %v7288_v33 = vrot.slane %v5220_v21, 2  ;;  %v820_v16 = vmax.f32 %v788_v5, 0.0  ;;  %v3132_v14 = vsel %vm937_vm1, %v5254_v40, 0.0  ;;  %v1302_v41 = vrot.slane %v1232_v60, 1 }
 0x161   : > { %v1450_v54 = vmul.f32 %v4679_v11, %v5205_v30  ;;  %v1725_v56 = vmul.f32 %v4715_v52, %v5205_v30  ;;  %v2036_v3 = vmul.f32 %v4707_v48, %v5205_v30  ;;  %v2725_v23 = vsel %vm1531_vm4, %v2723_v39, %v2724_v1 }
 0x162   : > { %v2144_v53 = vsel %vm1531_vm4, %v7288_v33, %v7287_v31  ;;  %v852_v42 = vmin.f32 %v820_v16, 6.0  ;;  %v1888_v50 = vrot.slane %v1820_v62, 1  ;;  %v2845_v5 = vadd.f32 %v2723_v39, %v2569_v32  ;;  %v5311_v16 = vld [vmem:[#allocation2 + $0xc8] sm:$0xff] }
 0x163   : > { %v2846_v12 = vadd.f32 %v2725_v23, %v2570_v27  ;;  %v791_v44 = vadd.f32 3.0, %v693_v20  ;;  %v3131_v31 = vadd.f32 %v3130_v38, %v5201_v35  ;;  %v1773_v33 = vadd.f32 %v1725_v56, %v1673_v7  ;;  %v1070_v7 = vld [vmem:[#allocation2 + $0xd0] sm:$0xff] }
 0x164   : > { %v2262_v60 = vadd.f32 %v2144_v53, %v1986_v58  ;;  %v884_v9 = vmul.f32 %v852_v42, %v5114_v10  ;;  %v1138_v40 = vmul.f32 %v4688_v19, %v5205_v30  ;;  %v1398_v17 = vadd.f32 %v1302_v41, %v7289_v37 }
 0x165   : > { %v823_v22 = vmax.f32 %v791_v44, 0.0  ;;  %v5303_v1 = vadd.f32 %v5272_v34, %v7290_v2  ;;  %v7291_v39 = vrot.slane %v5196_v46, 1  ;;  %v1557_v32 = vrot.slane %v1450_v54, 2  ;;  %v7292_v46 = vld [vmem:[#allocation29_spill] sm:$0xff] }
 0x166   : > { %v1984_v35 = vadd.f32 %v1888_v50, %v1772_v59  ;;  %v917_v58 = vmul.f32 0.16666667, %v884_v9  ;;  %v1890_v10 = vsel %vm1286_vm3, %v1888_v50, %v1889_v24  ;;  %v2140_v27 = vrot.slane %v2036_v3, 2 }
 0x167   : > { %v1304_v62 = vsel %vm1286_vm3, %v1302_v41, %v7291_v39  ;;  %v2948_v38 = vrot.slane %v2845_v5, 7  ;;  %v2949_v30 = vrot.slane %v2846_v12, 7  ;;  %v1985_v53 = vadd.f32 %v1890_v10, %v1773_v33 }
 0x168   : > { %v5309_v37 = vadd.f32 %v3132_v14, %v3131_v31  ;;  %1024 = vst.msk [vmem:[#allocation2 + $0xe8] sm:$0xff] %vm937_vm1, %v917_v58  ;;  %v855_v2 = vmin.f32 %v823_v22, 6.0  ;;  %v5316_v41 = vmul.f32 %v4679_v11, %v7292_v46  ;;  %v1399_v59 = vadd.f32 %v1304_v62, %v1138_v40 }
 0x169   : > { %v1675_v54 = vadd.f32 %v1557_v32, %v1398_v17  ;;  %v1235_v9 = vmul.f32 %v4671_v61, %v1070_v7  ;;  %v790_v24 = vadd.f32 3.0, %v5303_v1  ;;  %v2260_v56 = vadd.f32 %v2140_v27, %v1984_v35  ;;  %v5346_v35 = vld [vmem:[%s7077_s3 + $0x8] ss:$0 sm:$0xff] }
 0x16a   : > { %v1142_v3 = vmul.f32 %v4688_v19, %v1070_v7  ;;  %v5322_v14 = vmul.f32 %v4679_v11, %v1070_v7  ;;  %v7293_v23 = vrot.slane %v5208_v63, 2  ;;  %v2950_v42 = vsel %vm2932_vm5, %v2948_v38, %v2949_v30 }
 0x16b   : > { %v2409_v50 = vmul.f32 %v4788_v43, %v1070_v7  ;;  %v7294_v17 = vrot.slane %v5220_v21, 2  ;;  %v2408_v5 = vmul.f32 %v4788_v43, %v5311_v16  ;;  %v1729_v12 = vmul.f32 %v4715_v52, %v1070_v7 }
 0x16c   : > { %v1559_v22 = vsel %vm1531_vm4, %v1557_v32, %v7293_v23  ;;  %v5336_v44 = vmul.f32 %v4742_v15, %v1070_v7  ;;  %v887_v63 = vmul.f32 %v855_v2, %v693_v20  ;;  %v1306_v33 = vrot.slane %v1235_v9, 1  ;;  %v7295_v23 = vld [vmem:[#allocation35_spill] sm:$0xff] }
 0x16d   : > { %v2142_v40 = vsel %vm1531_vm4, %v2140_v27, %v7294_v17  ;;  %v5339_v39 = vmul.f32 %v4707_v48, %v1070_v7  ;;  %v2314_v62 = vmul.f32 %v4765_v29, %v1070_v7  ;;  %v822_v32 = vmax.f32 %v790_v24, 0.0 }
 0x16e   : > { %v2261_v31 = vadd.f32 %v2142_v40, %v1985_v53  ;;  %v3058_v21 = vmul.f32 %v5020_v45, %v2950_v42  ;;  %v2625_v58 = vmul.f32 %v5346_v35, %v1070_v7  ;;  %v2313_v10 = vmul.f32 %v4765_v29, %v5311_v16 }
 0x16f   : > { %v920_v20 = vmul.f32 0.16666667, %v887_v63  ;;  %v2477_v27 = vrot.slane %v2409_v50, 1  ;;  %v1234_v38 = vmul.f32 %v4671_v61, %v5311_v16  ;;  %v2476_v53 = vrot.slane %v2408_v5, 1 }
 0x170   : > { %v2624_v2 = vmul.f32 %v5346_v35, %v5311_v16  ;;  %v1563_v9 = vrot.slane %v5322_v14, 2  ;;  %v1777_v24 = vadd.f32 %v1729_v12, %v5278_v6  ;;  %v2360_v42 = vadd.f32 %v7295_v23, %v2260_v56 }
 0x171   : > { %v2361_v17 = vadd.f32 %v2313_v10, %v2261_v31  ;;  %1027 = vst.msk [vmem:[#allocation2 + $0x110] sm:$0xff] %vm937_vm1, %v920_v20  ;;  %v7296_v7 = vrot.slane %v5256_v13, 7  ;;  %v1892_v40 = vrot.slane %v5336_v44, 1  ;;  %v2362_v63 = vadd.f32 %v2314_v62, %v2262_v60  ;;  %v7298_v10 = vld [vmem:[#allocation34_spill] sm:$0xff]  ;;  %v7299_v20 = vld [vmem:[#allocation21_spill] sm:$0xff] }
 0x172   : > { %v854_v5 = vmin.f32 %v822_v32, 6.0  ;;  %v5364_v8 = vadd.f32 %v5040_v25, %v3058_v21  ;;  %v2146_v14 = vrot.slane %v5339_v39, 2  ;;  %v2729_v18 = vrot.slane %v2625_v58, 2 }
 0x173   : > { %v2952_v50 = vsel %vm2932_vm5, %v2949_v30, %v7296_v7  ;;  %v1822_v6 = vmul.f32 %v4742_v15, %v5311_v16  ;;  %v1403_v56 = vadd.f32 %v1306_v33, %v1142_v3  ;;  %v1305_v12 = vrot.slane %v1234_v38, 1 }
 0x174   : > { %7297 = vst [vmem:[#allocation14_spill] sm:$0xff] %v5364_v8  ;;  %v2478_v31 = vsel %vm1286_vm3, %v2476_v53, %v2477_v27  ;;  %v2728_v13 = vrot.slane %v2624_v2, 2  ;;  %v3059_v30 = vmul.f32 %v5020_v45, %v2952_v50  ;;  %v1775_v44 = vadd.f32 %v7298_v10, %v1675_v54 }
 0x175   : > { %v2572_v60 = vadd.f32 %v2476_v53, %v2360_v42  ;;  %v2573_v62 = vadd.f32 %v2478_v31, %v2361_v17  ;;  %v2574_v32 = vadd.f32 %v2477_v27, %v2362_v63  ;;  %v1453_v21 = vmul.f32 %v4679_v11, %v5311_v16  ;;  %v7301_v53 = vld [vmem:[#allocation31_spill] sm:$0xff] }
 0x176   : > { %v1676_v39 = vadd.f32 %v1559_v22, %v1399_v59  ;;  %v886_v58 = vmul.f32 %v854_v5, %v5303_v1  ;;  %v3134_v3 = vsel %vm937_vm1, %v5364_v8, 0.0  ;;  %v7300_v38 = vrot.slane %v7299_v20, 2 }
 0x177   : > { %v1891_v23 = vrot.slane %v1822_v6, 1  ;;  %v2039_v54 = vmul.f32 %v4707_v48, %v5311_v16  ;;  %v1401_v42 = vadd.f32 %v1305_v12, %v7301_v53  ;;  %v1728_v27 = vmul.f32 %v4715_v52, %v5311_v16 }
 0x178   : > { %v2732_v2 = vsel %vm1531_vm4, %v2729_v18, %v7300_v38  ;;  %v2730_v59 = vsel %vm1531_vm4, %v2728_v13, %v2729_v18  ;;  %v919_v22 = vmul.f32 0.16666667, %v886_v58  ;;  %v1307_v1 = vsel %vm1286_vm3, %v1305_v12, %v1306_v33  ;;  %v7302_v38 = vld [vmem:[#allocation30_spill] sm:$0xff]  ;;  %v1078_v8 = vld [vmem:[#allocation2 + $0x110] sm:$0xff] }
 0x179   : > { %v1987_v17 = vadd.f32 %v1891_v23, %v1775_v44  ;;  %v2848_v7 = vadd.f32 %v2728_v13, %v2572_v60  ;;  %v2849_v50 = vadd.f32 %v2730_v59, %v2573_v62  ;;  %v2850_v63 = vadd.f32 %v2732_v2, %v2574_v32  ;;  %v1074_v60 = vld [vmem:[#allocation2 + $0xf0] sm:$0xff] }
 0x17a   : > { %v1141_v5 = vmul.f32 %v4688_v19, %v5311_v16  ;;  %v1562_v6 = vrot.slane %v1453_v21, 2  ;;  %v1776_v31 = vadd.f32 %v1728_v27, %v1676_v39  ;;  %1026 = vst.msk [vmem:[#allocation2 + $0x108] sm:$0xff] %vm937_vm1, %v919_v22  ;;  %v1989_v10 = vadd.f32 %v1892_v40, %v1777_v24 }
 0x17b   : > { %v2145_v20 = vrot.slane %v2039_v54, 2  ;;  %v7303_v53 = vrot.slane %v7302_v38, 2  ;;  %v5395_v33 = vmul.f32 %v4707_v48, %v7292_v46  ;;  %v5398_v12 = vadd.f32 %v5040_v25, %v3059_v30  ;;  %v7306_v54 = vld [vmem:[#allocation32_spill] sm:$0xff] }
 0x17c   : > { %v5401_v13 = vadd.f32 %v3134_v3, %v5309_v37  ;;  %v1402_v16 = vadd.f32 %v1307_v1, %v1141_v5  ;;  %v1678_v44 = vadd.f32 %v1562_v6, %v1401_v42  ;;  %v1893_v24 = vsel %vm1286_vm3, %v1891_v23, %v1892_v40  ;;  %v7308_v42 = vld [vmem:[#allocation15_spill] sm:$0xff]  ;;  %v5440_v5 = vld [vmem:[#allocation2 + $0x118] sm:$0x1] }
 0x17d   : > { %v1566_v18 = vsel %vm1531_vm4, %v1563_v9, %v7303_v53  ;;  %7304 = vst [vmem:[#allocation16_spill] sm:$0xff] %v5398_v12  ;;  %v2263_v62 = vadd.f32 %v2145_v20, %v1987_v17  ;;  %v2953_v32 = vrot.slane %v2848_v7, 7  ;;  %v2954_v21 = vrot.slane %v2849_v50, 7 }
 0x17e   : > { %7305 = vst [vmem:[#allocation17_spill] sm:$0xff] %v5401_v13  ;;  %v2956_v39 = vrot.slane %v2850_v63, 7  ;;  %v1988_v58 = vadd.f32 %v1893_v24, %v1776_v31  ;;  %v1680_v2 = vadd.f32 %v1566_v18, %v1403_v56  ;;  %v7307_v46 = vrot.slane %v7306_v54, 2 }
 0x17f   : > { %v5408_v30 = vmul.f32 %v4671_v61, %v1074_v60  ;;  %v1564_v3 = vsel %vm1531_vm4, %v1562_v6, %v1563_v9  ;;  %v703_v59 = vadd.f32 %v5272_v34, %v7308_v42  ;;  %v5414_v40 = vmul.f32 %v4679_v11, %v1074_v60 }
 0x180   : > { %v2149_v27 = vsel %vm1531_vm4, %v2146_v14, %v7307_v46  ;;  %v5416_v23 = vadd.f32 %v1564_v3, %v1402_v16  ;;  %v5419_v56 = vadd.f32 %v4990_v55, %v1678_v44  ;;  %v2147_v22 = vsel %vm1531_vm4, %v2145_v20, %v2146_v14  ;;  %v1076_v16 = vld [vmem:[#allocation2 + $0x100] sm:$0xff] }
 0x181   : > { %v2265_v37 = vadd.f32 %v2149_v27, %v1989_v10  ;;  %v2955_v1 = vsel %vm2932_vm5, %v2953_v32, %v2954_v21  ;;  %v2317_v17 = vmul.f32 %v4765_v29, %v1074_v60  ;;  %v5425_v7 = vmul.f32 %v4788_v43, %v1074_v60  ;;  %v1073_v32 = vld [vmem:[#allocation2 + $0xe8] sm:$0xff] }
 0x182   : > { %v5428_v9 = vadd.f32 %v5125_v51, %v2263_v62  ;;  %v1732_v50 = vmul.f32 %v4715_v52, %v1074_v60  ;;  %v5432_v63 = vmul.f32 %v4742_v15, %v1074_v60  ;;  %v5435_v55 = vmul.f32 %v4707_v48, %v1074_v60 }
 0x183   : > { %v5438_v14 = vmul.f32 %v5346_v35, %v1074_v60  ;;  %v1309_v6 = vrot.slane %v5408_v30, 1  ;;  %v2365_v31 = vadd.f32 %v2317_v17, %v2265_v37  ;;  %v2264_v10 = vadd.f32 %v2147_v22, %v1988_v58 }
 0x184   : > { %v793_v20 = vadd.f32 3.0, %v703_v59  ;;  %v7111_v51 = vrot.slane %v5414_v40, 2  ;;  %v1780_v38 = vadd.f32 %v1732_v50, %v1680_v2  ;;  %v1570_v53 = vrot.slane %v5316_v41, 2 }
 0x185   : > { %v2153_v18 = vrot.slane %v5395_v33, 2  ;;  %v3060_v44 = vmul.f32 %v5020_v45, %v2955_v1  ;;  %v1145_v24 = vmul.f32 %v4688_v19, %v1074_v60  ;;  %v2480_v62 = vrot.slane %v5425_v7, 1  ;;  %v7311_v7 = vld [vmem:[#allocation33_spill] sm:$0xff] }
 0x186   : > { %v5451_v54 = vmul.f32 %v5346_v35, %v5440_v5  ;;  %v2957_v58 = vsel %vm2932_vm5, %v2954_v21, %v2956_v39  ;;  %v1895_v2 = vrot.slane %v5432_v63, 1  ;;  %v7112_v41 = vrot.slane %v5435_v55, 2 }
 0x187   : > { %v7113_v33 = vrot.slane %v5438_v14, 2  ;;  %v1406_v46 = vadd.f32 %v1309_v6, %v1145_v24  ;;  %v2577_v27 = vadd.f32 %v2480_v62, %v2365_v31  ;;  %v5458_v30 = vmul.f32 %v4688_v19, %v1076_v16 }
 0x188   : > { %v825_v60 = vmax.f32 %v793_v20, 0.0  ;;  %v1992_v37 = vadd.f32 %v1895_v2, %v1780_v38  ;;  %v1236_v3 = vmul.f32 %v4671_v61, %v1073_v32  ;;  %v1571_v42 = vsel %vm1531_vm4, %v7111_v51, %v1570_v53  ;;  %v7315_v51 = vld [vmem:[#allocation37_spill] sm:$0xff] }
 0x189   : > { %v5465_v21 = vmul.f32 %v4715_v52, %v1076_v16  ;;  %v5468_v39 = vmul.f32 %v5020_v45, %v2957_v58  ;;  %v5471_v22 = vadd.f32 %v5040_v25, %v3060_v44  ;;  %v7312_v50 = vrot.slane %v7311_v7, 2  ;;  %v7313_v45 = vld [vmem:[#allocation25_spill] sm:$0xff] }
 0x18a   : > { %v857_v17 = vmin.f32 %v825_v60, 6.0  ;;  %v2410_v31 = vmul.f32 %v4788_v43, %v1073_v32  ;;  %v2154_v20 = vsel %vm1531_vm4, %v7112_v41, %v2153_v18  ;;  %v698_v38 = vadd.f32 %v5272_v34, %v7313_v45 }
 0x18b   : > { %7309 = vst [vmem:[#allocation28_spill] sm:$0xff] %v5468_v39  ;;  %7310 = vst [vmem:[#allocation18_spill] sm:$0xff] %v5471_v22  ;;  %v2737_v63 = vsel %vm1531_vm4, %v7113_v33, %v7312_v50  ;;  %v1824_v53 = vmul.f32 %v4742_v15, %v1073_v32  ;;  %v1683_v44 = vadd.f32 %v1571_v42, %v1406_v46  ;;  %v1308_v58 = vrot.slane %v1236_v3, 1  ;;  %v7316_v42 = vld [vmem:[#allocation36_spill] sm:$0xff] }
 0x18c   : > { %v5485_v25 = vadd.f32 %v2737_v63, %v2577_v27  ;;  %v889_v24 = vmul.f32 %v857_v17, %v703_v59  ;;  %v5489_v60 = vmul.f32 %v4679_v11, %v1073_v32  ;;  %v5491_v7 = vadd.f32 %v2154_v20, %v1992_v37 }
 0x18d   : > { %v5494_v50 = vmul.f32 %v4765_v29, %v1076_v16  ;;  %v1144_v18 = vmul.f32 %v4688_v19, %v1073_v32  ;;  %v2316_v1 = vmul.f32 %v4765_v29, %v1073_v32  ;;  %v792_v27 = vadd.f32 3.0, %v698_v38 }
 0x18e   : > { %7314 = vst [vmem:[#allocation27_spill] sm:$0xff] %v5485_v25  ;;  %v922_v45 = vmul.f32 0.16666667, %v889_v24  ;;  %v1731_v63 = vmul.f32 %v4715_v52, %v1073_v32  ;;  %v2042_v46 = vmul.f32 %v4707_v48, %v1073_v32  ;;  %v2479_v59 = vrot.slane %v2410_v31, 1 }
 0x18f   : > { %v2627_v3 = vmul.f32 %v5346_v35, %v1073_v32  ;;  %v1894_v37 = vrot.slane %v1824_v53, 1  ;;  %v2364_v17 = vadd.f32 %v2316_v1, %v2264_v10  ;;  %v824_v16 = vmax.f32 %v792_v27, 0.0 }
 0x190   : > { %1029 = vst.msk [vmem:[#allocation2 + $0x130] sm:$0xff] %vm937_vm1, %v922_v45  ;;  %v1310_v20 = vsel %vm1286_vm3, %v1308_v58, %v1309_v6  ;;  %v1404_v41 = vadd.f32 %v1308_v58, %v7315_v51  ;;  %v1567_v24 = vrot.slane %v5489_v60, 2  ;;  %v1779_v33 = vadd.f32 %v1731_v63, %v5416_v23  ;;  %v7317_v6 = vld [vmem:[#allocation38_spill] sm:$0xff] }
 0x191   : > { %v1990_v31 = vadd.f32 %v1894_v37, %v5419_v56  ;;  %v2575_v32 = vadd.f32 %v2479_v59, %v5428_v9  ;;  %v856_v22 = vmin.f32 %v824_v16, 6.0  ;;  %v713_v10 = vadd.f32 %v5272_v34, %v7316_v42 }
 0x192   : > { %v2150_v1 = vrot.slane %v2042_v46, 2  ;;  %v2481_v53 = vsel %vm1286_vm3, %v2479_v59, %v2480_v62  ;;  %v2733_v45 = vrot.slane %v2627_v3, 2  ;;  %v5514_v51 = vadd.f32 %v5272_v34, %v7317_v6 }
 0x193   : > { %v2576_v58 = vadd.f32 %v2481_v53, %v2364_v17  ;;  %v5517_v23 = vmul.f32 %v4671_v61, %v1078_v8  ;;  %v888_v60 = vmul.f32 %v856_v22, %v698_v38  ;;  %v795_v56 = vadd.f32 3.0, %v713_v10  ;;  %v1077_v38 = vld [vmem:[#allocation2 + $0x108] sm:$0xff] }
 0x194   : > { %v1405_v27 = vadd.f32 %v1310_v20, %v1144_v18  ;;  %v1681_v9 = vadd.f32 %v1567_v24, %v1404_v41  ;;  %v1896_v63 = vsel %vm1286_vm3, %v1894_v37, %v1895_v2  ;;  %v5521_v42 = vmul.f32 %v4679_v11, %v1078_v8 }
 0x195   : > { %v1991_v46 = vadd.f32 %v1896_v63, %v1779_v33  ;;  %v2266_v62 = vadd.f32 %v2150_v1, %v1990_v31  ;;  %v2851_v59 = vadd.f32 %v2733_v45, %v2575_v32  ;;  %v921_v3 = vmul.f32 0.16666667, %v888_v60 }
 0x196   : > { %v7318_v16 = vrot.slane %v5438_v14, 2  ;;  %v1735_v53 = vmul.f32 %v4715_v52, %v1078_v8  ;;  %v5528_v22 = vmul.f32 %v4742_v15, %v1078_v8  ;;  %v794_v41 = vadd.f32 3.0, %v5514_v51 }
 0x197   : > { %v1312_v18 = vrot.slane %v5517_v23, 1  ;;  %v5535_v33 = vmul.f32 %v4707_v48, %v1078_v8  ;;  %1028 = vst.msk [vmem:[#allocation2 + $0x128] sm:$0xff] %vm937_vm1, %v921_v3  ;;  %v827_v14 = vmax.f32 %v795_v56, 0.0  ;;  %v1148_v37 = vmul.f32 %v4688_v19, %v1078_v8 }
 0x198   : > { %v2735_v17 = vsel %vm1531_vm4, %v2733_v45, %v7318_v16  ;;  %v1783_v31 = vadd.f32 %v1735_v53, %v1683_v44  ;;  %v2631_v32 = vmul.f32 %v5346_v35, %v1078_v8  ;;  %v2958_v45 = vrot.slane %v2851_v59, 7 }
 0x199   : > { %v5531_v2 = vadd.f32 %v2735_v17, %v2576_v58  ;;  %v2413_v6 = vmul.f32 %v4788_v43, %v1078_v8  ;;  %v7320_v58 = vrot.slane %v5435_v55, 2  ;;  %v2412_v60 = vmul.f32 %v4788_v43, %v1077_v38 }
 0x19a   : > { %v7116_v63 = vrot.slane %v5528_v22, 1  ;;  %v2320_v56 = vmul.f32 %v4765_v29, %v1078_v8  ;;  %v826_v16 = vmax.f32 %v794_v41, 0.0  ;;  %v5549_v44 = vadd.f32 %v1312_v18, %v1148_v37 }
 0x19b   : > { %7319 = vst [vmem:[#allocation19_spill] sm:$0xff] %v5531_v2  ;;  %v2152_v23 = vsel %vm1531_vm4, %v2150_v1, %v7320_v58  ;;  %v7119_v17 = vrot.slane %v5531_v2, 7  ;;  %v859_v53 = vmin.f32 %v827_v14, 6.0  ;;  %v2739_v58 = vrot.slane %v2631_v32, 2 }
 0x19c   : > { %v2267_v3 = vadd.f32 %v2152_v23, %v1991_v46  ;;  %v5554_v55 = vadd.f32 %v7116_v63, %v1783_v31  ;;  %v2368_v1 = vadd.f32 %v2320_v56, %v5491_v7  ;;  %v2319_v20 = vmul.f32 %v4765_v29, %v1077_v38 }
 0x19d   : > { %v2483_v13 = vrot.slane %v2413_v6, 1  ;;  %v1238_v8 = vmul.f32 %v4671_v61, %v1077_v38  ;;  %v2482_v46 = vrot.slane %v2412_v60, 1  ;;  %v2630_v41 = vmul.f32 %v5346_v35, %v1077_v38 }
 0x19e   : > { %v7321_v37 = vrot.slane %v5414_v40, 2  ;;  %v2366_v14 = vadd.f32 %v5494_v50, %v2266_v62  ;;  %v2367_v59 = vadd.f32 %v2319_v20, %v2267_v3  ;;  %v858_v31 = vmin.f32 %v826_v16, 6.0 }
 0x19f   : > { %v2960_v7 = vsel %vm2932_vm5, %v2958_v45, %v7119_v17  ;;  %v1781_v32 = vadd.f32 %v5465_v21, %v1681_v9  ;;  %v1826_v6 = vmul.f32 %v4742_v15, %v1077_v38  ;;  %v891_v56 = vmul.f32 %v859_v53, %v713_v10 }
 0x1a0   : > { %v1569_v23 = vsel %vm1531_vm4, %v1567_v24, %v7321_v37  ;;  %v2580_v60 = vadd.f32 %v2483_v13, %v2368_v1  ;;  %v7322_v63 = vrot.slane %v5451_v54, 2  ;;  %v1461_v50 = vmul.f32 %v4679_v11, %v5440_v5 }
 0x1a1   : > { %v1682_v12 = vadd.f32 %v1569_v23, %v1405_v27  ;;  %v1311_v24 = vrot.slane %v1238_v8, 1  ;;  %v1459_v62 = vmul.f32 %v4679_v11, %v1077_v38  ;;  %v2484_v20 = vsel %vm1286_vm3, %v2482_v46, %v2483_v13  ;;  %v1083_v8 = vld [vmem:[#allocation2 + $0x138] sm:$0x1] }
 0x1a2   : > { %v2742_v40 = vsel %vm1531_vm4, %v2739_v58, %v7322_v63  ;;  %v2738_v45 = vrot.slane %v2630_v41, 2  ;;  %v1734_v21 = vmul.f32 %v4715_v52, %v1077_v38  ;;  %v2578_v9 = vadd.f32 %v2482_v46, %v2366_v14 }
 0x1a3   : > { %v2579_v3 = vadd.f32 %v2484_v20, %v2367_v59  ;;  %v890_v10 = vmul.f32 %v858_v31, %v5514_v51  ;;  %v1897_v16 = vrot.slane %v1826_v6, 1  ;;  %v2045_v54 = vmul.f32 %v4707_v48, %v1077_v38 }
 0x1a4   : > { %v924_v63 = vmul.f32 0.16666667, %v891_v56  ;;  %v5581_v27 = vadd.f32 %v5272_v34, %v4980_v4  ;;  %v5583_v53 = vadd.f32 %v2742_v40, %v2580_v60  ;;  %v1147_v1 = vmul.f32 %v4688_v19, %v1077_v38 }
 0x1a5   : > { %v1782_v13 = vadd.f32 %v1734_v21, %v1682_v12  ;;  %v2047_v46 = vmul.f32 %v4707_v48, %v5440_v5  ;;  %v1313_v59 = vsel %vm1286_vm3, %v1311_v24, %v1312_v18  ;;  %v1407_v51 = vadd.f32 %v1311_v24, %v5458_v30  ;;  %v1080_v5 = vld [vmem:[#allocation2 + $0x120] sm:$0xff] }
 0x1a6   : > { %7323 = vst [vmem:[#allocation8_spill] sm:$0xff] %v5583_v53  ;;  %v1993_v41 = vadd.f32 %v1897_v16, %v1781_v32  ;;  %v2740_v37 = vsel %vm1531_vm4, %v2738_v45, %v2739_v58  ;;  %1031 = vst.msk [vmem:[#allocation2 + $0x150] sm:$0xff] %vm937_vm1, %v924_v63  ;;  %v2854_v4 = vadd.f32 %v2738_v45, %v2578_v9  ;;  %v1575_v14 = vrot.slane %v1461_v50, 2  ;;  %v4308_v30 = vld [vmem:[%s7078_s4] ss:$0 sm:$0xff] }
 0x1a7   : > { %v5592_v23 = vadd.f32 %v2740_v37, %v2579_v3  ;;  %v923_v31 = vmul.f32 0.16666667, %v890_v10  ;;  %v1572_v38 = vrot.slane %v1459_v62, 2  ;;  %v2155_v12 = vrot.slane %v2045_v54, 2  ;;  %v1082_v10 = vld [vmem:[#allocation2 + $0x130] sm:$0xff]  ;;  %v5687_v32 = vld [vmem:[#allocation2 + $0x160] sm:$0xff] }
 0x1a8   : > { %v5595_v6 = vmul.f32 %v5346_v35, %v1083_v8  ;;  %v797_v18 = vadd.f32 3.0, %v5581_v27  ;;  %v5601_v58 = vmul.f32 %v4308_v30, %v2960_v7  ;;  %v7326_v56 = vrot.slane %v5528_v22, 1 }
 0x1a9   : > { %7324 = vst [vmem:[#allocation20_spill] sm:$0xff] %v5592_v23  ;;  %v2158_v40 = vrot.slane %v2047_v46, 2  ;;  %1030 = vst.msk [vmem:[#allocation2 + $0x148] sm:$0xff] %vm937_vm1, %v923_v31  ;;  %v1408_v50 = vadd.f32 %v1313_v59, %v1147_v1  ;;  %v1684_v24 = vadd.f32 %v1572_v38, %v1407_v51  ;;  %v2269_v20 = vadd.f32 %v2155_v12, %v1993_v41 }
 0x1aa   : > { %7325 = vst [vmem:[#allocation26_spill] sm:$0xff] %v5601_v58  ;;  %v1899_v60 = vsel %vm1286_vm3, %v1897_v16, %v7326_v56  ;;  %v2963_v45 = vrot.slane %v2854_v4, 7  ;;  %v7118_v21 = vrot.slane %v5592_v23, 7  ;;  %v7327_v9 = vrot.slane %v5521_v42, 2 }
 0x1ab   : > { %v1994_v62 = vadd.f32 %v1899_v60, %v1782_v13  ;;  %v1736_v3 = vmul.f32 %v4715_v52, %v1080_v5  ;;  %v2746_v22 = vrot.slane %v5595_v6, 2  ;;  %v5615_v16 = vmul.f32 %v4688_v19, %v1080_v5 }
 0x1ac   : > { %v1576_v7 = vsel %vm1531_vm4, %v7327_v9, %v1575_v14  ;;  %v2321_v54 = vmul.f32 %v4765_v29, %v1080_v5  ;;  %v829_v63 = vmax.f32 %v797_v18, 0.0  ;;  %v7328_v1 = vrot.slane %v5535_v33, 2  ;;  %v1084_v18 = vld [vmem:[#allocation2 + $0x140] sm:$0xff] }
 0x1ad   : > { %v7329_v46 = vmov %v7327_v9  ;;  %v1464_v51 = vmul.f32 %v4679_v11, %v1083_v8  ;;  %v2050_v41 = vmul.f32 %v4707_v48, %v1083_v8  ;;  %v1686_v37 = vadd.f32 %v1576_v7, %v5549_v44  ;;  %v1087_v44 = vld [vmem:[#allocation2 + $0x158] sm:$0x1] }
 0x1ae   : > { %v2159_v13 = vsel %vm1531_vm4, %v7328_v1, %v2158_v40  ;;  %v1574_v59 = vsel %vm1531_vm4, %v1572_v38, %v7329_v46  ;;  %v7330_v31 = vmov %v7328_v1  ;;  %v5636_v42 = vsel %vm2932_vm5, %v2963_v45, %v7118_v21 }
 0x1af   : > { %v2271_v4 = vadd.f32 %v2159_v13, %v5554_v55  ;;  %v5628_v14 = vadd.f32 %v1574_v59, %v1408_v50  ;;  %v2157_v5 = vsel %vm1531_vm4, %v2155_v12, %v7330_v31  ;;  %7331 = vst [vmem:[#allocation9_spill] sm:$0xff] %v5636_v42  ;;  %v5639_v38 = vmul.f32 %v4671_v61, %v1082_v10 }
 0x1b0   : > { %v5641_v8 = vadd.f32 %v1736_v3, %v1684_v24  ;;  %v718_v55 = vadd.f32 %v5272_v34, %v5034_v26  ;;  %v5646_v30 = vmul.f32 %v4679_v11, %v1082_v10  ;;  %v5648_v33 = vadd.f32 %v2157_v5, %v1994_v62 }
 0x1b1   : > { %v5650_v12 = vadd.f32 %v2321_v54, %v2269_v20  ;;  %v861_v56 = vmin.f32 %v829_v63, 6.0  ;;  %v1580_v60 = vrot.slane %v1464_v51, 2  ;;  %v2163_v40 = vrot.slane %v2050_v41, 2  ;;  %v1081_v41 = vld [vmem:[#allocation2 + $0x128] sm:$0xff] }
 0x1b2   : > { %v5653_v50 = vmul.f32 %v4688_v19, %v1084_v18  ;;  %v5656_v24 = vmul.f32 %v4715_v52, %v1084_v18  ;;  %v1738_v45 = vmul.f32 %v4715_v52, %v1082_v10  ;;  %v5660_v26 = vmul.f32 %v4707_v48, %v1082_v10 }
 0x1b3   : > { %v5663_v9 = vmul.f32 %v4765_v29, %v1084_v18  ;;  %v5666_v62 = vmul.f32 %v4679_v11, %v1087_v44  ;;  %v1315_v20 = vrot.slane %v5639_v38, 1  ;;  %v5670_v7 = vmul.f32 %v4742_v15, %v1082_v10 }
 0x1b4   : > { %v5673_v3 = vmul.f32 %v5346_v35, %v1082_v10  ;;  %v796_v54 = vadd.f32 3.0, %v718_v55  ;;  %v7120_v63 = vrot.slane %v5646_v30, 2  ;;  %v2323_v1 = vmul.f32 %v4765_v29, %v1082_v10 }
 0x1b5   : > { %v2415_v13 = vmul.f32 %v4788_v43, %v1082_v10  ;;  %v893_v46 = vmul.f32 %v861_v56, %v5581_v27  ;;  %v1151_v59 = vmul.f32 %v4688_v19, %v1082_v10  ;;  %v1786_v51 = vadd.f32 %v1738_v45, %v1686_v37 }
 0x1b6   : > { %v5681_v31 = vmul.f32 %v4707_v48, %v1087_v44  ;;  %v733_v5 = vadd.f32 %v5272_v34, %v5075_v57  ;;  %v7121_v18 = vrot.slane %v5660_v26, 2  ;;  %v2371_v38 = vadd.f32 %v2323_v1, %v2271_v4 }
 0x1b7   : > { %v5691_v27 = vadd.f32 %v5272_v34, %v5098_v0  ;;  %v1412_v10 = vadd.f32 %v1315_v20, %v1151_v59  ;;  %v1901_v37 = vrot.slane %v5670_v7, 1  ;;  %v2744_v44 = vrot.slane %v5673_v3, 2 }
 0x1b8   : > { %v828_v56 = vmax.f32 %v796_v54, 0.0  ;;  %v2486_v45 = vrot.slane %v2415_v13, 1  ;;  %v1240_v57 = vmul.f32 %v4671_v61, %v1081_v41  ;;  %v1581_v4 = vsel %vm1531_vm4, %v7120_v63, %v1580_v60 }
 0x1b9   : > { %v926_v1 = vmul.f32 0.16666667, %v893_v46  ;;  %v1998_v17 = vadd.f32 %v1901_v37, %v1786_v51  ;;  %v2414_v21 = vmul.f32 %v4788_v43, %v1081_v41  ;;  %v5702_v0 = vmul.f32 %v4688_v19, %v5687_v32 }
 0x1ba   : > { %v799_v59 = vadd.f32 3.0, %v733_v5  ;;  %v2583_v7 = vadd.f32 %v2486_v45, %v2371_v38  ;;  %v1828_v3 = vmul.f32 %v4742_v15, %v1081_v41  ;;  %v2164_v54 = vsel %vm1531_vm4, %v7121_v18, %v2163_v40 }
 0x1bb   : > { %1033 = vst.msk [vmem:[#allocation2 + $0x170] sm:$0xff] %vm937_vm1, %v926_v1  ;;  %v798_v60 = vadd.f32 3.0, %v5691_v27  ;;  %v2747_v13 = vsel %vm1531_vm4, %v2744_v44, %v2746_v22  ;;  %v1462_v46 = vmul.f32 %v4679_v11, %v1081_v41  ;;  %v5714_v51 = vadd.f32 %v1581_v4, %v1412_v10 }
 0x1bc   : > { %v860_v63 = vmin.f32 %v828_v56, 6.0  ;;  %v1150_v38 = vmul.f32 %v4688_v19, %v1081_v41  ;;  %v1314_v58 = vrot.slane %v1240_v57, 1  ;;  %v2322_v39 = vmul.f32 %v4765_v29, %v1081_v41 }
 0x1bd   : > { %v2633_v40 = vmul.f32 %v5346_v35, %v1081_v41  ;;  %v2485_v18 = vrot.slane %v2414_v21, 1  ;;  %v831_v42 = vmax.f32 %v799_v59, 0.0  ;;  %v5721_v6 = vadd.f32 %v5272_v34, %v5127_v36 }
 0x1be   : > { %v892_v1 = vmul.f32 %v860_v63, %v718_v55  ;;  %v1737_v22 = vmul.f32 %v4715_v52, %v1081_v41  ;;  %v1900_v23 = vrot.slane %v1828_v3, 1  ;;  %v2048_v10 = vmul.f32 %v4707_v48, %v1081_v41 }
 0x1bf   : > { %v830_v56 = vmax.f32 %v798_v60, 0.0  ;;  %v1577_v4 = vrot.slane %v1462_v46, 2  ;;  %v2370_v57 = vadd.f32 %v2322_v39, %v5648_v33  ;;  %v863_v2 = vmin.f32 %v831_v42, 6.0 }
 0x1c0   : > { %v925_v53 = vmul.f32 0.16666667, %v892_v1  ;;  %v1316_v25 = vsel %vm1286_vm3, %v1314_v58, %v1315_v20  ;;  %v1410_v21 = vadd.f32 %v1314_v58, %v5615_v16  ;;  %v1785_v55 = vadd.f32 %v1737_v22, %v5628_v14 }
 0x1c1   : > { %v1996_v36 = vadd.f32 %v1900_v23, %v5641_v8  ;;  %v2487_v63 = vsel %vm1286_vm3, %v2485_v18, %v2486_v45  ;;  %v2581_v59 = vadd.f32 %v2485_v18, %v5650_v12  ;;  %v2743_v3 = vrot.slane %v2633_v40, 2 }
 0x1c2   : > { %1032 = vst.msk [vmem:[#allocation2 + $0x168] sm:$0xff] %vm937_vm1, %v925_v53  ;;  %v801_v41 = vadd.f32 3.0, %v5721_v6  ;;  %v895_v39 = vmul.f32 %v863_v2, %v733_v5  ;;  %v862_v33 = vmin.f32 %v830_v56, 6.0  ;;  %v5736_v42 = vadd.f32 %v5272_v34, %v5140_v28 }
 0x1c3   : > { %v5740_v58 = vadd.f32 %v5272_v34, %v5170_v47  ;;  %v5742_v16 = vadd.f32 %v2747_v13, %v2583_v7  ;;  %v1902_v14 = vsel %vm1286_vm3, %v1900_v23, %v1901_v37  ;;  %v2160_v8 = vrot.slane %v2048_v10, 2 }
 0x1c4   : > { %v2582_v12 = vadd.f32 %v2487_v63, %v2370_v57  ;;  %v1411_v20 = vadd.f32 %v1316_v25, %v1150_v38  ;;  %v1687_v53 = vadd.f32 %v1577_v4, %v1410_v21  ;;  %v1997_v18 = vadd.f32 %v1902_v14, %v1785_v55  ;;  %v1086_v25 = vld [vmem:[#allocation2 + $0x150] sm:$0xff]  ;;  %v7337_v63 = vld [vmem:[#allocation12_spill] sm:$0xff] }
 0x1c5   : > { %7332 = vst [vmem:[#allocation29_spill] sm:$0xff] %v5742_v16  ;;  %v2274_v45 = vadd.f32 %v2164_v54, %v1998_v17  ;;  %v2272_v2 = vadd.f32 %v2160_v8, %v1996_v36  ;;  %v2745_v5 = vsel %vm1531_vm4, %v2743_v3, %v2744_v44  ;;  %v5746_v60 = vadd.f32 %v2743_v3, %v2581_v59 }
 0x1c6   : > { %v833_v28 = vmax.f32 %v801_v41, 0.0  ;;  %v928_v46 = vmul.f32 0.16666667, %v895_v39  ;;  %v894_v47 = vmul.f32 %v862_v33, %v5691_v27  ;;  %v800_v7 = vadd.f32 3.0, %v5736_v42 }
 0x1c7   : > { %7333 = vst [vmem:[#allocation35_spill] sm:$0xff] %v5746_v60  ;;  %v803_v13 = vadd.f32 3.0, %v5740_v58  ;;  %v5752_v37 = vadd.f32 %v2745_v5, %v2582_v12  ;;  %v5757_v44 = vadd.f32 %v5272_v34, %v5175_v49  ;;  %v7335_v54 = vrot.slane %v5646_v30, 2  ;;  %v5776_v30 = vld [vmem:[#allocation2 + $0x180] sm:$0xff] }
 0x1c8   : > { %v5763_v27 = vadd.f32 %v5656_v24, %v1687_v53  ;;  %v7336_v40 = vrot.slane %v5660_v26, 2  ;;  %1035 = vst.msk [vmem:[#allocation2 + $0x190] sm:$0xff] %vm937_vm1, %v928_v46  ;;  %v927_v22 = vmul.f32 0.16666667, %v894_v47  ;;  %v5774_v49 = vadd.f32 %v5663_v9, %v2272_v2 }
 0x1c9   : > { %7334 = vst [vmem:[#allocation34_spill] sm:$0xff] %v5752_v37  ;;  %v1579_v38 = vsel %vm1531_vm4, %v1577_v4, %v7335_v54  ;;  %v865_v4 = vmin.f32 %v833_v28, 6.0  ;;  %v5780_v57 = vmul.f32 %v4671_v61, %v1086_v25  ;;  %v832_v26 = vmax.f32 %v800_v7, 0.0 }
 0x1ca   : > { %v2162_v1 = vsel %vm1531_vm4, %v2160_v8, %v7336_v40  ;;  %v5769_v10 = vadd.f32 %v1579_v38, %v1411_v20  ;;  %1034 = vst.msk [vmem:[#allocation2 + $0x188] sm:$0xff] %vm937_vm1, %v927_v22  ;;  %v835_v21 = vmax.f32 %v803_v13, 0.0  ;;  %v5786_v36 = vmul.f32 %v4715_v52, %v5687_v32 }
 0x1cb   : > { %v5771_v56 = vadd.f32 %v2162_v1, %v1997_v18  ;;  %v802_v9 = vadd.f32 3.0, %v5757_v44  ;;  %v763_v59 = vadd.f32 %v5272_v34, %v7337_v63  ;;  %v5792_v3 = vmul.f32 %v4679_v11, %v1086_v25  ;;  %v7342_v1 = vld [vmem:[#allocation23_spill] sm:$0xff] }
 0x1cc   : > { %v1741_v41 = vmul.f32 %v4715_v52, %v1086_v25  ;;  %v5797_v39 = vmul.f32 %v4765_v29, %v5687_v32  ;;  %v5801_v33 = vmul.f32 %v4688_v19, %v5776_v30  ;;  %v5804_v14 = vmul.f32 %v4742_v15, %v1086_v25  ;;  %v1085_v32 = vld [vmem:[#allocation2 + $0x148] sm:$0xff] }
 0x1cd   : > { %v5807_v8 = vmul.f32 %v4707_v48, %v1086_v25  ;;  %v2326_v12 = vmul.f32 %v4765_v29, %v1086_v25  ;;  %v897_v20 = vmul.f32 %v865_v4, %v5721_v6  ;;  %v7128_v53 = vrot.slane %v5780_v57, 1  ;;  %v7339_v6 = vld [vmem:[#allocation6_spill] sm:$0xff] }
 0x1ce   : > { %v5813_v18 = vmul.f32 %v4788_v43, %v1086_v25  ;;  %v864_v2 = vmin.f32 %v832_v26, 6.0  ;;  %v867_v5 = vmin.f32 %v835_v21, 6.0  ;;  %v5816_v28 = vmul.f32 %v5346_v35, %v1086_v25 }
 0x1cf   : > { %v930_v46 = vmul.f32 0.16666667, %v897_v20  ;;  %v834_v47 = vmax.f32 %v802_v9, 0.0  ;;  %v805_v7 = vadd.f32 3.0, %v763_v59  ;;  %v1154_v13 = vmul.f32 %v4688_v19, %v1086_v25 }
 0x1d0   : > { %7338 = vst [vmem:[#allocation21_spill] sm:$0xff] %v5816_v28  ;;  %v1789_v54 = vadd.f32 %v1741_v41, %v5714_v51  ;;  %v2374_v38 = vadd.f32 %v2326_v12, %v2274_v45  ;;  %v758_v40 = vadd.f32 %v5272_v34, %v7339_v6  ;;  %v7127_v22 = vrot.slane %v5804_v14, 1 }
 0x1d1   : > { %v1242_v26 = vmul.f32 %v4671_v61, %v1085_v32  ;;  %1037 = vst.msk [vmem:[#allocation2 + $0x1b0] sm:$0xff] %vm937_vm1, %v930_v46  ;;  %v7126_v21 = vrot.slane %v5813_v18, 1  ;;  %v5829_v25 = vmul.f32 %v4679_v11, %v1085_v32  ;;  %v896_v51 = vmul.f32 %v864_v2, %v5736_v42 }
 0x1d2   : > { %v899_v45 = vmul.f32 %v867_v5, %v5740_v58  ;;  %v5835_v9 = vadd.f32 %v7128_v53, %v1154_v13  ;;  %v866_v41 = vmin.f32 %v834_v47, 6.0  ;;  %v837_v12 = vmax.f32 %v805_v7, 0.0  ;;  %v3194_v47 = vld [vmem:[%s7080_s6] sm:$0xff] }
 0x1d3   : > { %v5840_v20 = vadd.f32 %v7127_v22, %v1789_v54  ;;  %v5844_v46 = vadd.f32 %v7126_v21, %v2374_v38  ;;  %v1153_v42 = vmul.f32 %v4688_v19, %v1085_v32  ;;  %v804_v2 = vadd.f32 3.0, %v758_v40  ;;  %v3196_v22 = vld [vmem:[%s7080_s6 + $0x10] sm:$0xff] }
 0x1d4   : > { %v1317_v58 = vrot.slane %v1242_v26, 1  ;;  %v1740_v5 = vmul.f32 %v4715_v52, %v1085_v32  ;;  %v1830_v13 = vmul.f32 %v4742_v15, %v1085_v32  ;;  %v5850_v6 = vmul.f32 %v4707_v48, %v1085_v32  ;;  %v3195_v26 = vld [vmem:[%s7080_s6 + $0x8] sm:$0xff] }
 0x1d5   : > { %7340 = vst [vmem:[#allocation31_spill] sm:$0xff] %v5844_v46  ;;  %v2325_v54 = vmul.f32 %v4765_v29, %v1085_v32  ;;  %v929_v38 = vmul.f32 0.16666667, %v896_v51  ;;  %v932_v23 = vmul.f32 0.16666667, %v899_v45  ;;  %v2416_v24 = vmul.f32 %v4788_v43, %v1085_v32  ;;  %v7343_v45 = vld [vmem:[#allocation24_spill] sm:$0xff] }
 0x1d6   : > { %v5862_v55 = vmul.f32 %v5346_v35, %v1085_v32  ;;  %v898_v63 = vmul.f32 %v866_v41, %v5757_v44  ;;  %v869_v4 = vmin.f32 %v837_v12, 6.0  ;;  %v836_v17 = vmax.f32 %v804_v2, 0.0  ;;  %v3197_v35 = vld [vmem:[%s7080_s6 + $0x18] sm:$0xff] }
 0x1d7   : > { %1036 = vst.msk [vmem:[#allocation2 + $0x1a8] sm:$0xff] %vm937_vm1, %v929_v38  ;;  %1039 = vst.msk [vmem:[#allocation2 + $0x1d0] sm:$0xff] %vm937_vm1, %v932_v23  ;;  %v773_v51 = vadd.f32 %v5272_v34, %v7342_v1  ;;  %v768_v21 = vadd.f32 %v5272_v34, %v7343_v45  ;;  %v1413_v44 = vadd.f32 %v1317_v58, %v5653_v50  ;;  %v4354_v23 = vmov 0.0|0.0  }
 0x1d8   : > { %7341 = vst [vmem:[#allocation30_spill] sm:$0xff] %v5862_v55  ;;  %v931_v32 = vmul.f32 0.16666667, %v898_v63  ;;  %v901_v41 = vmul.f32 %v869_v4, %v763_v59  ;;  %4281 = vmatprep.subr.bf16.mxu0 %v4354_v23  ;;  %v4282_v12 = vpack.c.bf16 %v3195_v26, %v3194_v47  ;;  %v1903_v2 = vrot.slane %v1830_v13, 1 }
 0x1d9   : > { %v868_v1 = vmin.f32 %v836_v17, 6.0  ;;  %v807_v38 = vadd.f32 3.0, %v773_v51  ;;  %v806_v7 = vadd.f32 3.0, %v768_v21  ;;  %v2488_v34 = vrot.slane %v2416_v24, 1 }
 0x1da   : > { %1038 = vst.msk [vmem:[#allocation2 + $0x1c8] sm:$0xff] %vm937_vm1, %v931_v32  ;;  %v934_v45 = vmul.f32 0.16666667, %v901_v41  ;;  %4283 = vmatpush3.bf16.msra.mxu0 %v4282_v12  ;;  %v4285_v53 = vpack.c.bf16 %v3197_v35, %v3196_v22  ;;  %v7344_v16 = vrot.slane %v5780_v57, 1  ;;  %v7345_v4 = vmov 0.0  }
 0x1db   : > { %v900_v50 = vmul.f32 %v868_v1, %v758_v40  ;;  %v839_v63 = vmax.f32 %v807_v38, 0.0  ;;  %v838_v59 = vmax.f32 %v806_v7, 0.0  ;;  %4284 = vmatprep.subr.bf16.mxu0 %v4354_v23  ;;  %4217 = vmatprep.mubr.msk.f32.mxu0 %vm4355_vm6, %v7345_v4  ;;  %v1788_v17 = vadd.f32 %v1740_v5, %v5769_v10 }
 0x1dc   : > { %v1319_v60 = vsel %vm1286_vm3, %v1317_v58, %v7344_v16  ;;  %v1999_v24 = vadd.f32 %v1903_v2, %v5763_v27  ;;  %v2373_v13 = vadd.f32 %v2325_v54, %v5771_v56  ;;  %v2584_v47 = vadd.f32 %v2488_v34, %v5774_v49  ;;  %1041 = vst.msk [vmem:[#allocation2 + $0x1f0] sm:$0xff] %vm937_vm1, %v934_v45  ;;  %v1090_v49 = vld [vmem:[#allocation2 + $0x170] sm:$0xff] }
 0x1dd   : > { %4222 = vmatprep.mubr.msk.f32.mxu1 %vm4355_vm6, %v7345_v4  ;;  %v2165_v16 = vrot.slane %v5850_v6, 2  ;;  %v933_v57 = vmul.f32 0.16666667, %v900_v50  ;;  %v871_v40 = vmin.f32 %v839_v63, 6.0  ;;  %v870_v22 = vmin.f32 %v838_v59, 6.0 }
 0x1de   : > { %v1414_v58 = vadd.f32 %v1319_v60, %v1153_v42  ;;  %v7346_v7 = vrot.slane %v5829_v25, 2  ;;  %v7347_v10 = vrot.slane %v5804_v14, 1  ;;  %v7131_v56 = vrot.slane %v5862_v55, 2  ;;  %4286 = vmatpush3.bf16.msra.mxu0 %v4285_v53  ;;  %v1089_v42 = vld [vmem:[#allocation2 + $0x168] sm:$0xff] }
 0x1df   : > { %v7348_v5 = vrot.slane %v5813_v18, 1  ;;  %v7349_v6 = vrot.slane %v5666_v62, 2  ;;  %v7350_v35 = vrot.slane %v5792_v3, 2  ;;  %1040 = vst.msk [vmem:[#allocation2 + $0x1e8] sm:$0xff] %vm937_vm1, %v933_v57  ;;  %v903_v14 = vmul.f32 %v871_v40, %v773_v51 }
 0x1e0   : > { %v1690_v26 = vadd.f32 %v7346_v7, %v1413_v44  ;;  %v1905_v27 = vsel %vm1286_vm3, %v1903_v2, %v7347_v10  ;;  %v902_v44 = vmul.f32 %v870_v22, %v768_v21  ;;  %v2275_v41 = vadd.f32 %v2165_v16, %v1999_v24  ;;  %v5953_v22 = vld [vmem:[%s7077_s3 + $0x8] ss:$0 sm:$0xff] }
 0x1e1   : > { %v2490_v54 = vsel %vm1286_vm3, %v2488_v34, %v7348_v5  ;;  %v1586_v60 = vsel %vm1531_vm4, %v7350_v35, %v7349_v6  ;;  %v2000_v32 = vadd.f32 %v1905_v27, %v1788_v17  ;;  %v5909_v53 = vadd.f32 %v7131_v56, %v2584_v47  ;;  %7362 = vst [vmem:[#allocation38_spill] sm:$0xff] %v5953_v22  ;;  %v6087_v56 = vld [vmem:[#allocation2 + $0x1d0] sm:$0xff] }
 0x1e2   : > { %v5905_v23 = vadd.f32 %v2490_v54, %v2373_v13  ;;  %v1245_v18 = vmul.f32 %v4671_v61, %v1090_v49  ;;  %v7353_v62 = vrot.slane %v5681_v31, 2  ;;  %v7354_v12 = vrot.slane %v5807_v8, 2  ;;  %7383 = vst [vmem:[#allocation57_spill] sm:$0xff] %v6087_v56 }
 0x1e3   : > { %7352 = vst [vmem:[#allocation15_spill] sm:$0xff] %v5909_v53  ;;  %v936_v1 = vmul.f32 0.16666667, %v903_v14  ;;  %v935_v38 = vmul.f32 0.16666667, %v902_v44  ;;  %v1692_v21 = vadd.f32 %v1586_v60, %v5835_v9  ;;  %v1244_v34 = vmul.f32 %v4671_v61, %v1089_v42  ;;  %v6113_v55 = vld [vmem:[#allocation2 + $0x1f0] sm:$0xff] }
 0x1e4   : > { %7351 = vst [vmem:[#allocation32_spill] sm:$0xff] %v5905_v23  ;;  %v2169_v2 = vsel %vm1531_vm4, %v7354_v12, %v7353_v62  ;;  %v7355_v45 = vmov %v7350_v35  ;;  %v7356_v50 = vmov %v7346_v7  ;;  %v5926_v31 = vmul.f32 %v4679_v11, %v1090_v49  ;;  %v5983_v62 = vld [vmem:[#allocation2 + $0x190] sm:$0xff]  ;;  %v6091_v7 = vld [vmem:[#allocation2 + $0x1a0] sm:$0xff]  ;;  %7389 = vst [vmem:[#allocation63_spill] sm:$0xff] %v6113_v55 }
 0x1e5   : > { %v2277_v51 = vadd.f32 %v2169_v2, %v5840_v20  ;;  %v1584_v63 = vsel %vm1531_vm4, %v7356_v50, %v7355_v45  ;;  %v5929_v59 = vmul.f32 %v4742_v15, %v1090_v49  ;;  %v1790_v17 = vadd.f32 %v5786_v36, %v1690_v26  ;;  %1043 = vst.msk [vmem:[#allocation2 + $0x210] sm:$0xff] %vm937_vm1, %v936_v1 }
 0x1e6   : > { %v1691_v4 = vadd.f32 %v1584_v63, %v1414_v58  ;;  %1042 = vst.msk [vmem:[#allocation2 + $0x208] sm:$0xff] %vm937_vm1, %v935_v38  ;;  %v5936_v3 = vmul.f32 %v4707_v48, %v1090_v49  ;;  %v7359_v25 = vmov %v7354_v12  ;;  %v2375_v24 = vadd.f32 %v5797_v39, %v2275_v41  ;;  %7368 = vst [vmem:[#allocation42_spill] sm:$0xff] %v5983_v62  ;;  %v5985_v12 = vld [vmem:[#allocation2 + $0x188] sm:$0xff] }
 0x1e7   : > { %7357 = vst [vmem:[#allocation33_spill] sm:$0xff] %v5929_v59  ;;  %v2167_v20 = vsel %vm1531_vm4, %v2165_v16, %v7359_v25  ;;  %v1321_v13 = vrot.slane %v1245_v18, 1  ;;  %v1744_v47 = vmul.f32 %v4715_v52, %v1090_v49  ;;  %v5944_v36 = vmul.f32 %v4788_v43, %v1090_v49  ;;  %7369 = vst [vmem:[#allocation43_spill] sm:$0xff] %v5985_v12  ;;  %v6115_v28 = vld [vmem:[#allocation2 + $0x1e8] sm:$0xff] }
 0x1e8   : > { %7358 = vst [vmem:[#allocation25_spill] sm:$0xff] %v5936_v3  ;;  %v5947_v57 = vmul.f32 %v4742_v15, %v1089_v42  ;;  %v2329_v40 = vmul.f32 %v4765_v29, %v1090_v49  ;;  %v5956_v8 = vmul.f32 %v5953_v22, %v1090_v49  ;;  %v1320_v39 = vrot.slane %v1244_v34, 1  ;;  %7390 = vst [vmem:[#allocation64_spill] sm:$0xff] %v6115_v28 }
 0x1e9   : > { %7360 = vst [vmem:[#allocation37_spill] sm:$0xff] %v5944_v36  ;;  %v2276_v16 = vadd.f32 %v2167_v20, %v2000_v32  ;;  %v1157_v58 = vmul.f32 %v4688_v19, %v1090_v49  ;;  %v1792_v26 = vadd.f32 %v1744_v47, %v1692_v21  ;;  %v7135_v10 = vrot.slane %v5929_v59, 1  ;;  %v6137_v36 = vld [vmem:[#allocation2 + $0x1d8] sm:$0x1] }
 0x1ea   : > { %7361 = vst [vmem:[#allocation36_spill] sm:$0xff] %v5947_v57  ;;  %7363 = vst [vmem:[#allocation12_spill] sm:$0xff] %v5956_v8  ;;  %v5962_v5 = vadd.f32 %v2329_v40, %v2277_v51  ;;  %v5965_v54 = vmul.f32 %v4679_v11, %v1089_v42  ;;  %v5968_v6 = vmul.f32 %v4788_v43, %v1089_v42  ;;  %v7134_v49 = vrot.slane %v5947_v57, 1 }
 0x1eb   : > { %v5970_v35 = vadd.f32 %v1321_v13, %v1157_v58  ;;  %v5975_v14 = vmul.f32 %v4707_v48, %v1089_v42  ;;  %v1416_v32 = vadd.f32 %v1320_v39, %v5702_v0  ;;  %v1743_v41 = vmul.f32 %v4715_v52, %v1089_v42  ;;  %v6032_v58 = vld [vmem:[#allocation2 + $0x1b0] sm:$0xff]  ;;  %7392 = vst [vmem:[#allocation66_spill] sm:$0xff] %v6137_v36 }
 0x1ec   : > { %7364 = vst [vmem:[#allocation6_spill] sm:$0xff] %v5962_v5  ;;  %7365 = vst [vmem:[#allocation23_spill] sm:$0xff] %v5968_v6  ;;  %v5981_v18 = vmul.f32 %v5953_v22, %v1089_v42  ;;  %v5989_v2 = vadd.f32 %v7135_v10, %v1792_v26  ;;  %v1322_v1 = vsel %vm1286_vm3, %v1320_v39, %v1321_v13  ;;  %v7136_v51 = vrot.slane %v5965_v54, 2  ;;  %v6101_v10 = vld [vmem:[#allocation2 + $0x1c0] sm:$0xff] }
 0x1ed   : > { %7366 = vst [vmem:[#allocation24_spill] sm:$0xff] %v5975_v14  ;;  %v2002_v38 = vadd.f32 %v7134_v49, %v1790_v17  ;;  %v2328_v0 = vmul.f32 %v4765_v29, %v1089_v42  ;;  %v1156_v21 = vmul.f32 %v4688_v19, %v1089_v42  ;;  %v5997_v34 = vadd.f32 %v1743_v41, %v1691_v4  ;;  %v6099_v49 = vld [vmem:[#allocation2 + $0x1c8] sm:$0xff] }
 0x1ee   : > { %7367 = vst [vmem:[#allocation41_spill] sm:$0xff] %v5981_v18  ;;  %7370 = vst [vmem:[#allocation44_spill] sm:$0xff] %v5989_v2  ;;  %v7132_v45 = vrot.slane %v5968_v6, 1  ;;  %v7133_v50 = vrot.slane %v5975_v14, 2  ;;  %v1247_v25 = vmul.f32 %v4671_v61, %v5983_v62  ;;  %v1246_v17 = vmul.f32 %v4671_v61, %v5985_v12  ;;  %v6110_v18 = vld [vmem:[#allocation2 + $0x198] sm:$0x1] }
 0x1ef   : > { %7371 = vst [vmem:[#allocation45_spill] sm:$0xff] %v5997_v34  ;;  %v6001_v63 = vadd.f32 %v2328_v0, %v2276_v16  ;;  %v6007_v20 = vadd.f32 %v1322_v1, %v1156_v21  ;;  %v6011_v42 = vadd.f32 %v7136_v51, %v1416_v32  ;;  %v1160_v40 = vmul.f32 %v4688_v19, %v5983_v62 }
 0x1f0   : > { %v6015_v4 = vadd.f32 %v7132_v45, %v2375_v24  ;;  %v6020_v47 = vadd.f32 %v7133_v50, %v2002_v38  ;;  %v6026_v39 = vmul.f32 %v4679_v11, %v5983_v62  ;;  %v6030_v16 = vmul.f32 %v4742_v15, %v5983_v62  ;;  %v6034_v24 = vld [vmem:[#allocation2 + $0x1a8] sm:$0xff]  ;;  %v6089_v45 = vld [vmem:[#allocation2 + $0x178] sm:$0x1]  ;;  %7386 = vst [vmem:[#allocation60_spill] sm:$0xff] %v6101_v10 }
 0x1f1   : > { %7372 = vst [vmem:[#allocation46_spill] sm:$0xff] %v6001_v63  ;;  %v6038_v26 = vmul.f32 %v4715_v52, %v5983_v62  ;;  %v6042_v32 = vmul.f32 %v4707_v48, %v5983_v62  ;;  %v6046_v41 = vmul.f32 %v5953_v22, %v5983_v62  ;;  %v6050_v1 = vmul.f32 %v4679_v11, %v5985_v12 }
 0x1f2   : > { %7373 = vst [vmem:[#allocation47_spill] sm:$0xff] %v6015_v4  ;;  %7374 = vst [vmem:[#allocation48_spill] sm:$0xff] %v6020_v47  ;;  %v1324_v38 = vrot.slane %v1247_v25, 1  ;;  %v1323_v0 = vrot.slane %v1246_v17, 1  ;;  %v6054_v21 = vmul.f32 %v4742_v15, %v5985_v12  ;;  %v6058_v9 = vmul.f32 %v4707_v48, %v5985_v12  ;;  %v6103_v4 = vld [vmem:[#allocation2 + $0x1e0] sm:$0xff] }
 0x1f3   : > { %7375 = vst [vmem:[#allocation49_spill] sm:$0xff] %v6030_v16  ;;  %7376 = vst [vmem:[#allocation50_spill] sm:$0xff] %v6038_v26  ;;  %v6062_v13 = vmul.f32 %v4765_v29, %v5983_v62  ;;  %v6066_v44 = vmul.f32 %v4788_v43, %v5985_v12  ;;  %v1248_v25 = vmul.f32 %v4671_v61, %v6034_v24  ;;  %v6150_v47 = vld [vmem:[#allocation2 + $0x1f8] sm:$0x1] }
 0x1f4   : > { %7377 = vst [vmem:[#allocation51_spill] sm:$0xff] %v6042_v32  ;;  %7378 = vst [vmem:[#allocation52_spill] sm:$0xff] %v6046_v41  ;;  %v1249_v17 = vmul.f32 %v4671_v61, %v6032_v58  ;;  %v1159_v60 = vmul.f32 %v4688_v19, %v5985_v12  ;;  %v6078_v50 = vmul.f32 %v4679_v11, %v6032_v58 }
 0x1f5   : > { %7379 = vst [vmem:[#allocation53_spill] sm:$0xff] %v6054_v21  ;;  %7380 = vst [vmem:[#allocation54_spill] sm:$0xff] %v6058_v9  ;;  %v6085_v51 = vmul.f32 %v4715_v52, %v5985_v12  ;;  %v6097_v27 = vmul.f32 %v4765_v29, %v5985_v12  ;;  %v1325_v46 = vsel %vm1286_vm3, %v1323_v0, %v1324_v38  ;;  %v1326_v53 = vrot.slane %v1248_v25, 1 }
 0x1f6   : > { %7381 = vst [vmem:[#allocation55_spill] sm:$0xff] %v6062_v13  ;;  %7382 = vst [vmem:[#allocation56_spill] sm:$0xff] %v6066_v44  ;;  %v6107_v23 = vadd.f32 %v1323_v0, %v5801_v33  ;;  %v1327_v37 = vrot.slane %v1249_v17, 1  ;;  %v1161_v12 = vmul.f32 %v4688_v19, %v6091_v7  ;;  %v1163_v22 = vmul.f32 %v4688_v19, %v6032_v58  ;;  %v6123_v0 = vld [vmem:[#allocation2 + $0x1b8] sm:$0x1] }
 0x1f7   : > { %7384 = vst [vmem:[#allocation58_spill] sm:$0xff] %v6089_v45  ;;  %7385 = vst [vmem:[#allocation59_spill] sm:$0xff] %v6097_v27  ;;  %v1251_v33 = vmul.f32 %v4671_v61, %v6087_v56  ;;  %v1164_v25 = vmul.f32 %v4688_v19, %v6101_v10  ;;  %v1167_v17 = vmul.f32 %v4688_v19, %v6103_v4 }
 0x1f8   : > { %7387 = vst [vmem:[#allocation61_spill] sm:$0xff] %v6103_v4  ;;  %7388 = vst [vmem:[#allocation62_spill] sm:$0xff] %v6110_v18  ;;  %v1250_v41 = vmul.f32 %v4671_v61, %v6099_v49  ;;  %v1420_v8 = vadd.f32 %v1325_v46, %v1159_v60  ;;  %v1162_v5 = vmul.f32 %v4688_v19, %v6034_v24 }
 0x1f9   : > { %7391 = vst [vmem:[#allocation65_spill] sm:$0xff] %v6123_v0  ;;  %v1421_v63 = vadd.f32 %v1324_v38, %v1160_v40  ;;  %v1470_v44 = vmul.f32 %v4679_v11, %v6089_v45  ;;  %v1473_v6 = vmul.f32 %v4679_v11, %v6110_v18  ;;  %v1166_v43 = vmul.f32 %v4688_v19, %v6087_v56 }
 0x1fa   : > { %v1252_v62 = vmul.f32 %v4671_v61, %v6115_v28  ;;  %v1253_v46 = vmul.f32 %v4671_v61, %v6113_v55  ;;  %v1328_v60 = vsel %vm1286_vm3, %v1326_v53, %v1327_v37  ;;  %v1330_v40 = vrot.slane %v1251_v33, 1  ;;  %7393 = vst [vmem:[#allocation67_spill] sm:$0xff] %v6150_v47 }
 0x1fb   : > { %v1424_v38 = vadd.f32 %v1327_v37, %v1163_v22  ;;  %v1474_v13 = vmul.f32 %v4679_v11, %v6034_v24  ;;  %v1476_v27 = vmul.f32 %v4679_v11, %v6123_v0  ;;  %v1165_v29 = vmul.f32 %v4688_v19, %v6099_v49 }
 0x1fc   : > { %v1329_v2 = vrot.slane %v1250_v41, 1  ;;  %v1422_v9 = vadd.f32 %v1326_v53, %v1161_v12  ;;  %v1477_v61 = vmul.f32 %v4679_v11, %v6099_v49  ;;  %v1169_v33 = vmul.f32 %v4688_v19, %v6113_v55 }
 0x1fd   : > { %v1423_v37 = vadd.f32 %v1328_v60, %v1162_v5  ;;  %v1478_v22 = vmul.f32 %v4679_v11, %v6087_v56  ;;  %v1479_v32 = vmul.f32 %v4679_v11, %v6137_v36  ;;  %v1332_v14 = vrot.slane %v1252_v62, 1 }
 0x1fe   : > { %v1333_v3 = vrot.slane %v1253_v46, 1  ;;  %v1480_v0 = vmul.f32 %v4679_v11, %v6115_v28  ;;  %v1481_v53 = vmul.f32 %v4679_v11, %v6113_v55  ;;  %v1427_v12 = vadd.f32 %v1330_v40, %v1166_v43 }
 0x1ff   : > { %v1482_v41 = vmul.f32 %v4679_v11, %v6150_v47  ;;  %v7394_v5 = vrot.slane %v5926_v31, 2  ;;  %v7395_v60 = vrot.slane %v5965_v54, 2  ;;  %v1590_v48 = vrot.slane %v1470_v44, 2 }
 0x200   : > { %v1331_v62 = vsel %vm1286_vm3, %v1329_v2, %v1330_v40  ;;  %v1425_v46 = vadd.f32 %v1329_v2, %v1164_v25  ;;  %v1595_v36 = vrot.slane %v1473_v6, 2  ;;  %v1597_v45 = vrot.slane %v1474_v13, 2 }
 0x201   : > { %v1589_v18 = vsel %vm1531_vm4, %v7395_v60, %v7394_v5  ;;  %v1600_v34 = vrot.slane %v1476_v27, 2  ;;  %v1602_v21 = vrot.slane %v1477_v61, 2  ;;  %v1603_v16 = vrot.slane %v1478_v22, 2 }
 0x202   : > { %v1605_v57 = vrot.slane %v1479_v32, 2  ;;  %v1168_v43 = vmul.f32 %v4688_v19, %v6115_v28  ;;  %v1334_v11 = vsel %vm1286_vm3, %v1332_v14, %v1333_v3  ;;  %v1607_v47 = vrot.slane %v1480_v0, 2 }
 0x203   : > { %v1608_v59 = vrot.slane %v1481_v53, 2  ;;  %v1426_v54 = vadd.f32 %v1331_v62, %v1165_v29  ;;  %v1430_v26 = vadd.f32 %v1333_v3, %v1169_v33  ;;  %v7396_v44 = vmov %v7394_v5 }
 0x204   : > { %v1591_v40 = vsel %vm1531_vm4, %v7396_v44, %v1590_v48  ;;  %v1610_v2 = vrot.slane %v1482_v41, 2  ;;  %v1428_v6 = vadd.f32 %v1332_v14, %v1167_v17  ;;  %v7397_v27 = vrot.slane %v6026_v39, 2 }
 0x205   : > { %v7398_v13 = vrot.slane %v6050_v1, 2  ;;  %v7400_v0 = vrot.slane %v6078_v50, 2  ;;  %v1429_v3 = vadd.f32 %v1334_v11, %v1168_v43  ;;  %v1604_v14 = vsel %vm1531_vm4, %v1602_v21, %v1603_v16 }
 0x206   : > { %v7399_v19 = vmov %v7397_v27  ;;  %v1606_v17 = vsel %vm1531_vm4, %v1603_v16, %v1605_v57  ;;  %v1609_v61 = vsel %vm1531_vm4, %v1607_v47, %v1608_v59  ;;  %v1694_v33 = vadd.f32 %v1589_v18, %v6007_v20  ;;  %v6203_v57 = vld [vmem:[#allocation2 + $0x208] sm:$0xff]  ;;  %v6205_v16 = vld [vmem:[#allocation2 + $0x200] sm:$0xff] }
 0x207   : > { %v1594_v32 = vsel %vm1531_vm4, %v7398_v13, %v7397_v27  ;;  %v1596_v25 = vsel %vm1531_vm4, %v7399_v19, %v1595_v36  ;;  %v1599_v29 = vsel %vm1531_vm4, %v1597_v45, %v7400_v0  ;;  %v7401_v31 = vmov %v7400_v0  ;;  %7403 = vst [vmem:[#allocation68_spill] sm:$0xff] %v6203_v57  ;;  %7404 = vst [vmem:[#allocation69_spill] sm:$0xff] %v6205_v16 }
 0x208   : > { %v1601_v48 = vsel %vm1531_vm4, %v7401_v31, %v1600_v34  ;;  %v1695_v39 = vadd.f32 %v1591_v40, %v5970_v35  ;;  %v7402_v36 = vmov %v7398_v13  ;;  %v1611_v53 = vsel %vm1531_vm4, %v1608_v59, %v1610_v2  ;;  %v7406_v13 = vld [vmem:[#allocation50_spill] sm:$0xff] }
 0x209   : > { %v1696_v22 = vadd.f32 %v7402_v36, %v6107_v23  ;;  %v1697_v41 = vadd.f32 %v1594_v32, %v1420_v8  ;;  %v1698_v50 = vadd.f32 %v1596_v25, %v1421_v63  ;;  %v1699_v5 = vadd.f32 %v1597_v45, %v1422_v9  ;;  %v6209_v23 = vld [vmem:[#allocation2 + $0x210] sm:$0xff] }
 0x20a   : > { %v1700_v34 = vadd.f32 %v1599_v29, %v1423_v37  ;;  %v1701_v60 = vadd.f32 %v1601_v48, %v1424_v38  ;;  %v1702_v62 = vadd.f32 %v1602_v21, %v1425_v46  ;;  %v1703_v43 = vadd.f32 %v1604_v14, %v1426_v54  ;;  %7405 = vst [vmem:[#allocation70_spill] sm:$0xff] %v6209_v23 }
 0x20b   : > { %v1704_v18 = vadd.f32 %v1606_v17, %v1427_v12  ;;  %v1705_v20 = vadd.f32 %v1607_v47, %v1428_v6  ;;  %v1706_v35 = vadd.f32 %v1609_v61, %v1429_v3  ;;  %v1745_v1 = vmul.f32 %v4715_v52, %v5776_v30 }
 0x20c   : > { %v1707_v59 = vadd.f32 %v1611_v53, %v1430_v26  ;;  %v1748_v9 = vmul.f32 %v4715_v52, %v6091_v7  ;;  %v1749_v8 = vmul.f32 %v4715_v52, %v6034_v24  ;;  %v1750_v45 = vmul.f32 %v4715_v52, %v6032_v58 }
 0x20d   : > { %v1751_v63 = vmul.f32 %v4715_v52, %v6101_v10  ;;  %v1752_v47 = vmul.f32 %v4715_v52, %v6099_v49  ;;  %v1753_v21 = vmul.f32 %v4715_v52, %v6087_v56  ;;  %v1754_v26 = vmul.f32 %v4715_v52, %v6103_v4 }
 0x20e   : > { %v1755_v38 = vmul.f32 %v4715_v52, %v6115_v28  ;;  %v1756_v37 = vmul.f32 %v4715_v52, %v6113_v55  ;;  %v1757_v12 = vmul.f32 %v4715_v52, %v6205_v16  ;;  %v1758_v46 = vmul.f32 %v4715_v52, %v6203_v57 }
 0x20f   : > { %v1759_v11 = vmul.f32 %v4715_v52, %v6209_v23  ;;  %v1793_v54 = vadd.f32 %v1745_v1, %v6011_v42  ;;  %v1836_v44 = vmul.f32 %v4742_v15, %v6034_v24  ;;  %v1837_v40 = vmul.f32 %v4742_v15, %v6032_v58 }
 0x210   : > { %v1838_v2 = vmul.f32 %v4742_v15, %v6099_v49  ;;  %v1839_v6 = vmul.f32 %v4742_v15, %v6087_v56  ;;  %v1840_v27 = vmul.f32 %v4742_v15, %v6115_v28  ;;  %v1841_v52 = vmul.f32 %v4742_v15, %v6113_v55 }
 0x211   : > { %v1794_v42 = vadd.f32 %v6085_v51, %v1694_v33  ;;  %v1795_v32 = vadd.f32 %v7406_v13, %v1695_v39  ;;  %v1842_v19 = vmul.f32 %v4742_v15, %v6203_v57  ;;  %v6254_v25 = vmul.f32 %v4742_v15, %v6209_v23 }
 0x212   : > { %v1796_v0 = vadd.f32 %v1748_v9, %v1696_v22  ;;  %v1797_v29 = vadd.f32 %v1749_v8, %v1697_v41  ;;  %v1798_v3 = vadd.f32 %v1750_v45, %v1698_v50  ;;  %v1799_v31 = vadd.f32 %v1751_v63, %v1699_v5  ;;  %v7407_v22 = vld [vmem:[#allocation33_spill] sm:$0xff]  ;;  %v7409_v50 = vld [vmem:[#allocation36_spill] sm:$0xff] }
 0x213   : > { %v1800_v48 = vadd.f32 %v1752_v47, %v1700_v34  ;;  %v1801_v14 = vadd.f32 %v1753_v21, %v1701_v60  ;;  %v1912_v17 = vrot.slane %v1836_v44, 1  ;;  %v1913_v61 = vrot.slane %v1837_v40, 1  ;;  %v7411_v9 = vld [vmem:[#allocation49_spill] sm:$0xff] }
 0x214   : > { %v1915_v36 = vrot.slane %v1838_v2, 1  ;;  %v1916_v53 = vrot.slane %v1839_v6, 1  ;;  %v1918_v51 = vrot.slane %v1840_v27, 1  ;;  %v1919_v33 = vrot.slane %v1841_v52, 1  ;;  %v7413_v45 = vld [vmem:[#allocation53_spill] sm:$0xff] }
 0x215   : > { %v1802_v39 = vadd.f32 %v1754_v26, %v1702_v62  ;;  %v1803_v1 = vadd.f32 %v1755_v38, %v1703_v43  ;;  %v1921_v13 = vrot.slane %v1842_v19, 1  ;;  %v1922_v16 = vrot.slane %v6254_v25, 1  ;;  %v7415_v47 = vld [vmem:[#allocation45_spill] sm:$0xff]  ;;  %v7418_v19 = vld [vmem:[#allocation58_spill] sm:$0xff]  ;;  %v7419_v25 = vld [vmem:[#allocation4_spill] sm:$0xff] }
 0x216   : > { %v1804_v4 = vadd.f32 %v1756_v37, %v1704_v18  ;;  %v1805_v15 = vadd.f32 %v1757_v12, %v1705_v20  ;;  %v1806_v10 = vadd.f32 %v1758_v46, %v1706_v35  ;;  %v7408_v41 = vrot.slane %v7407_v22, 1 }
 0x217   : > { %v7410_v5 = vrot.slane %v7409_v50, 1  ;;  %v1807_v60 = vadd.f32 %v1759_v11, %v1707_v59  ;;  %v7412_v8 = vrot.slane %v7411_v9, 1  ;;  %v7414_v63 = vrot.slane %v7413_v45, 1 }
 0x218   : > { %v1914_v43 = vsel %vm1286_vm3, %v1912_v17, %v1913_v61  ;;  %v1917_v18 = vsel %vm1286_vm3, %v1915_v36, %v1916_v53  ;;  %v1920_v20 = vsel %vm1286_vm3, %v1918_v51, %v1919_v33  ;;  %v1923_v59 = vsel %vm1286_vm3, %v1921_v13, %v1922_v16 }
 0x219   : > { %v1908_v34 = vsel %vm1286_vm3, %v7410_v5, %v7408_v41  ;;  %v1911_v62 = vsel %vm1286_vm3, %v7414_v63, %v7412_v8  ;;  %v7416_v35 = vmov %v7414_v63  ;;  %v7417_v37 = vmov %v7412_v8  ;;  %v7420_v41 = vld [vmem:[#allocation62_spill] sm:$0xff] }
 0x21a   : > { %v2003_v21 = vadd.f32 %v1908_v34, %v7415_v47  ;;  %v2005_v26 = vadd.f32 %v7416_v35, %v1793_v54  ;;  %v2006_v38 = vadd.f32 %v1911_v62, %v1794_v42  ;;  %v2007_v12 = vadd.f32 %v7417_v37, %v1795_v32  ;;  %v6280_v42 = vld [vmem:[#allocation2 + $0x218] sm:$0x1] }
 0x21b   : > { %v2008_v46 = vadd.f32 %v1912_v17, %v1796_v0  ;;  %v2009_v11 = vadd.f32 %v1914_v43, %v1797_v29  ;;  %v2010_v44 = vadd.f32 %v1913_v61, %v1798_v3  ;;  %v2011_v40 = vadd.f32 %v1915_v36, %v1799_v31  ;;  %7421 = vst [vmem:[#allocation50_spill] sm:$0xff] %v6280_v42  ;;  %v7422_v0 = vld [vmem:[#allocation65_spill] sm:$0xff] }
 0x21c   : > { %v2012_v2 = vadd.f32 %v1917_v18, %v1800_v48  ;;  %v2013_v6 = vadd.f32 %v1916_v53, %v1801_v14  ;;  %v2014_v27 = vadd.f32 %v1918_v51, %v1802_v39  ;;  %v2015_v52 = vadd.f32 %v1920_v20, %v1803_v1  ;;  %v7423_v48 = vld [vmem:[#allocation66_spill] sm:$0xff]  ;;  %v7424_v53 = vld [vmem:[#allocation67_spill] sm:$0xff] }
 0x21d   : > { %v2056_v22 = vmul.f32 %v7419_v25, %v7418_v19  ;;  %v2059_v54 = vmul.f32 %v7419_v25, %v7420_v41  ;;  %v2060_v50 = vmul.f32 %v7419_v25, %v6034_v24  ;;  %v2061_v32 = vmul.f32 %v7419_v25, %v6032_v58 }
 0x21e   : > { %v2062_v29 = vmul.f32 %v7419_v25, %v7422_v0  ;;  %v2063_v3 = vmul.f32 %v7419_v25, %v6099_v49  ;;  %v2064_v31 = vmul.f32 %v7419_v25, %v6087_v56  ;;  %v2065_v14 = vmul.f32 %v7419_v25, %v7423_v48  ;;  %v7425_v0 = vld [vmem:[#allocation25_spill] sm:$0xff] }
 0x21f   : > { %v2066_v17 = vmul.f32 %v7419_v25, %v6115_v28  ;;  %v2067_v61 = vmul.f32 %v7419_v25, %v6113_v55  ;;  %v2016_v36 = vadd.f32 %v1919_v33, %v1804_v4  ;;  %v2068_v51 = vmul.f32 %v7419_v25, %v7424_v53 }
 0x220   : > { %v2069_v39 = vmul.f32 %v7419_v25, %v6203_v57  ;;  %v2070_v1 = vmul.f32 %v7419_v25, %v6209_v23  ;;  %v2017_v5 = vadd.f32 %v1921_v13, %v1805_v15  ;;  %v2071_v34 = vmul.f32 %v7419_v25, %v6280_v42  ;;  %v7427_v15 = vld [vmem:[#allocation24_spill] sm:$0xff] }
 0x221   : > { %v2173_v9 = vrot.slane %v2056_v22, 2  ;;  %v2178_v8 = vrot.slane %v2059_v54, 2  ;;  %v2180_v45 = vrot.slane %v2060_v50, 2  ;;  %v2181_v63 = vrot.slane %v2061_v32, 2  ;;  %v7429_v22 = vld [vmem:[#allocation51_spill] sm:$0xff]  ;;  %v7431_v50 = vld [vmem:[#allocation54_spill] sm:$0xff] }
 0x222   : > { %v2183_v62 = vrot.slane %v2062_v29, 2  ;;  %v2185_v43 = vrot.slane %v2063_v3, 2  ;;  %v2186_v4 = vrot.slane %v2064_v31, 2  ;;  %v2188_v33 = vrot.slane %v2065_v14, 2 }
 0x223   : > { %v2190_v47 = vrot.slane %v2066_v17, 2  ;;  %v2191_v18 = vrot.slane %v2067_v61, 2  ;;  %v2018_v20 = vadd.f32 %v1923_v59, %v1806_v10  ;;  %v2193_v35 = vrot.slane %v2068_v51, 2 }
 0x224   : > { %v2195_v37 = vrot.slane %v2069_v39, 2  ;;  %v2196_v53 = vrot.slane %v2070_v1, 2  ;;  %v2019_v48 = vadd.f32 %v1922_v16, %v1807_v60  ;;  %v7426_v13 = vrot.slane %v7425_v0, 2  ;;  %v7435_v1 = vld [vmem:[#allocation44_spill] sm:$0xff] }
 0x225   : > { %v7428_v41 = vrot.slane %v7427_v15, 2  ;;  %v7430_v54 = vrot.slane %v7429_v22, 2  ;;  %v7432_v32 = vrot.slane %v7431_v50, 2  ;;  %v2198_v3 = vrot.slane %v2071_v34, 2 }
 0x226   : > { %v7433_v31 = vmov %v7426_v13  ;;  %v2182_v60 = vsel %vm1531_vm4, %v2180_v45, %v2181_v63  ;;  %v2184_v14 = vsel %vm1531_vm4, %v2181_v63, %v2183_v62  ;;  %v2189_v17 = vsel %vm1531_vm4, %v2186_v4, %v2188_v33 }
 0x227   : > { %v2172_v25 = vsel %vm1531_vm4, %v7428_v41, %v7426_v13  ;;  %v2177_v29 = vsel %vm1531_vm4, %v7432_v32, %v7430_v54  ;;  %v2174_v10 = vsel %vm1531_vm4, %v7433_v31, %v2173_v9  ;;  %v7434_v59 = vmov %v7430_v54 }
 0x228   : > { %v2179_v16 = vsel %vm1531_vm4, %v7434_v59, %v2178_v8  ;;  %v2187_v41 = vsel %vm1531_vm4, %v2185_v43, %v2186_v4  ;;  %v2192_v61 = vsel %vm1531_vm4, %v2190_v47, %v2191_v18  ;;  %v2279_v51 = vadd.f32 %v2172_v25, %v2003_v21 }
 0x229   : > { %v2194_v39 = vsel %vm1531_vm4, %v2191_v18, %v2193_v35  ;;  %v2197_v0 = vsel %vm1531_vm4, %v2195_v37, %v2196_v53  ;;  %v2280_v34 = vadd.f32 %v2174_v10, %v7435_v1  ;;  %v7436_v9 = vmov %v7432_v32  ;;  %v7437_v10 = vld [vmem:[#allocation10_spill] sm:$0xff]  ;;  %v6335_v1 = vld [vmem:[#allocation2 + $0x228] sm:$0xff] }
 0x22a   : > { %v2281_v8 = vadd.f32 %v7436_v9, %v2005_v26  ;;  %v2199_v13 = vsel %vm1531_vm4, %v2196_v53, %v2198_v3  ;;  %v2282_v15 = vadd.f32 %v2177_v29, %v2006_v38  ;;  %v2283_v63 = vadd.f32 %v2179_v16, %v2007_v12  ;;  %v1112_v26 = vld [vmem:[#allocation2 + $0x220] sm:$0xff]  ;;  %7438 = vst [vmem:[#allocation33_spill] sm:$0xff] %v6335_v1  ;;  %v6337_v38 = vld [vmem:[#allocation2 + $0x230] sm:$0xff] }
 0x22b   : > { %v2284_v62 = vadd.f32 %v2180_v45, %v2008_v46  ;;  %v2285_v22 = vadd.f32 %v2182_v60, %v2009_v11  ;;  %v2286_v54 = vadd.f32 %v2184_v14, %v2010_v44  ;;  %v2287_v4 = vadd.f32 %v2185_v43, %v2011_v40  ;;  %7439 = vst [vmem:[#allocation36_spill] sm:$0xff] %v6337_v38  ;;  %v7440_v44 = vld [vmem:[#allocation60_spill] sm:$0xff]  ;;  %v7444_v29 = vld [vmem:[#allocation59_spill] sm:$0xff] }
 0x22c   : > { %v2288_v33 = vadd.f32 %v2187_v41, %v2012_v2  ;;  %v2289_v32 = vadd.f32 %v2189_v17, %v2013_v6  ;;  %v2290_v21 = vadd.f32 %v2190_v47, %v2014_v27  ;;  %v2291_v25 = vadd.f32 %v2192_v61, %v2015_v52  ;;  %v7441_v6 = vld [vmem:[#allocation61_spill] sm:$0xff]  ;;  %v7445_v16 = vld [vmem:[#allocation55_spill] sm:$0xff]  ;;  %v7446_v61 = vld [vmem:[#allocation42_spill] sm:$0xff] }
 0x22d   : > { %v2292_v18 = vadd.f32 %v2194_v39, %v2016_v36  ;;  %v2293_v35 = vadd.f32 %v2195_v37, %v2017_v5  ;;  %v2294_v31 = vadd.f32 %v2197_v0, %v2018_v20  ;;  %v2295_v59 = vadd.f32 %v2199_v13, %v2019_v48  ;;  %v7442_v48 = vld [vmem:[#allocation69_spill] sm:$0xff]  ;;  %v7443_v20 = vld [vmem:[#allocation48_spill] sm:$0xff] }
 0x22e   : > { %v2330_v50 = vmul.f32 %v7437_v10, %v5776_v30  ;;  %v2333_v12 = vmul.f32 %v7437_v10, %v6091_v7  ;;  %v2334_v46 = vmul.f32 %v7437_v10, %v6034_v24  ;;  %v2335_v11 = vmul.f32 %v7437_v10, %v6032_v58  ;;  %v7447_v39 = vld [vmem:[#allocation13_spill] sm:$0xff] }
 0x22f   : > { %v2336_v40 = vmul.f32 %v7437_v10, %v7440_v44  ;;  %v2337_v30 = vmul.f32 %v7437_v10, %v6099_v49  ;;  %v2338_v2 = vmul.f32 %v7437_v10, %v6087_v56  ;;  %v2339_v27 = vmul.f32 %v7437_v10, %v7441_v6 }
 0x230   : > { %v2340_v7 = vmul.f32 %v7437_v10, %v6115_v28  ;;  %v2341_v52 = vmul.f32 %v7437_v10, %v6113_v55  ;;  %v2342_v36 = vmul.f32 %v7437_v10, %v7442_v48  ;;  %v2343_v53 = vmul.f32 %v7437_v10, %v6203_v57 }
 0x231   : > { %v2344_v5 = vmul.f32 %v7437_v10, %v6209_v23  ;;  %v2345_v45 = vmul.f32 %v7437_v10, %v1112_v26  ;;  %v2346_v43 = vmul.f32 %v7437_v10, %v6335_v1  ;;  %v2347_v47 = vmul.f32 %v7437_v10, %v6337_v38 }
 0x232   : > { %v2378_v37 = vadd.f32 %v2330_v50, %v7443_v20  ;;  %v2379_v3 = vadd.f32 %v7444_v29, %v2279_v51  ;;  %v2380_v60 = vadd.f32 %v7445_v16, %v2280_v34  ;;  %v2381_v14 = vadd.f32 %v2333_v12, %v2281_v8 }
 0x233   : > { %v2382_v41 = vadd.f32 %v2334_v46, %v2282_v15  ;;  %v2383_v17 = vadd.f32 %v2335_v11, %v2283_v63  ;;  %v2421_v0 = vmul.f32 %v7447_v39, %v7446_v61  ;;  %v2422_v9 = vmul.f32 %v7447_v39, %v6034_v24 }
 0x234   : > { %v2423_v13 = vmul.f32 %v7447_v39, %v6032_v58  ;;  %v2424_v10 = vmul.f32 %v7447_v39, %v6099_v49  ;;  %v2425_v51 = vmul.f32 %v7447_v39, %v6087_v56  ;;  %v2426_v34 = vmul.f32 %v7447_v39, %v6115_v28 }
 0x235   : > { %v2427_v8 = vmul.f32 %v7447_v39, %v6113_v55  ;;  %v2428_v15 = vmul.f32 %v7447_v39, %v6203_v57  ;;  %v2429_v63 = vmul.f32 %v7447_v39, %v6209_v23  ;;  %v2430_v50 = vmul.f32 %v7447_v39, %v6335_v1 }
 0x236   : > { %v6393_v26 = vmul.f32 %v7447_v39, %v6337_v38  ;;  %v2384_v12 = vadd.f32 %v2336_v40, %v2284_v62  ;;  %v2385_v46 = vadd.f32 %v2337_v30, %v2285_v22  ;;  %v2386_v11 = vadd.f32 %v2338_v2, %v2286_v54  ;;  %v7452_v30 = vld [vmem:[#allocation23_spill] sm:$0xff] }
 0x237   : > { %v2387_v44 = vadd.f32 %v2339_v27, %v2287_v4  ;;  %v2388_v6 = vadd.f32 %v2340_v7, %v2288_v33  ;;  %v2495_v48 = vrot.slane %v2421_v0, 1  ;;  %v2497_v20 = vrot.slane %v2422_v9, 1  ;;  %v7450_v33 = vld [vmem:[#allocation37_spill] sm:$0xff]  ;;  %v7454_v7 = vld [vmem:[#allocation56_spill] sm:$0xff] }
 0x238   : > { %7448 = vst [vmem:[#allocation49_spill] sm:$0xff] %v6393_v26  ;;  %v2498_v29 = vrot.slane %v2423_v13, 1  ;;  %v2500_v16 = vrot.slane %v2424_v10, 1  ;;  %v2501_v61 = vrot.slane %v2425_v51, 1  ;;  %v2503_v42 = vrot.slane %v2426_v34, 1 }
 0x239   : > { %v2504_v57 = vrot.slane %v2427_v8, 1  ;;  %v2506_v23 = vrot.slane %v2428_v15, 1  ;;  %v2507_v55 = vrot.slane %v2429_v63, 1  ;;  %v2509_v28 = vrot.slane %v2430_v50, 1  ;;  %v7460_v50 = vld [vmem:[#allocation38_spill] sm:$0xff] }
 0x23a   : > { %v7198_v1 = vrot.slane %v6393_v26, 1  ;;  %v2389_v56 = vadd.f32 %v2341_v52, %v2289_v32  ;;  %v2390_v39 = vadd.f32 %v2342_v36, %v2290_v21  ;;  %v2391_v38 = vadd.f32 %v2343_v53, %v2291_v25 }
 0x23b   : > { %v2392_v62 = vadd.f32 %v2344_v5, %v2292_v18  ;;  %v2393_v22 = vadd.f32 %v2345_v45, %v2293_v35  ;;  %v2394_v54 = vadd.f32 %v2346_v43, %v2294_v31  ;;  %v6396_v4 = vadd.f32 %v2347_v47, %v2295_v59  ;;  %v7456_v35 = vld [vmem:[#allocation46_spill] sm:$0xff] }
 0x23c   : > { %v7451_v40 = vrot.slane %v7450_v33, 1  ;;  %v7453_v2 = vrot.slane %v7452_v30, 1  ;;  %v7455_v0 = vrot.slane %v7454_v7, 1  ;;  %v2499_v13 = vsel %vm1286_vm3, %v2497_v20, %v2498_v29  ;;  %v7457_v59 = vld [vmem:[#allocation6_spill] sm:$0xff]  ;;  %v7469_v33 = vld [vmem:[#allocation68_spill] sm:$0xff] }
 0x23d   : > { %7449 = vst [vmem:[#allocation53_spill] sm:$0xff] %v6396_v4  ;;  %v2502_v32 = vsel %vm1286_vm3, %v2500_v16, %v2501_v61  ;;  %v2505_v21 = vsel %vm1286_vm3, %v2503_v42, %v2504_v57  ;;  %v2508_v25 = vsel %vm1286_vm3, %v2506_v23, %v2507_v55  ;;  %v2511_v18 = vsel %vm1286_vm3, %v2509_v28, %v7198_v1  ;;  %v7470_v30 = vld [vmem:[#allocation70_spill] sm:$0xff]  ;;  %v7514_v4 = vld [vmem:[#allocation15_spill] sm:$0xff] }
 0x23e   : > { %v2493_v27 = vsel %vm1286_vm3, %v7453_v2, %v7451_v40  ;;  %v2496_v9 = vsel %vm1286_vm3, %v7455_v0, %v2495_v48  ;;  %v7458_v52 = vmov %v7451_v40  ;;  %v7459_v53 = vmov %v7455_v0  ;;  %v7472_v0 = vld [vmem:[#allocation33_spill] sm:$0xff] }
 0x23f   : > { %v6414_v31 = vadd.f32 %v2493_v27, %v7456_v35  ;;  %v6419_v36 = vadd.f32 %v7458_v52, %v7457_v59  ;;  %v6423_v5 = vadd.f32 %v7459_v53, %v2378_v37  ;;  %v6425_v45 = vadd.f32 %v2496_v9, %v2379_v3  ;;  %v7471_v27 = vld [vmem:[#allocation50_spill] sm:$0xff]  ;;  %v7480_v53 = vld [vmem:[#allocation12_spill] sm:$0xff] }
 0x240   : > { %v6427_v43 = vadd.f32 %v2495_v48, %v2380_v60  ;;  %v6429_v47 = vadd.f32 %v2497_v20, %v2381_v14  ;;  %v6431_v10 = vadd.f32 %v2499_v13, %v2382_v41  ;;  %v6433_v51 = vadd.f32 %v2498_v29, %v2383_v17  ;;  %v4310_v17 = vld [vmem:[#allocation2 + $0x158] sm:$0x1]  ;;  %v7464_v20 = vld [vmem:[#allocation57_spill] sm:$0xff]  ;;  %v7473_v13 = vld [vmem:[#allocation36_spill] sm:$0xff] }
 0x241   : > { %v6435_v34 = vadd.f32 %v2500_v16, %v2384_v12  ;;  %v6437_v8 = vadd.f32 %v2502_v32, %v2385_v46  ;;  %v6439_v15 = vadd.f32 %v2501_v61, %v2386_v11  ;;  %v6441_v63 = vadd.f32 %v2503_v42, %v2387_v44  ;;  %v7461_v11 = vld [vmem:[#allocation43_spill] sm:$0xff]  ;;  %v7465_v16 = vld [vmem:[#allocation66_spill] sm:$0xff] }
 0x242   : > { %v6443_v37 = vadd.f32 %v2505_v21, %v2388_v6  ;;  %v6445_v3 = vadd.f32 %v2504_v57, %v2389_v56  ;;  %v6447_v60 = vadd.f32 %v2506_v23, %v2390_v39  ;;  %v6449_v14 = vadd.f32 %v2508_v25, %v2391_v38  ;;  %v7462_v57 = vld [vmem:[#allocation62_spill] sm:$0xff]  ;;  %v7463_v38 = vld [vmem:[#allocation65_spill] sm:$0xff]  ;;  %v7466_v39 = vld [vmem:[#allocation64_spill] sm:$0xff] }
 0x243   : > { %v6451_v41 = vadd.f32 %v2507_v55, %v2392_v62  ;;  %v2638_v12 = vmul.f32 %v4310_v17, %v7460_v50  ;;  %v6454_v48 = vadd.f32 %v2509_v28, %v2393_v22  ;;  %v6456_v46 = vadd.f32 %v2511_v18, %v2394_v54  ;;  %v1115_v6 = vld [vmem:[#allocation2 + $0x238] sm:$0x1]  ;;  %v7467_v62 = vld [vmem:[#allocation63_spill] sm:$0xff]  ;;  %v7476_v25 = vld [vmem:[#allocation21_spill] sm:$0xff] }
 0x244   : > { %v2641_v42 = vmul.f32 %v7460_v50, %v7418_v19  ;;  %v6462_v56 = vmul.f32 %v7460_v50, %v7461_v11  ;;  %v2644_v23 = vmul.f32 %v7460_v50, %v7462_v57  ;;  %v6468_v55 = vmul.f32 %v7460_v50, %v6034_v24  ;;  %v7468_v22 = vld [vmem:[#allocation67_spill] sm:$0xff]  ;;  %v7478_v35 = vld [vmem:[#allocation30_spill] sm:$0xff] }
 0x245   : > { %v2646_v28 = vmul.f32 %v7460_v50, %v6032_v58  ;;  %v2647_v44 = vmul.f32 %v7460_v50, %v7463_v38  ;;  %v6476_v19 = vmul.f32 %v7460_v50, %v6099_v49  ;;  %v2649_v29 = vmul.f32 %v7460_v50, %v7464_v20 }
 0x246   : > { %v2650_v61 = vmul.f32 %v7460_v50, %v7465_v16  ;;  %v6484_v24 = vmul.f32 %v7460_v50, %v7466_v39  ;;  %v2652_v58 = vmul.f32 %v7460_v50, %v7467_v62  ;;  %v2653_v54 = vmul.f32 %v7460_v50, %v7468_v22 }
 0x247   : > { %v6492_v49 = vmul.f32 %v7460_v50, %v7469_v33  ;;  %v2751_v40 = vrot.slane %v2638_v12, 2  ;;  %v2655_v2 = vmul.f32 %v7460_v50, %v7470_v30  ;;  %v2656_v7 = vmul.f32 %v7460_v50, %v7471_v27  ;;  %v7482_v12 = vld [vmem:[#allocation41_spill] sm:$0xff] }
 0x248   : > { %v6500_v9 = vmul.f32 %v7460_v50, %v7472_v0  ;;  %v6504_v32 = vmul.f32 %v7460_v50, %v7473_v13  ;;  %v6507_v21 = vmul.f32 %v7460_v50, %v1115_v6  ;;  %v7477_v18 = vrot.slane %v7476_v25, 2 }
 0x249   : > { %v7479_v59 = vrot.slane %v7478_v35, 2  ;;  %v7481_v17 = vrot.slane %v7480_v53, 2  ;;  %v7483_v11 = vrot.slane %v7482_v12, 2  ;;  %v2756_v38 = vrot.slane %v2641_v42, 2 }
 0x24a   : > { %7474 = vst [vmem:[#allocation45_spill] sm:$0xff] %v6504_v32  ;;  %7475 = vst [vmem:[#allocation58_spill] sm:$0xff] %v6507_v21  ;;  %v2758_v20 = vrot.slane %v6462_v56, 2  ;;  %v2761_v16 = vrot.slane %v2644_v23, 2  ;;  %v2763_v39 = vrot.slane %v6468_v55, 2  ;;  %v2764_v50 = vrot.slane %v2646_v28, 2 }
 0x24b   : > { %v2750_v52 = vsel %vm1531_vm4, %v7479_v59, %v7477_v18  ;;  %v2755_v57 = vsel %vm1531_vm4, %v7483_v11, %v7481_v17  ;;  %v7484_v6 = vmov %v7477_v18  ;;  %v2766_v22 = vrot.slane %v2647_v44, 2  ;;  %v7489_v59 = vld [vmem:[#allocation32_spill] sm:$0xff] }
 0x24c   : > { %v2752_v62 = vsel %vm1531_vm4, %v7484_v6, %v2751_v40  ;;  %v7203_v33 = vrot.slane %v6476_v19, 2  ;;  %v2769_v30 = vrot.slane %v2649_v29, 2  ;;  %v2771_v27 = vrot.slane %v2650_v61, 2  ;;  %v7486_v40 = vld [vmem:[#allocation52_spill] sm:$0xff]  ;;  %v7492_v6 = vld [vmem:[#allocation19_spill] sm:$0xff] }
 0x24d   : > { %v7202_v0 = vrot.slane %v6484_v24, 2  ;;  %v2774_v13 = vrot.slane %v2652_v58, 2  ;;  %v2776_v18 = vrot.slane %v2653_v54, 2  ;;  %v7201_v42 = vrot.slane %v6492_v49, 2 }
 0x24e   : > { %v2779_v56 = vrot.slane %v2655_v2, 2  ;;  %v2781_v23 = vrot.slane %v2656_v7, 2  ;;  %v7200_v55 = vrot.slane %v6500_v9, 2  ;;  %v7485_v28 = vmov %v7481_v17 }
 0x24f   : > { %v2757_v25 = vsel %vm1531_vm4, %v7485_v28, %v2756_v38  ;;  %v7487_v44 = vrot.slane %v7486_v40, 2  ;;  %v2765_v58 = vsel %vm1531_vm4, %v2763_v39, %v2764_v50  ;;  %v2767_v54 = vsel %vm1531_vm4, %v2764_v50, %v2766_v22 }
 0x250   : > { %v2770_v2 = vsel %vm1531_vm4, %v7203_v33, %v2769_v30  ;;  %v7199_v7 = vrot.slane %v6504_v32, 2  ;;  %v2861_v53 = vadd.f32 %v2750_v52, %v7489_v59  ;;  %v6545_v17 = vsel %vm1531_vm4, %v2769_v30, %v2771_v27 }
 0x251   : > { %v2760_v35 = vsel %vm1531_vm4, %v2758_v20, %v7487_v44  ;;  %v7488_v29 = vmov %v7487_v44  ;;  %v6550_v11 = vsel %vm1531_vm4, %v7202_v0, %v2774_v13  ;;  %v6553_v38 = vsel %vm1531_vm4, %v2774_v13, %v2776_v18  ;;  %v7494_v18 = vld [vmem:[#allocation31_spill] sm:$0xff]  ;;  %v7511_v0 = vld [vmem:[#allocation29_spill] sm:$0xff] }
 0x252   : > { %v2762_v61 = vsel %vm1531_vm4, %v7488_v29, %v2761_v16  ;;  %v7490_v16 = vld [vmem:[#allocation27_spill] sm:$0xff]  ;;  %v7493_v22 = vrot.slane %v7492_v6, 7  ;;  %v6563_v52 = vsel %vm1531_vm4, %v7201_v42, %v2779_v56  ;;  %v6566_v30 = vsel %vm1531_vm4, %v2779_v56, %v2781_v23  ;;  %v7497_v23 = vld [vmem:[#allocation8_spill] sm:$0xff] }
 0x253   : > { %v7491_v50 = vrot.slane %v7490_v16, 7  ;;  %v6573_v27 = vsel %vm1531_vm4, %v7200_v55, %v7199_v7  ;;  %v2862_v40 = vadd.f32 %v2752_v62, %v7494_v18  ;;  %v7495_v44 = vld [vmem:[#allocation47_spill] sm:$0xff]  ;;  %v7496_v29 = vrot.slane %v7482_v12, 2  ;;  %v7499_v6 = vld [vmem:[#allocation20_spill] sm:$0xff]  ;;  %v7501_v7 = vld [vmem:[#allocation34_spill] sm:$0xff] }
 0x254   : > { %v2864_v16 = vadd.f32 %v2755_v57, %v6414_v31  ;;  %v2865_v56 = vadd.f32 %v2757_v25, %v6419_v36  ;;  %v7502_v55 = vrot.slane %v7501_v7, 7  ;;  %v7503_v42 = vld [vmem:[#allocation35_spill] sm:$0xff]  ;;  %v2974_v18 = vrot.slane %v2861_v53, 7  ;;  %v7505_v36 = vld [vmem:[#allocation9_spill] sm:$0xff] }
 0x255   : > { %v2962_v28 = vsel %vm2932_vm5, %v7493_v22, %v7491_v50  ;;  %v2863_v59 = vadd.f32 %v7496_v29, %v7495_v44  ;;  %v7498_v50 = vrot.slane %v7497_v23, 7  ;;  %v7500_v22 = vrot.slane %v7499_v6, 7  ;;  %v6595_v12 = vld [vmem:[%s7078_s4] ss:$0 sm:$0xff]  ;;  %v7506_v44 = vld [vmem:[#allocation28_spill] sm:$0xff] }
 0x256   : > { %v7504_v13 = vrot.slane %v7503_v42, 7  ;;  %v3063_v31 = vmul.f32 %v6595_v12, %v2962_v28  ;;  %v3064_v57 = vmul.f32 %v6595_v12, %v7505_v36  ;;  %v6603_v25 = vld [vmem:[%s7079_s5] ss:$0 sm:$0xff]  ;;  %v2866_v28 = vadd.f32 %v2758_v20, %v6423_v5 }
 0x257   : > { %v2967_v1 = vsel %vm2932_vm5, %v7500_v22, %v7498_v50  ;;  %v6607_v42 = vadd.f32 %v6603_v25, %v7506_v44  ;;  %v2867_v23 = vadd.f32 %v2760_v35, %v6425_v45  ;;  %v7509_v50 = vld [vmem:[#allocation17_spill] sm:$0xff]  ;;  %v7510_v22 = vld [vmem:[#allocation18_spill] sm:$0xff]  ;;  %v7512_v33 = vrot.slane %v7511_v0, 7 }
 0x258   : > { %v2970_v62 = vsel %vm2932_vm5, %v7504_v13, %v7502_v55  ;;  %v7507_v55 = vld [vmem:[#allocation26_spill] sm:$0xff]  ;;  %v7508_v13 = vld [vmem:[#allocation16_spill] sm:$0xff]  ;;  %v3138_v36 = vsel %vm937_vm1, %v7510_v22, 0.0  ;;  %v7513_v44 = vrot.slane %v7501_v7, 7  ;;  %v2978_v21 = vrot.slane %v2863_v59, 7 }
 0x259   : > { %v6611_v53 = vadd.f32 %v6603_v25, %v7507_v55  ;;  %v3136_v29 = vsel %vm937_vm1, %v7508_v13, 0.0  ;;  %v2976_v55 = vrot.slane %v2862_v40, 7  ;;  %v2979_v26 = vrot.slane %v2864_v16, 7 }
 0x25a   : > { %v3137_v6 = vadd.f32 %v3136_v29, %v7509_v50  ;;  %v2972_v32 = vsel %vm2932_vm5, %v7513_v44, %v7512_v33  ;;  %v7515_v13 = vrot.slane %v7514_v4, 7  ;;  %v3065_v45 = vmul.f32 %v6595_v12, %v2967_v1 }
 0x25b   : > { %v3066_v20 = vmul.f32 %v6595_v12, %v2970_v62  ;;  %v6631_v29 = vadd.f32 %v6603_v25, %v3063_v31  ;;  %v6634_v0 = vadd.f32 %v6603_v25, %v3064_v57  ;;  %v3140_v33 = vsel %vm937_vm1, %v6607_v42, 0.0 }
 0x25c   : > { %v2975_v5 = vsel %vm2932_vm5, %v7515_v13, %v2974_v18  ;;  %v3139_v35 = vadd.f32 %v3138_v36, %v3137_v6  ;;  %v3142_v7 = vsel %vm937_vm1, %v6611_v53, 0.0  ;;  %v2868_v4 = vadd.f32 %v2762_v61, %v6427_v43 }
 0x25d   : > { %v2869_v40 = vadd.f32 %v2763_v39, %v6429_v47  ;;  %v2870_v1 = vadd.f32 %v2765_v58, %v6431_v10  ;;  %v2977_v16 = vsel %vm2932_vm5, %v2974_v18, %v2976_v55  ;;  %v2981_v62 = vrot.slane %v2865_v56, 7 }
 0x25e   : > { %v3141_v59 = vadd.f32 %v3140_v33, %v3139_v35  ;;  %v2983_v31 = vrot.slane %v2866_v28, 7  ;;  %v2984_v13 = vrot.slane %v2867_v23, 7  ;;  %v2980_v57 = vsel %vm2932_vm5, %v2978_v21, %v2979_v26 }
 0x25f   : > { %v3067_v50 = vmul.f32 %v6595_v12, %v2972_v32  ;;  %v3068_v6 = vmul.f32 %v6595_v12, %v2975_v5  ;;  %v6648_v44 = vadd.f32 %v6603_v25, %v3065_v45  ;;  %v6651_v43 = vadd.f32 %v6603_v25, %v3066_v20 }
 0x260   : > { %v3143_v36 = vadd.f32 %v3142_v7, %v3141_v59  ;;  %v3144_v47 = vsel %vm937_vm1, %v6631_v29, 0.0  ;;  %v3146_v10 = vsel %vm937_vm1, %v6634_v0, 0.0  ;;  %v2871_v39 = vadd.f32 %v2767_v54, %v6433_v51 }
 0x261   : > { %v7516_v32 = vrot.slane %v6476_v19, 2  ;;  %v2873_v61 = vadd.f32 %v2770_v2, %v6437_v8  ;;  %v2982_v56 = vsel %vm2932_vm5, %v2979_v26, %v2981_v62  ;;  %v2985_v18 = vsel %vm2932_vm5, %v2983_v31, %v2984_v13 }
 0x262   : > { %v3145_v58 = vadd.f32 %v3144_v47, %v3143_v36  ;;  %v2986_v28 = vrot.slane %v2868_v4, 7  ;;  %v2988_v23 = vrot.slane %v2869_v40, 7  ;;  %v2989_v55 = vrot.slane %v2870_v1, 7 }
 0x263   : > { %v2872_v21 = vadd.f32 %v7516_v32, %v6435_v34  ;;  %v3069_v5 = vmul.f32 %v6595_v12, %v2977_v16  ;;  %v3070_v45 = vmul.f32 %v6595_v12, %v2980_v57  ;;  %v6667_v51 = vadd.f32 %v6603_v25, %v3067_v50 }
 0x264   : > { %v3147_v20 = vadd.f32 %v3146_v10, %v3145_v58  ;;  %v6670_v34 = vadd.f32 %v6603_v25, %v3068_v6  ;;  %v3148_v8 = vsel %vm937_vm1, %v6648_v44, 0.0  ;;  %v3150_v26 = vsel %vm937_vm1, %v6651_v43, 0.0 }
 0x265   : > { %v2874_v19 = vadd.f32 %v6545_v17, %v6439_v15  ;;  %v7517_v54 = vrot.slane %v6484_v24, 2  ;;  %v2876_v35 = vadd.f32 %v6550_v11, %v6443_v37  ;;  %v2987_v7 = vsel %vm2932_vm5, %v2984_v13, %v2986_v28 }
 0x266   : > { %v3149_v33 = vadd.f32 %v3148_v8, %v3147_v20  ;;  %v2991_v4 = vrot.slane %v2871_v39, 7  ;;  %v2993_v40 = vrot.slane %v2872_v21, 7  ;;  %v2994_v1 = vrot.slane %v2873_v61, 7 }
 0x267   : > { %v2875_v2 = vadd.f32 %v7517_v54, %v6441_v63  ;;  %v2990_v59 = vsel %vm2932_vm5, %v2988_v23, %v2989_v55  ;;  %v3071_v16 = vmul.f32 %v6595_v12, %v2982_v56  ;;  %v3072_v62 = vmul.f32 %v6595_v12, %v2985_v18 }
 0x268   : > { %v3151_v15 = vadd.f32 %v3150_v26, %v3149_v33  ;;  %v6688_v17 = vadd.f32 %v6603_v25, %v3069_v5  ;;  %v6691_v63 = vadd.f32 %v6603_v25, %v3070_v45  ;;  %v3152_v37 = vsel %vm937_vm1, %v6667_v51, 0.0  ;;  %v7521_v26 = vld [vmem:[#allocation49_spill] sm:$0xff] }
 0x269   : > { %v3154_v24 = vsel %vm937_vm1, %v6670_v34, 0.0  ;;  %v2877_v11 = vadd.f32 %v6553_v38, %v6445_v3  ;;  %v7518_v31 = vrot.slane %v6492_v49, 2  ;;  %v2879_v57 = vadd.f32 %v6563_v52, %v6449_v14  ;;  %v7525_v33 = vld [vmem:[#allocation45_spill] sm:$0xff] }
 0x26a   : > { %v3153_v50 = vadd.f32 %v3152_v37, %v3151_v15  ;;  %v2992_v6 = vsel %vm2932_vm5, %v2989_v55, %v2991_v4  ;;  %v2996_v36 = vrot.slane %v2874_v19, 7  ;;  %v2998_v47 = vrot.slane %v2875_v2, 7  ;;  %v7523_v2 = vld [vmem:[#allocation58_spill] sm:$0xff] }
 0x26b   : > { %v2878_v13 = vadd.f32 %v7518_v31, %v6447_v60  ;;  %v2999_v10 = vrot.slane %v2876_v35, 7  ;;  %v2995_v39 = vsel %vm2932_vm5, %v2993_v40, %v2994_v1  ;;  %v3073_v32 = vmul.f32 %v6595_v12, %v2987_v7 }
 0x26c   : > { %v3074_v21 = vmul.f32 %v6595_v12, %v2990_v59  ;;  %v3155_v3 = vadd.f32 %v3154_v24, %v3153_v50  ;;  %v6709_v38 = vadd.f32 %v6603_v25, %v3071_v16  ;;  %v6712_v60 = vadd.f32 %v6603_v25, %v3072_v62 }
 0x26d   : > { %v3156_v14 = vsel %vm937_vm1, %v6688_v17, 0.0  ;;  %v3158_v49 = vsel %vm937_vm1, %v6691_v63, 0.0  ;;  %v2880_v52 = vadd.f32 %v6566_v30, %v6451_v41  ;;  %v7519_v61 = vrot.slane %v6500_v9, 2 }
 0x26e   : > { %v2882_v56 = vadd.f32 %v6573_v27, %v6456_v46  ;;  %v3157_v18 = vadd.f32 %v3156_v14, %v3155_v3  ;;  %v2997_v28 = vsel %vm2932_vm5, %v2994_v1, %v2996_v36  ;;  %v3000_v23 = vsel %vm2932_vm5, %v2998_v47, %v2999_v10  ;;  %v7520_v27 = vld [vmem:[#allocation53_spill] sm:$0xff] }
 0x26f   : > { %v2881_v58 = vadd.f32 %v7519_v61, %v6454_v48  ;;  %v3001_v55 = vrot.slane %v2877_v11, 7  ;;  %v3003_v5 = vrot.slane %v2878_v13, 7  ;;  %v3004_v45 = vrot.slane %v2879_v57, 7 }
 0x270   : > { %v3075_v20 = vmul.f32 %v6595_v12, %v2992_v6  ;;  %v3076_v8 = vmul.f32 %v6595_v12, %v2995_v39  ;;  %v3159_v41 = vadd.f32 %v3158_v49, %v3157_v18  ;;  %v6730_v30 = vadd.f32 %v6603_v25, %v3073_v32 }
 0x271   : > { %v6733_v48 = vadd.f32 %v6603_v25, %v3074_v21  ;;  %v3160_v46 = vsel %vm937_vm1, %v6709_v38, 0.0  ;;  %v3162_v9 = vsel %vm937_vm1, %v6712_v60, 0.0  ;;  %v7522_v19 = vrot.slane %v7521_v26, 1 }
 0x272   : > { %v7524_v35 = vrot.slane %v7523_v2, 2  ;;  %v7526_v7 = vrot.slane %v7525_v33, 2  ;;  %v3161_v40 = vadd.f32 %v3160_v46, %v3159_v41  ;;  %v3002_v1 = vsel %vm2932_vm5, %v2999_v10, %v3001_v55 }
 0x273   : > { %v2607_v54 = vadd.f32 %v7522_v19, %v7520_v27  ;;  %v3006_v59 = vrot.slane %v2880_v52, 7  ;;  %v3008_v16 = vrot.slane %v2881_v58, 7  ;;  %v3009_v62 = vrot.slane %v2882_v56, 7 }
 0x274   : > { %v2787_v4 = vsel %vm1531_vm4, %v7526_v7, %v7524_v35  ;;  %v3005_v15 = vsel %vm2932_vm5, %v3003_v5, %v3004_v45  ;;  %v3077_v37 = vmul.f32 %v6595_v12, %v2997_v28  ;;  %v3078_v24 = vmul.f32 %v6595_v12, %v3000_v23 }
 0x275   : > { %v3163_v11 = vadd.f32 %v3162_v9, %v3161_v40  ;;  %v6752_v31 = vadd.f32 %v6603_v25, %v3075_v20  ;;  %v6755_v13 = vadd.f32 %v6603_v25, %v3076_v8  ;;  %v3164_v57 = vsel %vm937_vm1, %v6730_v30, 0.0 }
 0x276   : > { %v3166_v50 = vsel %vm937_vm1, %v6733_v48, 0.0  ;;  %v2883_v6 = vadd.f32 %v2787_v4, %v2607_v54  ;;  %v3007_v47 = vsel %vm2932_vm5, %v3004_v45, %v3006_v59  ;;  %v3010_v10 = vsel %vm2932_vm5, %v3008_v16, %v3009_v62 }
 0x277   : > { %v3165_v36 = vadd.f32 %v3164_v57, %v3163_v11  ;;  %v3079_v39 = vmul.f32 %v6595_v12, %v3002_v1  ;;  %v3080_v32 = vmul.f32 %v6595_v12, %v3005_v15  ;;  %v6766_v3 = vadd.f32 %v6603_v25, %v3077_v37  ;;  %v3273_v11 = vld [vmem:[%s7082_s8] sm:$0xff] }
 0x278   : > { %v6769_v14 = vadd.f32 %v6603_v25, %v3078_v24  ;;  %v3168_v49 = vsel %vm937_vm1, %v6752_v31, 0.0  ;;  %v3170_v52 = vsel %vm937_vm1, %v6755_v13, 0.0  ;;  %v3011_v61 = vrot.slane %v2883_v6, 7  ;;  %4221 = vmatpush3.msra.mxu1 %v3273_v11  ;;  %v3198_v57 = vld [vmem:[%s7081_s7] sm:$0x1] }
 0x279   : > { %v3167_v21 = vadd.f32 %v3166_v50, %v3165_v36  ;;  %v3081_v18 = vmul.f32 %v6595_v12, %v3007_v47  ;;  %v3082_v28 = vmul.f32 %v6595_v12, %v3010_v10  ;;  %v6779_v55 = vadd.f32 %v6603_v25, %v3079_v39  ;;  %v3548_v10 = vld [vmem:[%s7084_s10] sm:$0xff]  ;;  %v3549_v39 = vld [vmem:[%s7084_s10 + $0x8] sm:$0xff] }
 0x27a   : > { %v3012_v56 = vsel %vm2932_vm5, %v3009_v62, %v3011_v61  ;;  %v6782_v5 = vadd.f32 %v6603_v25, %v3080_v32  ;;  %v3172_v45 = vsel %vm937_vm1, %v6766_v3, 0.0  ;;  %v3174_v20 = vsel %vm937_vm1, %v6769_v14, 0.0  ;;  %v3550_v32 = vld [vmem:[%s7084_s10 + $0x10] sm:$0xff]  ;;  %v3274_v61 = vld [vmem:[%s7083_s9] sm:$0x1] }
 0x27b   : > { %v3169_v58 = vadd.f32 %v3168_v49, %v3167_v21  ;;  %v3083_v41 = vmul.f32 %v6595_v12, %v3012_v56  ;;  %v6790_v9 = vadd.f32 %v6603_v25, %v3081_v18  ;;  %v6793_v27 = vadd.f32 %v6603_v25, %v3082_v28  ;;  %v3551_v49 = vld [vmem:[%s7084_s10 + $0x18] sm:$0xff] }
 0x27c   : > { %v3176_v26 = vsel %vm937_vm1, %v6779_v55, 0.0  ;;  %v3178_v19 = vsel %vm937_vm1, %v6782_v5, 0.0  ;;  %v4287_v21 = vpack.c.bf16 %v3549_v39, %v3548_v10 }
 0x27d   : > { %v3171_v23 = vadd.f32 %v3170_v52, %v3169_v58  ;;  %v6800_v35 = vadd.f32 %v6603_v25, %v3083_v41  ;;  %v3180_v12 = vsel %vm937_vm1, %v6790_v9, 0.0  ;;  %v3182_v33 = vsel %vm937_vm1, %v6793_v27, 0.0 }
 0x27e   : > { %v4291_v52 = vpack.c.bf16 %v3551_v49, %v3550_v32  ;;  %4288 = vmatprep.subr.bf16.mxu1 %v4287_v21 }
 0x27f   : > { %v3173_v8 = vadd.f32 %v3172_v45, %v3171_v23  ;;  %v3184_v40 = vsel %vm937_vm1, %v6800_v35, 0.0 }
 0x281   : > { %v3175_v46 = vadd.f32 %v3174_v20, %v3173_v8  ;;  %v7527_v8 = vld [vmem:[#allocation3_spill] sm:$0xff] }
 0x282   : > { %v7528_v41 = vsub.s32 0, %v7527_v8 }
 0x283   : > { %v3177_v54 = vadd.f32 %v3176_v26, %v3175_v46  ;;  %v7529_v26 = vld [vmem:[#allocation39_spill] sm:$0xff] }
 0x285   : > { %v3179_v2 = vadd.f32 %v3178_v19, %v3177_v54  ;;  %v7530_v54 = vld [vmem:[#allocation40_spill] sm:$0xff] }
 0x287   : > { %v3181_v7 = vadd.f32 %v3180_v12, %v3179_v2  ;;  %v7531_v12 = vld [vmem:[#allocation5_spill] sm:$0xff] }
 0x289   : > { %v3183_v4 = vadd.f32 %v3182_v33, %v3181_v7  ;;  %v7532_v7 = vld [vmem:[#allocation11_spill] sm:$0xff] }
 0x28b   : > { %v3185_v1 = vadd.f32 %v3184_v40, %v3183_v4  ;;  %v7533_v40 = vld [vmem:[#allocation7_spill] sm:$0xff] }
 0x28d   : > { %v3186_v59 = vrot.slane %v3185_v1, 4 }
 0x28f   : > { %v3187_v16 = vadd.f32 %v3186_v59, %v3185_v1  ;;  %v7534_v59 = vld [vmem:[#allocation22_spill] sm:$0xff] }
 0x291   : > { %v3188_v62 = vrot.slane %v3187_v16, 2 }
 0x293   : > { %v3189_v15 = vadd.f32 %v3188_v62, %v3187_v16  ;;  %v7535_v62 = vld [vmem:[#allocation14_spill] sm:$0xff] }
 0x295   : > { %v3190_v37 = vrot.slane %v3189_v15, 1 }
 0x297   : > { %v3191_v24 = vadd.f32 %v3190_v37, %v3189_v15  ;;  %v7536_v37 = vld [vmem:[#allocation16_spill] sm:$0xff] }
 0x299   : > { %v3193_v25 = vmul.f32 0.00390625, %v3191_v24 }
 0x29b   : > { %4218 = vmatmul.mubr.msk.f32.vlgmr.msra.gmra.mrb[32].mxu0 %vm937_vm1, %v3193_v25 }
 0x36e   : > { %v3268_v50 = vpop.f32.mrb[32].mxu0 }
 0x36f   : > { %v3269_v6 = vadd.f32 %v3268_v50, %v3198_v57  ;;  %v4219_v36 = vpop.f32.mrb[33].mxu0 }
 0x371   : > { %v3272_v47 = vmax.f32 %v3269_v6, 0.0 }
 0x373   : > { %4223 = vmatmul.mubr.msk.f32.vlgmr.msra.gmra.mrb[0].mxu1 %vm454_vm0, %v3272_v47 }
 0x374   : > { %4290 = vmatpush3.bf16.msra.mxu1 %v4287_v21 }
 0x375   : > { %4292 = vmatprep.subr.bf16.mxu1 %v4291_v52 }
 0x378   : > { %4294 = vmatpush3.bf16.msra.mxu1 %v4291_v52 }
 0x446   : > { %v3344_v58 = vpop.f32.mrb[0].mxu1 }
 0x447   : > { %v3345_v56 = vadd.f32 %v3344_v58, %v3274_v61  ;;  %v4224_v18 = vpop.f32.mrb[1].mxu1 }
 0x449   : > { %v3348_v28 = vadd.f32 3.0, %v3345_v56 }
 0x44b   : > { %v3349_v23 = vmax.f32 %v3348_v28, 0.0 }
 0x44d   : > { %v3350_v45 = vmin.f32 %v3349_v23, 6.0 }
 0x44f   : > { %v3351_v20 = vmul.f32 0.16666667, %v3350_v45 }
 0x451   : > { %v6833_v46 = vrot.slane %v3351_v20, %v7528_v41 }
 0x453   : > { %v3356_v19 = vmul.f32 %v6833_v46, %v7529_v26  ;;  %v3357_v2 = vmul.f32 %v6833_v46, %v7530_v54  ;;  %v3358_v33 = vmul.f32 %v6833_v46, %v7531_v12  ;;  %v3359_v4 = vmul.f32 %v6833_v46, %v7532_v7 }
 0x454   : > { %v3360_v1 = vmul.f32 %v6833_v46, %v7533_v40  ;;  %v3361_v16 = vmul.f32 %v6833_v46, %v7534_v59  ;;  %v3362_v15 = vmul.f32 %v6833_v46, %v7535_v62  ;;  %v3363_v24 = vmul.f32 %v6833_v46, %v7536_v37 }
 0x455   : > { %v3388_v25 = vadd.f32 3.0, %v3356_v19  ;;  %v3389_v11 = vadd.f32 3.0, %v3357_v2  ;;  %v3390_v57 = vadd.f32 3.0, %v3358_v33  ;;  %v3391_v50 = vadd.f32 3.0, %v3359_v4 }
 0x456   : > { %v3392_v6 = vadd.f32 3.0, %v3360_v1  ;;  %v3393_v36 = vadd.f32 3.0, %v3361_v16  ;;  %v3394_v47 = vadd.f32 3.0, %v3362_v15  ;;  %v3395_v10 = vadd.f32 3.0, %v3363_v24 }
 0x457   : > { %v3420_v39 = vmax.f32 %v3388_v25, 0.0  ;;  %v3421_v32 = vmax.f32 %v3389_v11, 0.0  ;;  %v3422_v21 = vmax.f32 %v3390_v57, 0.0  ;;  %v3423_v49 = vmax.f32 %v3391_v50, 0.0 }
 0x458   : > { %v3424_v52 = vmax.f32 %v3392_v6, 0.0  ;;  %v3425_v61 = vmax.f32 %v3393_v36, 0.0  ;;  %v3426_v23 = vmax.f32 %v3394_v47, 0.0  ;;  %v3427_v45 = vmax.f32 %v3395_v10, 0.0 }
 0x459   : > { %v3452_v58 = vmin.f32 %v3420_v39, 6.0  ;;  %v3453_v56 = vmin.f32 %v3421_v32, 6.0  ;;  %v3454_v18 = vmin.f32 %v3422_v21, 6.0  ;;  %v3455_v28 = vmin.f32 %v3423_v49, 6.0 }
 0x45a   : > { %v3456_v26 = vmin.f32 %v3424_v52, 6.0  ;;  %v3457_v54 = vmin.f32 %v3425_v61, 6.0  ;;  %v3364_v40 = vmul.f32 %v6833_v46, %v7510_v22  ;;  %v3458_v62 = vmin.f32 %v3426_v23, 6.0 }
 0x45b   : > { %v3484_v20 = vmul.f32 %v3452_v58, %v3356_v19  ;;  %v3485_v8 = vmul.f32 %v3453_v56, %v3357_v2  ;;  %v3486_v41 = vmul.f32 %v3454_v18, %v3358_v33  ;;  %v3487_v59 = vmul.f32 %v3455_v28, %v3359_v4 }
 0x45c   : > { %v3459_v37 = vmin.f32 %v3427_v45, 6.0  ;;  %v3365_v25 = vmul.f32 %v6833_v46, %v6607_v42  ;;  %v3488_v57 = vmul.f32 %v3456_v26, %v3360_v1  ;;  %v3396_v19 = vadd.f32 3.0, %v3364_v40 }
 0x45d   : > { %v3516_v12 = vmul.f32 0.16666667, %v3484_v20  ;;  %v3517_v7 = vmul.f32 0.16666667, %v3485_v8  ;;  %v3518_v11 = vmul.f32 0.16666667, %v3486_v41  ;;  %v3366_v2 = vmul.f32 %v6833_v46, %v6611_v53 }
 0x45e   : > { %v3489_v33 = vmul.f32 %v3457_v54, %v3361_v16  ;;  %v3397_v50 = vadd.f32 3.0, %v3365_v25  ;;  %v3367_v22 = vmul.f32 %v6833_v46, %v6631_v29  ;;  %v3368_v4 = vmul.f32 %v6833_v46, %v6634_v0 }
 0x45f   : > { %4233 = vmatprep.mubr.msk.f32.mxu1 %vm937_vm1, %v3516_v12  ;;  %v3428_v42 = vmax.f32 %v3396_v19, 0.0  ;;  %v3398_v6 = vadd.f32 3.0, %v3366_v2  ;;  %v3369_v1 = vmul.f32 %v6833_v46, %v6648_v44  ;;  %v3370_v53 = vmul.f32 %v6833_v46, %v6651_v43 }
 0x460   : > { %4234 = vmatmul.mubr.msk.f32.vlgmr.msra.gmra.mrb[2].mxu1 %vm937_vm1, %v3517_v7  ;;  %v3519_v36 = vmul.f32 0.16666667, %v3487_v59  ;;  %v3429_v47 = vmax.f32 %v3397_v50, 0.0  ;;  %v3399_v16 = vadd.f32 3.0, %v3367_v22  ;;  %v3400_v10 = vadd.f32 3.0, %v3368_v4 }
 0x461   : > { %4236 = vmatprep.mubr.msk.f32.mxu1 %vm937_vm1, %v3518_v11  ;;  %v3520_v39 = vmul.f32 0.16666667, %v3488_v57  ;;  %v3490_v32 = vmul.f32 %v3458_v62, %v3362_v15  ;;  %v3460_v29 = vmin.f32 %v3428_v42, 6.0  ;;  %v3430_v21 = vmax.f32 %v3398_v6, 0.0 }
 0x462   : > { %v3491_v0 = vmul.f32 %v3459_v37, %v3363_v24  ;;  %v3401_v49 = vadd.f32 3.0, %v3369_v1  ;;  %v3402_v52 = vadd.f32 3.0, %v3370_v53  ;;  %v3371_v44 = vmul.f32 %v6833_v46, %v6667_v51 }
 0x463   : > { %v3521_v61 = vmul.f32 0.16666667, %v3489_v33  ;;  %v3461_v43 = vmin.f32 %v3429_v47, 6.0  ;;  %v3431_v58 = vmax.f32 %v3399_v16, 0.0  ;;  %v3432_v56 = vmax.f32 %v3400_v10, 0.0 }
 0x464   : > { %4237 = vmatmul.mubr.msk.f32.gmra.mrb[4].mxu1 %vm937_vm1, %v3519_v36  ;;  %v3522_v18 = vmul.f32 0.16666667, %v3490_v32  ;;  %v3492_v28 = vmul.f32 %v3460_v29, %v3364_v40  ;;  %v3462_v23 = vmin.f32 %v3430_v21, 6.0  ;;  %v3523_v15 = vmul.f32 0.16666667, %v3491_v0 }
 0x465   : > { %4239 = vmatprep.mubr.msk.f32.mxu1 %vm937_vm1, %v3520_v39  ;;  %v3433_v24 = vmax.f32 %v3401_v49, 0.0  ;;  %v3434_v45 = vmax.f32 %v3402_v52, 0.0  ;;  %v3403_v20 = vadd.f32 3.0, %v3371_v44  ;;  %v3372_v8 = vmul.f32 %v6833_v46, %v6670_v34 }
 0x466   : > { %v3493_v41 = vmul.f32 %v3461_v43, %v3365_v25  ;;  %v3463_v51 = vmin.f32 %v3431_v58, 6.0  ;;  %v3464_v26 = vmin.f32 %v3432_v56, 6.0  ;;  %v3373_v54 = vmul.f32 %v6833_v46, %v6688_v17 }
 0x467   : > { %v3524_v12 = vmul.f32 0.16666667, %v3492_v28  ;;  %v3494_v7 = vmul.f32 %v3462_v23, %v3366_v2  ;;  %v3404_v40 = vadd.f32 3.0, %v3372_v8  ;;  %v3374_v59 = vmul.f32 %v6833_v46, %v6691_v63 }
 0x468   : > { %4240 = vmatmul.mubr.msk.f32.gmra.mrb[6].mxu1 %vm937_vm1, %v3521_v61  ;;  %v3465_v62 = vmin.f32 %v3433_v24, 6.0  ;;  %v3466_v37 = vmin.f32 %v3434_v45, 6.0  ;;  %v3435_v11 = vmax.f32 %v3403_v20, 0.0  ;;  %v3375_v34 = vmul.f32 %v6833_v46, %v6709_v38 }
 0x469   : > { %4242 = vmatprep.mubr.msk.f32.mxu1 %vm937_vm1, %v3522_v18  ;;  %v3525_v25 = vmul.f32 0.16666667, %v3493_v41  ;;  %v3495_v57 = vmul.f32 %v3463_v51, %v3367_v22  ;;  %v3405_v19 = vadd.f32 3.0, %v3373_v54  ;;  %v3376_v17 = vmul.f32 %v6833_v46, %v6712_v60 }
 0x46a   : > { %v3526_v2 = vmul.f32 0.16666667, %v3494_v7  ;;  %v3496_v33 = vmul.f32 %v3464_v26, %v3368_v4  ;;  %v3436_v50 = vmax.f32 %v3404_v40, 0.0  ;;  %v3406_v63 = vadd.f32 3.0, %v3374_v59 }
 0x46b   : > { %v3467_v42 = vmin.f32 %v3435_v11, 6.0  ;;  %v3407_v6 = vadd.f32 3.0, %v3375_v34  ;;  %v3377_v36 = vmul.f32 %v6833_v46, %v6730_v30  ;;  %v3378_v38 = vmul.f32 %v6833_v46, %v6733_v48 }
 0x46c   : > { %4243 = vmatmul.mubr.msk.f32.gmra.mrb[8].mxu1 %vm937_vm1, %v3523_v15  ;;  %v3527_v22 = vmul.f32 0.16666667, %v3495_v57  ;;  %v3497_v47 = vmul.f32 %v3465_v62, %v3369_v1  ;;  %v3437_v16 = vmax.f32 %v3405_v19, 0.0  ;;  %v3408_v60 = vadd.f32 3.0, %v3376_v17 }
 0x46d   : > { %4245 = vmatprep.mubr.msk.f32.mxu1 %vm937_vm1, %v3524_v12  ;;  %v3528_v10 = vmul.f32 0.16666667, %v3496_v33  ;;  %v3498_v4 = vmul.f32 %v3466_v37, %v3370_v53  ;;  %v3468_v39 = vmin.f32 %v3436_v50, 6.0  ;;  %v3438_v32 = vmax.f32 %v3406_v63, 0.0 }
 0x46e   : > { %v3439_v29 = vmax.f32 %v3407_v6, 0.0  ;;  %v3409_v21 = vadd.f32 3.0, %v3377_v36  ;;  %v3410_v0 = vadd.f32 3.0, %v3378_v38  ;;  %v3379_v30 = vmul.f32 %v6833_v46, %v6752_v31 }
 0x46f   : > { %v3529_v49 = vmul.f32 0.16666667, %v3497_v47  ;;  %v3499_v48 = vmul.f32 %v3467_v42, %v3371_v44  ;;  %v3469_v52 = vmin.f32 %v3437_v16, 6.0  ;;  %v3440_v1 = vmax.f32 %v3408_v60, 0.0 }
 0x470   : > { %4246 = vmatmul.mubr.msk.f32.gmra.mrb[10].mxu1 %vm937_vm1, %v3525_v25  ;;  %v3530_v61 = vmul.f32 0.16666667, %v3498_v4  ;;  %v3500_v43 = vmul.f32 %v3468_v39, %v3372_v8  ;;  %v3470_v58 = vmin.f32 %v3438_v32, 6.0  ;;  %v3380_v53 = vmul.f32 %v6833_v46, %v6755_v13 }
 0x471   : > { %4248 = vmatprep.mubr.msk.f32.mxu1 %vm937_vm1, %v3526_v2  ;;  %v3471_v56 = vmin.f32 %v3439_v29, 6.0  ;;  %v3441_v18 = vmax.f32 %v3409_v21, 0.0  ;;  %v3442_v28 = vmax.f32 %v3410_v0, 0.0  ;;  %v3411_v23 = vadd.f32 3.0, %v3379_v30 }
 0x472   : > { %v3531_v15 = vmul.f32 0.16666667, %v3499_v48  ;;  %v3501_v31 = vmul.f32 %v3469_v52, %v3373_v54  ;;  %v3472_v24 = vmin.f32 %v3440_v1, 6.0  ;;  %v3381_v44 = vmul.f32 %v6833_v46, %v6766_v3 }
 0x473   : > { %v3532_v45 = vmul.f32 0.16666667, %v3500_v43  ;;  %v3502_v20 = vmul.f32 %v3470_v58, %v3374_v59  ;;  %v3412_v8 = vadd.f32 3.0, %v3380_v53  ;;  %v3382_v13 = vmul.f32 %v6833_v46, %v6769_v14 }
 0x474   : > { %4249 = vmatmul.mubr.msk.f32.gmra.mrb[12].mxu1 %vm937_vm1, %v3527_v22  ;;  %v3503_v41 = vmul.f32 %v3471_v56, %v3375_v34  ;;  %v3473_v51 = vmin.f32 %v3441_v18, 6.0  ;;  %v3474_v26 = vmin.f32 %v3442_v28, 6.0  ;;  %v3443_v12 = vmax.f32 %v3411_v23, 0.0 }
 0x475   : > { %4251 = vmatprep.mubr.msk.f32.mxu1 %vm937_vm1, %v3528_v10  ;;  %v3533_v7 = vmul.f32 0.16666667, %v3501_v31  ;;  %v3504_v54 = vmul.f32 %v3472_v24, %v3376_v17  ;;  %v3413_v40 = vadd.f32 3.0, %v3381_v44  ;;  %v3383_v3 = vmul.f32 %v6833_v46, %v6779_v55 }
 0x476   : > { %v3534_v62 = vmul.f32 0.16666667, %v3502_v20  ;;  %v3444_v59 = vmax.f32 %v3412_v8, 0.0  ;;  %v3414_v37 = vadd.f32 3.0, %v3382_v13  ;;  %v3384_v14 = vmul.f32 %v6833_v46, %v6782_v5 }
 0x477   : > { %v3535_v11 = vmul.f32 0.16666667, %v3503_v41  ;;  %v3505_v34 = vmul.f32 %v3473_v51, %v3377_v36  ;;  %v3506_v25 = vmul.f32 %v3474_v26, %v3378_v38  ;;  %v3475_v57 = vmin.f32 %v3443_v12, 6.0  ;;  %v4313_v51 = vld [vmem:[%s4440_s28 + $0x8] sm:$0xff]  ;;  %v4314_v12 = vld [vmem:[%s4440_s28] sm:$0xff] }
 0x478   : > { %4252 = vmatmul.mubr.msk.f32.gmra.mrb[14].mxu1 %vm937_vm1, %v3529_v49  ;;  %v3536_v19 = vmul.f32 0.16666667, %v3504_v54  ;;  %v3445_v17 = vmax.f32 %v3413_v40, 0.0  ;;  %v3415_v2 = vadd.f32 3.0, %v3383_v3  ;;  %v3385_v55 = vmul.f32 %v6833_v46, %v6790_v9 }
 0x479   : > { %4254 = vmatprep.mubr.msk.f32.mxu1 %vm937_vm1, %v3530_v61  ;;  %v3476_v33 = vmin.f32 %v3444_v59, 6.0  ;;  %v3446_v50 = vmax.f32 %v3414_v37, 0.0  ;;  %v3416_v63 = vadd.f32 3.0, %v3384_v14  ;;  %v3386_v5 = vmul.f32 %v6833_v46, %v6793_v27  ;;  %v4315_v59 = vld [vmem:[%s4440_s28 + $0x18] sm:$0xff] }
 0x47a   : > { %v3537_v42 = vmul.f32 0.16666667, %v3505_v34  ;;  %v3538_v6 = vmul.f32 0.16666667, %v3506_v25  ;;  %v3507_v36 = vmul.f32 %v3475_v57, %v3379_v30  ;;  %v3477_v38 = vmin.f32 %v3445_v17, 6.0  ;;  %v4317_v17 = vld [vmem:[%s4440_s28 + $0x28] sm:$0xff] }
 0x47b   : > { %v3447_v22 = vmax.f32 %v3415_v2, 0.0  ;;  %v3417_v47 = vadd.f32 3.0, %v3385_v55  ;;  %v3387_v16 = vmul.f32 %v6833_v46, %v6800_v35  ;;  %v3508_v9 = vmul.f32 %v3476_v33, %v3380_v53 }
 0x47c   : > { %4255 = vmatmul.mubr.msk.f32.gmra.mrb[16].mxu1 %vm937_vm1, %v3531_v15  ;;  %v3478_v60 = vmin.f32 %v3446_v50, 6.0  ;;  %v3448_v10 = vmax.f32 %v3416_v63, 0.0  ;;  %v3418_v4 = vadd.f32 3.0, %v3386_v5  ;;  %v3539_v27 = vmul.f32 0.16666667, %v3507_v36 }
 0x47d   : > { %4257 = vmatprep.mubr.msk.f32.mxu1 %vm937_vm1, %v3532_v45  ;;  %v3509_v39 = vmul.f32 %v3477_v38, %v3381_v44  ;;  %v3479_v32 = vmin.f32 %v3447_v22, 6.0  ;;  %v3449_v29 = vmax.f32 %v3417_v47, 0.0  ;;  %v3419_v21 = vadd.f32 3.0, %v3387_v16  ;;  %v6934_v45 = vld [vmem:[%s7085_s11] ss:$0 sm:$0xff]  ;;  %v4320_v38 = vld [vmem:[%s4440_s28 + $0x30] sm:$0xff] }
 0x47e   : > { %v3540_v0 = vmul.f32 0.16666667, %v3508_v9  ;;  %v3510_v30 = vmul.f32 %v3478_v60, %v3382_v13  ;;  %v3480_v49 = vmin.f32 %v3448_v10, 6.0  ;;  %v3450_v48 = vmax.f32 %v3418_v4, 0.0  ;;  %v4321_v10 = vld [vmem:[%s4440_s28 + $0x48] sm:$0xff] }
 0x47f   : > { %v3541_v35 = vmul.f32 0.16666667, %v3509_v39  ;;  %v3511_v46 = vmul.f32 %v3479_v32, %v3383_v3  ;;  %v3481_v52 = vmin.f32 %v3449_v29, 6.0  ;;  %v3451_v1 = vmax.f32 %v3419_v21, 0.0 }
 0x480   : > { %4258 = vmatmul.mubr.msk.f32.gmra.mrb[18].mxu1 %vm937_vm1, %v3533_v7  ;;  %v3542_v61 = vmul.f32 0.16666667, %v3510_v30  ;;  %v3512_v43 = vmul.f32 %v3480_v49, %v3384_v14  ;;  %v3482_v58 = vmin.f32 %v3450_v48, 6.0  ;;  %v4316_v14 = vld [vmem:[%s4440_s28 + $0x10] sm:$0xff]  ;;  %v4323_v30 = vld [vmem:[%s4440_s28 + $0x58] sm:$0xff] }
 0x481   : > { %4260 = vmatprep.mubr.msk.f32.mxu1 %vm937_vm1, %v3534_v62  ;;  %v3543_v53 = vmul.f32 0.16666667, %v3511_v46  ;;  %v3513_v56 = vmul.f32 %v3481_v52, %v3385_v55  ;;  %v3483_v18 = vmin.f32 %v3451_v1, 6.0  ;;  %v4318_v55 = vld [vmem:[%s4440_s28 + $0x20] sm:$0xff]  ;;  %v4324_v48 = vld [vmem:[%s4440_s28 + $0x50] sm:$0xff] }
 0x482   : > { %v3544_v28 = vmul.f32 0.16666667, %v3512_v43  ;;  %v3514_v23 = vmul.f32 %v3482_v58, %v3386_v5  ;;  %v4325_v43 = vld [vmem:[%s4440_s28 + $0x68] sm:$0xff] }
 0x483   : > { %v3545_v15 = vmul.f32 0.16666667, %v3513_v56  ;;  %v3515_v31 = vmul.f32 %v3483_v18, %v3387_v16 }
 0x484   : > { %4261 = vmatmul.mubr.msk.f32.gmra.mrb[20].mxu1 %vm937_vm1, %v3535_v11  ;;  %v3546_v24 = vmul.f32 0.16666667, %v3514_v23 }
 0x485   : > { %4263 = vmatprep.mubr.msk.f32.mxu1 %vm937_vm1, %v3536_v19  ;;  %v3547_v44 = vmul.f32 0.16666667, %v3515_v31  ;;  %v4327_v31 = vld [vmem:[%s4440_s28 + $0x78] sm:$0xff] }
 0x488   : > { %4264 = vmatmul.mubr.msk.f32.gmra.mrb[22].mxu1 %vm937_vm1, %v3537_v42 }
 0x489   : > { %4266 = vmatprep.mubr.msk.f32.mxu1 %vm937_vm1, %v3538_v6  ;;  %v4319_v6 = vld [vmem:[%s4440_s28 + $0x38] sm:$0xff] }
 0x48c   : > { %4267 = vmatmul.mubr.msk.f32.gmra.mrb[24].mxu1 %vm937_vm1, %v3539_v27  ;;  %v4322_v27 = vld [vmem:[%s4440_s28 + $0x40] sm:$0xff] }
 0x48d   : > { %4269 = vmatprep.mubr.msk.f32.mxu1 %vm937_vm1, %v3540_v0 }
 0x490   : > { %4270 = vmatmul.mubr.msk.f32.gmra.mrb[26].mxu1 %vm937_vm1, %v3541_v35 }
 0x491   : > { %4272 = vmatprep.mubr.msk.f32.mxu1 %vm937_vm1, %v3542_v61 }
 0x494   : > { %4273 = vmatmul.mubr.msk.f32.gmra.mrb[28].mxu1 %vm937_vm1, %v3543_v53  ;;  %v4326_v53 = vld [vmem:[%s4440_s28 + $0x60] sm:$0xff] }
 0x495   : > { %4275 = vmatprep.mubr.msk.f32.mxu1 %vm937_vm1, %v3544_v28 }
 0x498   : > { %4276 = vmatmul.mubr.msk.f32.gmra.mrb[30].mxu1 %vm937_vm1, %v3545_v15 }
 0x499   : > { %4278 = vmatprep.mubr.msk.f32.mxu1 %vm937_vm1, %v3546_v24 }
 0x49c   : > { %4279 = vmatmul.mubr.msk.f32.gmra.mrb[32].mxu1 %vm937_vm1, %v3547_v44  ;;  %v4328_v44 = vld [vmem:[%s4440_s28 + $0x70] sm:$0xff] }
 0x533   : > { %v4235_v20 = vpop.f32.mrb[2].mxu1 }
 0x534   : > { %v3727_v8 = vadd.f32 %v4235_v20, %v6934_v45  ;;  %v3721_v13 = vpop.f32.mrb[3].mxu1 }
 0x535   : > { %v3722_v41 = vadd.f32 %v6934_v45, %v3721_v13 }
 0x536   : > { %v3881_v26 = vadd.f32 %v4313_v51, %v3727_v8 }
 0x537   : > { %v3880_v7 = vadd.f32 %v4314_v12, %v3722_v41  ;;  %v4238_v54 = vpop.f32.mrb[4].mxu1 }
 0x538   : > { %3913 = vst.msk [vmem:[%s6942_s17 + $0x8] sm:$0xff] %vm454_vm0, %v3881_v26  ;;  %v3737_v40 = vadd.f32 %v4238_v54, %v6934_v45  ;;  %v3731_v3 = vpop.f32.mrb[5].mxu1  ;;  %v4329_v26 = vld [vmem:[%s4440_s28 + $0x88] sm:$0xff] }
 0x539   : > { %3912 = vst.msk [vmem:[%s6942_s17] sm:$0xff] %vm454_vm0, %v3880_v7  ;;  %v3732_v62 = vadd.f32 %v6934_v45, %v3731_v3  ;;  %v4330_v7 = vld [vmem:[%s4440_s28 + $0x80] sm:$0xff] }
 0x53a   : > { %v3883_v37 = vadd.f32 %v4315_v59, %v3737_v40 }
 0x53b   : > { %v3882_v11 = vadd.f32 %v4316_v14, %v3732_v62  ;;  %v4241_v34 = vpop.f32.mrb[6].mxu1 }
 0x53c   : > { %3915 = vst.msk [vmem:[%s6942_s17 + $0x18] sm:$0xff] %vm454_vm0, %v3883_v37  ;;  %v3747_v25 = vadd.f32 %v4241_v34, %v6934_v45  ;;  %v3741_v57 = vpop.f32.mrb[7].mxu1  ;;  %v4331_v37 = vld [vmem:[%s4440_s28 + $0x98] sm:$0xff] }
 0x53d   : > { %3914 = vst.msk [vmem:[%s6942_s17 + $0x10] sm:$0xff] %vm454_vm0, %v3882_v11  ;;  %v3742_v19 = vadd.f32 %v6934_v45, %v3741_v57  ;;  %v4332_v11 = vld [vmem:[%s4440_s28 + $0x90] sm:$0xff] }
 0x53e   : > { %v3885_v2 = vadd.f32 %v4317_v17, %v3747_v25 }
 0x53f   : > { %v3884_v33 = vadd.f32 %v4318_v55, %v3742_v19  ;;  %v4244_v50 = vpop.f32.mrb[8].mxu1 }
 0x540   : > { %3917 = vst.msk [vmem:[%s6942_s17 + $0x28] sm:$0xff] %vm454_vm0, %v3885_v2  ;;  %v3757_v63 = vadd.f32 %v4244_v50, %v6934_v45  ;;  %v3751_v5 = vpop.f32.mrb[9].mxu1  ;;  %v4333_v2 = vld [vmem:[%s4440_s28 + $0xa8] sm:$0xff] }
 0x541   : > { %3916 = vst.msk [vmem:[%s6942_s17 + $0x20] sm:$0xff] %vm454_vm0, %v3884_v33  ;;  %v3752_v42 = vadd.f32 %v6934_v45, %v3751_v5  ;;  %v4334_v33 = vld [vmem:[%s4440_s28 + $0xa0] sm:$0xff] }
 0x542   : > { %v3887_v36 = vadd.f32 %v4319_v6, %v3757_v63 }
 0x543   : > { %v3886_v22 = vadd.f32 %v4320_v38, %v3752_v42  ;;  %v4247_v47 = vpop.f32.mrb[10].mxu1 }
 0x544   : > { %3919 = vst.msk [vmem:[%s6942_s17 + $0x38] sm:$0xff] %vm454_vm0, %v3887_v36  ;;  %v3767_v16 = vadd.f32 %v4247_v47, %v6934_v45  ;;  %v3761_v9 = vpop.f32.mrb[11].mxu1  ;;  %v4335_v36 = vld [vmem:[%s4440_s28 + $0xb8] sm:$0xff] }
 0x545   : > { %3918 = vst.msk [vmem:[%s6942_s17 + $0x30] sm:$0xff] %vm454_vm0, %v3886_v22  ;;  %v3762_v60 = vadd.f32 %v6934_v45, %v3761_v9  ;;  %v4336_v22 = vld [vmem:[%s4440_s28 + $0xb0] sm:$0xff] }
 0x546   : > { %v3889_v4 = vadd.f32 %v4321_v10, %v3767_v16 }
 0x547   : > { %v3888_v39 = vadd.f32 %v4322_v27, %v3762_v60  ;;  %v4250_v32 = vpop.f32.mrb[12].mxu1 }
 0x548   : > { %3921 = vst.msk [vmem:[%s6942_s17 + $0x48] sm:$0xff] %vm454_vm0, %v3889_v4  ;;  %v3777_v29 = vadd.f32 %v4250_v32, %v6934_v45  ;;  %v3771_v21 = vpop.f32.mrb[13].mxu1  ;;  %v4337_v4 = vld [vmem:[%s4440_s28 + $0xc8] sm:$0xff] }
 0x549   : > { %3920 = vst.msk [vmem:[%s6942_s17 + $0x40] sm:$0xff] %vm454_vm0, %v3888_v39  ;;  %v3772_v0 = vadd.f32 %v6934_v45, %v3771_v21  ;;  %v4338_v39 = vld [vmem:[%s4440_s28 + $0xc0] sm:$0xff] }
 0x54a   : > { %v3891_v49 = vadd.f32 %v4323_v30, %v3777_v29 }
 0x54b   : > { %v3890_v35 = vadd.f32 %v4324_v48, %v3772_v0  ;;  %v4253_v46 = vpop.f32.mrb[14].mxu1 }
 0x54c   : > { %3923 = vst.msk [vmem:[%s6942_s17 + $0x58] sm:$0xff] %vm454_vm0, %v3891_v49  ;;  %v3787_v52 = vadd.f32 %v4253_v46, %v6934_v45  ;;  %v3781_v1 = vpop.f32.mrb[15].mxu1  ;;  %v4339_v49 = vld [vmem:[%s4440_s28 + $0xd8] sm:$0xff] }
 0x54d   : > { %3922 = vst.msk [vmem:[%s6942_s17 + $0x50] sm:$0xff] %vm454_vm0, %v3890_v35  ;;  %v3782_v61 = vadd.f32 %v6934_v45, %v3781_v1  ;;  %v4340_v35 = vld [vmem:[%s4440_s28 + $0xd0] sm:$0xff] }
 0x54e   : > { %v3893_v58 = vadd.f32 %v4325_v43, %v3787_v52 }
 0x54f   : > { %v3892_v56 = vadd.f32 %v4326_v53, %v3782_v61  ;;  %v4256_v18 = vpop.f32.mrb[16].mxu1 }
 0x550   : > { %3925 = vst.msk [vmem:[%s6942_s17 + $0x68] sm:$0xff] %vm454_vm0, %v3893_v58  ;;  %v3797_v28 = vadd.f32 %v4256_v18, %v6934_v45  ;;  %v3791_v23 = vpop.f32.mrb[17].mxu1  ;;  %v4341_v58 = vld [vmem:[%s4440_s28 + $0xe8] sm:$0xff] }
 0x551   : > { %3924 = vst.msk [vmem:[%s6942_s17 + $0x60] sm:$0xff] %vm454_vm0, %v3892_v56  ;;  %v3792_v15 = vadd.f32 %v6934_v45, %v3791_v23  ;;  %v4342_v56 = vld [vmem:[%s4440_s28 + $0xe0] sm:$0xff] }
 0x552   : > { %v3895_v24 = vadd.f32 %v4327_v31, %v3797_v28 }
 0x553   : > { %v3894_v20 = vadd.f32 %v4328_v44, %v3792_v15  ;;  %v4259_v8 = vpop.f32.mrb[18].mxu1 }
 0x554   : > { %3927 = vst.msk [vmem:[%s6942_s17 + $0x78] sm:$0xff] %vm454_vm0, %v3895_v24  ;;  %v3807_v13 = vadd.f32 %v4259_v8, %v6934_v45  ;;  %v3801_v41 = vpop.f32.mrb[19].mxu1  ;;  %v4343_v24 = vld [vmem:[%s4440_s28 + $0xf8] sm:$0xff] }
 0x555   : > { %3926 = vst.msk [vmem:[%s6942_s17 + $0x70] sm:$0xff] %vm454_vm0, %v3894_v20  ;;  %v3802_v51 = vadd.f32 %v6934_v45, %v3801_v41  ;;  %v4344_v20 = vld [vmem:[%s4440_s28 + $0xf0] sm:$0xff] }
 0x556   : > { %v3897_v12 = vadd.f32 %v4329_v26, %v3807_v13 }
 0x557   : > { %v3896_v54 = vadd.f32 %v4330_v7, %v3802_v51  ;;  %v4262_v40 = vpop.f32.mrb[20].mxu1 }
 0x558   : > { %3929 = vst.msk [vmem:[%s6942_s17 + $0x88] sm:$0xff] %vm454_vm0, %v3897_v12  ;;  %v3817_v3 = vadd.f32 %v4262_v40, %v6934_v45  ;;  %v3811_v62 = vpop.f32.mrb[21].mxu1 }
 0x559   : > { %3928 = vst.msk [vmem:[%s6942_s17 + $0x80] sm:$0xff] %vm454_vm0, %v3896_v54  ;;  %v3812_v59 = vadd.f32 %v6934_v45, %v3811_v62 }
 0x55a   : > { %v3899_v14 = vadd.f32 %v4331_v37, %v3817_v3 }
 0x55b   : > { %v3898_v34 = vadd.f32 %v4332_v11, %v3812_v59  ;;  %v4265_v25 = vpop.f32.mrb[22].mxu1 }
 0x55c   : > { %3931 = vst.msk [vmem:[%s6942_s17 + $0x98] sm:$0xff] %vm454_vm0, %v3899_v14  ;;  %v3827_v57 = vadd.f32 %v4265_v25, %v6934_v45  ;;  %v3821_v19 = vpop.f32.mrb[23].mxu1 }
 0x55d   : > { %3930 = vst.msk [vmem:[%s6942_s17 + $0x90] sm:$0xff] %vm454_vm0, %v3898_v34  ;;  %v3822_v17 = vadd.f32 %v6934_v45, %v3821_v19 }
 0x55e   : > { %v3901_v55 = vadd.f32 %v4333_v2, %v3827_v57 }
 0x55f   : > { %v3900_v50 = vadd.f32 %v4334_v33, %v3822_v17  ;;  %v4268_v63 = vpop.f32.mrb[24].mxu1 }
 0x560   : > { %3933 = vst.msk [vmem:[%s6942_s17 + $0xa8] sm:$0xff] %vm454_vm0, %v3901_v55  ;;  %v3837_v5 = vadd.f32 %v4268_v63, %v6934_v45  ;;  %v3831_v42 = vpop.f32.mrb[25].mxu1 }
 0x561   : > { %3932 = vst.msk [vmem:[%s6942_s17 + $0xa0] sm:$0xff] %vm454_vm0, %v3900_v50  ;;  %v3832_v6 = vadd.f32 %v6934_v45, %v3831_v42 }
 0x562   : > { %v3903_v38 = vadd.f32 %v4335_v36, %v3837_v5 }
 0x563   : > { %v3902_v47 = vadd.f32 %v4336_v22, %v3832_v6  ;;  %v4271_v16 = vpop.f32.mrb[26].mxu1 }
 0x564   : > { %3935 = vst.msk [vmem:[%s6942_s17 + $0xb8] sm:$0xff] %vm454_vm0, %v3903_v38  ;;  %v3847_v9 = vadd.f32 %v4271_v16, %v6934_v45  ;;  %v3841_v60 = vpop.f32.mrb[27].mxu1 }
 0x565   : > { %3934 = vst.msk [vmem:[%s6942_s17 + $0xb0] sm:$0xff] %vm454_vm0, %v3902_v47  ;;  %v3842_v10 = vadd.f32 %v6934_v45, %v3841_v60 }
 0x566   : > { %v3905_v27 = vadd.f32 %v4337_v4, %v3847_v9 }
 0x567   : > { %v3904_v32 = vadd.f32 %v4338_v39, %v3842_v10  ;;  %v4274_v29 = vpop.f32.mrb[28].mxu1 }
 0x568   : > { %3937 = vst.msk [vmem:[%s6942_s17 + $0xc8] sm:$0xff] %vm454_vm0, %v3905_v27  ;;  %v3857_v21 = vadd.f32 %v4274_v29, %v6934_v45  ;;  %v3851_v0 = vpop.f32.mrb[29].mxu1 }
 0x569   : > { %3936 = vst.msk [vmem:[%s6942_s17 + $0xc0] sm:$0xff] %vm454_vm0, %v3904_v32  ;;  %v3852_v30 = vadd.f32 %v6934_v45, %v3851_v0 }
 0x56a   : > { %v3907_v48 = vadd.f32 %v4339_v49, %v3857_v21 }
 0x56b   : > { %v3906_v46 = vadd.f32 %v4340_v35, %v3852_v30  ;;  %v4277_v52 = vpop.f32.mrb[30].mxu1 }
 0x56c   : > { %3939 = vst.msk [vmem:[%s6942_s17 + $0xd8] sm:$0xff] %vm454_vm0, %v3907_v48  ;;  %v3867_v1 = vadd.f32 %v4277_v52, %v6934_v45  ;;  %v3861_v61 = vpop.f32.mrb[31].mxu1 }
 0x56d   : > { %3938 = vst.msk [vmem:[%s6942_s17 + $0xd0] sm:$0xff] %vm454_vm0, %v3906_v46  ;;  %v3862_v43 = vadd.f32 %v6934_v45, %v3861_v61 }
 0x56e   : > { %v3909_v53 = vadd.f32 %v4341_v58, %v3867_v1 }
 0x56f   : > { %v3908_v18 = vadd.f32 %v4342_v56, %v3862_v43  ;;  %v4280_v28 = vpop.f32.mrb[32].mxu1 }
 0x570   : > { %3941 = vst.msk [vmem:[%s6942_s17 + $0xe8] sm:$0xff] %vm454_vm0, %v3909_v53  ;;  %v3877_v23 = vadd.f32 %v4280_v28, %v6934_v45  ;;  %v3871_v15 = vpop.f32.mrb[33].mxu1 }
 0x571   : > { %3940 = vst.msk [vmem:[%s6942_s17 + $0xe0] sm:$0xff] %vm454_vm0, %v3908_v18  ;;  %v3872_v31 = vadd.f32 %v6934_v45, %v3871_v15 }
 0x572   : > { %v3911_v44 = vadd.f32 %v4343_v24, %v3877_v23 }
 0x573   : > { %v3910_v8 = vadd.f32 %v4344_v20, %v3872_v31 }
 0x574   : > { %3943 = vst.msk [vmem:[%s6942_s17 + $0xf8] sm:$0xff] %vm454_vm0, %v3911_v44 }
 0x575   : > { %3942 = vst.msk [vmem:[%s6942_s17 + $0xf0] sm:$0xff] %vm454_vm0, %v3910_v8 }
 0x576 PF: > { %s22_s21 = sadd.s32 1, %s4351_s21  }
 0x577   : > { %p19_p4 = scmp.ge.s32.totalorder %s22_s21, 4  }
 0x579   :  { %21 = sbr.rel (!%p19_p4) target bundleno = 1 (0x1), region = 99 }

</bundles_post_ra>
